<compile_context>
chip_gen: v7x
topology: tpu7x:2x2x1
jax: 0.10.0
libtpu: 0.0.40
codegen_flags: <defaults>
</compile_context>

<pallas_src>
import numpy as np

import jax
import jax.numpy as jnp
from jax import lax
from jax.experimental import pallas as pl
from jax.experimental.pallas import tpu as pltpu

_LANES = 128


# ------------------------- static index / permutation constants -------------

def _conv1_patch_indices():
    # conv1 im2col rows ordered as q*144 + ph*12 + pw, where q = 2x2-pool
    # member (qh, qw) and (ph, pw) raster the 12x12 pooled grid.  This makes
    # pool1 a max over 4 contiguous, 8-aligned 144-row blocks inside the kernel.
    r = np.arange(576)
    q, rem = r // 144, r % 144
    ph, pw = rem // 12, rem % 12
    qh, qw = q // 2, q % 2
    oh = 2 * ph + qh                       # conv1 output row (0..23)
    ow = 2 * pw + qw                       # conv1 output col (0..23)
    k = np.arange(25)
    ki, kj = k // 5, k % 5
    h_idx = (oh[:, None] + ki[None, :]).astype(np.int32)   # (576, 25)
    w_idx = (ow[:, None] + kj[None, :]).astype(np.int32)   # (576, 25)
    return h_idx, w_idx


_H_IDX, _W_IDX = _conv1_patch_indices()


def _pool2_permutation():
    # Pm2 @ a2 reorders conv2 raster rows (oy*8+ox) into pool-member blocks
    # q*16 + py*4 + px, so pool2 becomes 3 maxes of contiguous 16-row slices.
    pm = np.zeros((64, 64), np.float32)
    for q in range(4):
        qy, qx = q // 2, q % 2
        for py in range(4):
            for px in range(4):
                dst = q * 16 + py * 4 + px
                src = (2 * py + qy) * 8 + (2 * px + qx)
                pm[dst, src] = 1.0
    return pm


_PM2_NP = _pool2_permutation()


# --------------------------------- kernel -----------------------------------

def _lenet_kernel(p1_ref, w1_ref, b1_ref, w2_ref, b2_ref, pm2_ref,
                  wf1_ref, bf1_ref, wf2_ref, bf2_ref, wf3_ref, bf3_ref,
                  out_ref, m1_ref, m2_ref):
    f32 = jnp.float32

    # conv1 + bias + relu : one MXU matmul on pre-ordered patches (576,32)x(32,128)
    a1 = jnp.dot(p1_ref[0], w1_ref[...], preferred_element_type=f32)
    a1 = jnp.maximum(a1 + b1_ref[...], 0.0)                     # (576, 128)

    # pool1 : rows grouped per 2x2-window member -> 3 contiguous maxes
    m1_ref[...] = jnp.maximum(jnp.maximum(a1[0:144], a1[144:288]),
                              jnp.maximum(a1[288:432], a1[432:576]))  # (144,128)

    # conv2 + bias + relu : im2col built in VMEM from the pooled 12x12 map.
    # Output rows in conv2 raster order (oy*8 + ox), channels in lanes.
    a2 = jnp.zeros((64, _LANES), f32)
    for i in range(5):
        for j in range(5):
            rows = [m1_ref[(oy + i) * 12 + j:(oy + i) * 12 + j + 8, :]
                    for oy in range(8)]
            g = jnp.concatenate(rows, axis=0)                   # (64, 128)
            a2 = a2 + jnp.dot(g, w2_ref[i * 5 + j],
                              preferred_element_type=f32)
    a2 = jnp.maximum(a2 + b2_ref[...], 0.0)                     # (64, 128)

    # pool2 : constant 0/1 permutation matmul -> 3 contiguous maxes
    a2p = jnp.dot(pm2_ref[...], a2, preferred_element_type=f32)  # (64, 128)
    m2_ref[...] = jnp.maximum(jnp.maximum(a2p[0:16], a2p[16:32]),
                              jnp.maximum(a2p[32:48], a2p[48:64]))  # (16, 128)

    # flatten : lane index = s*128 + c ; the PyTorch NCHW (c*16 + s) ordering
    # is folded into the fc1 weight layout in prepare_params().
    flat = jnp.concatenate([m2_ref[s:s + 1, :] for s in range(16)],
                           axis=1)                              # (1, 2048)

    # fc1 -> fc2 -> fc3 (all lane-padded to 128 outputs)
    y = jnp.dot(flat, wf1_ref[...], preferred_element_type=f32) + bf1_ref[...]
    y = jnp.maximum(y, 0.0)
    y = jnp.dot(y, wf2_ref[...], preferred_element_type=f32) + bf2_ref[...]
    y = jnp.maximum(y, 0.0)
    y = jnp.dot(y, wf3_ref[...], preferred_element_type=f32) + bf3_ref[...]

    out_ref[0] = jnp.broadcast_to(y, (8, _LANES))


# ------------------------- one-time parameter prep --------------------------

def prepare_params(p):
    """Hoisted re-layout: pad/transpose all weights once (K multiple of 8,
    output lanes padded to 128, PyTorch NCHW flatten folded into fc1)."""
    f32 = jnp.float32

    # conv1: (6,1,5,5) -> (32, 128), row k = i*5+j, col = out channel
    w1 = p["conv1_w"].astype(f32).reshape(6, 25).T
    w1p = jnp.zeros((32, _LANES), f32).at[:25, :6].set(w1)
    b1p = jnp.zeros((1, _LANES), f32).at[0, :6].set(p["conv1_b"].astype(f32))

    # conv2: (16,6,5,5) -> (25, 128, 128): [tap k][in channel c][out channel o]
    w2 = jnp.transpose(p["conv2_w"].astype(f32), (2, 3, 1, 0)).reshape(25, 6, 16)
    w2p = jnp.zeros((25, _LANES, _LANES), f32).at[:, :6, :16].set(w2)
    b2p = jnp.zeros((1, _LANES), f32).at[0, :16].set(p["conv2_b"].astype(f32))

    # fc1: (120, 256) with torch flat index c*16+s  ->  (2048, 128) rows s*128+c
    wf1 = jnp.transpose(p["fc1_w"].astype(f32).reshape(120, 16, 16), (2, 1, 0))
    wf1p = jnp.zeros((16, _LANES, _LANES), f32).at[:, :16, :120].set(wf1)
    wf1p = wf1p.reshape(16 * _LANES, _LANES)
    bf1p = jnp.zeros((1, _LANES), f32).at[0, :120].set(p["fc1_b"].astype(f32))

    wf2p = jnp.zeros((_LANES, _LANES), f32).at[:120, :84].set(p["fc2_w"].astype(f32).T)
    bf2p = jnp.zeros((1, _LANES), f32).at[0, :84].set(p["fc2_b"].astype(f32))
    wf3p = jnp.zeros((_LANES, _LANES), f32).at[:84, :10].set(p["fc3_w"].astype(f32).T)
    bf3p = jnp.zeros((1, _LANES), f32).at[0, :10].set(p["fc3_b"].astype(f32))

    return dict(w1=w1p, b1=b1p, w2=w2p, b2=b2p, pm2=jnp.asarray(_PM2_NP),
                wf1=wf1p, bf1=bf1p, wf2=wf2p, bf2=bf2p, wf3=wf3p, bf3=bf3p)


# ------------------------------- forward pass --------------------------------

def convnet_forward(x_nchw, prepped):
    N = x_nchw.shape[0]
    x2 = x_nchw[:, 0].astype(jnp.float32)                # (N, 28, 28)
    # conv1 im2col (pool-ordered rows), K padded 25 -> 32.
    patches = x2[:, _H_IDX, _W_IDX]                      # (N, 576, 25)
    patches = jnp.pad(patches, ((0, 0), (0, 0), (0, 7))) # (N, 576, 32)

    args = (patches, prepped["w1"], prepped["b1"], prepped["w2"], prepped["b2"],
            prepped["pm2"], prepped["wf1"], prepped["bf1"], prepped["wf2"],
            prepped["bf2"], prepped["wf3"], prepped["bf3"])

    flops_per_img = 2 * (576 * 32 * 128 + 25 * 64 * 128 * 128 + 64 * 64 * 128
                         + 2048 * 128 + 128 * 128 + 128 * 128)
    bytes_accessed = 4 * (sum(int(a.size) for a in args) + N * 8 * _LANES)

    out = pl.pallas_call(
        _lenet_kernel,
        out_shape=jax.ShapeDtypeStruct((N, 8, _LANES), jnp.float32),
        grid=(N,),
        in_specs=[
            pl.BlockSpec((1, 576, 32), lambda n: (n, 0, 0)),       # patches
            pl.BlockSpec((32, _LANES), lambda n: (0, 0)),          # w1
            pl.BlockSpec((1, _LANES), lambda n: (0, 0)),           # b1
            pl.BlockSpec((25, _LANES, _LANES), lambda n: (0, 0, 0)),  # w2
            pl.BlockSpec((1, _LANES), lambda n: (0, 0)),           # b2
            pl.BlockSpec((64, 64), lambda n: (0, 0)),              # pool2 perm
            pl.BlockSpec((16 * _LANES, _LANES), lambda n: (0, 0)), # fc1 w
            pl.BlockSpec((1, _LANES), lambda n: (0, 0)),           # fc1 b
            pl.BlockSpec((_LANES, _LANES), lambda n: (0, 0)),      # fc2 w
            pl.BlockSpec((1, _LANES), lambda n: (0, 0)),           # fc2 b
            pl.BlockSpec((_LANES, _LANES), lambda n: (0, 0)),      # fc3 w
            pl.BlockSpec((1, _LANES), lambda n: (0, 0)),           # fc3 b
        ],
        out_specs=pl.BlockSpec((1, 8, _LANES), lambda n: (n, 0, 0)),
        scratch_shapes=[pltpu.VMEM((144, _LANES), jnp.float32),    # pooled conv1
                        pltpu.VMEM((16, _LANES), jnp.float32)],    # pooled conv2
        compiler_params=pltpu.CompilerParams(
            dimension_semantics=("parallel",),
            vmem_limit_bytes=32 * 1024 * 1024),
        cost_estimate=pl.CostEstimate(flops=N * flops_per_img,
                                      transcendentals=0,
                                      bytes_accessed=bytes_accessed),
    )(*args)
    return out[:, 0, :10]


# ----------------------------- params / reference ----------------------------

def init_params(key):
    def uinit(k, shape, fan_in):
        bound = 1.0 / jnp.sqrt(fan_in)
        return jax.random.uniform(k, shape, jnp.float32, -bound, bound)

    ks = jax.random.split(key, 10)
    return {
        "conv1_w": uinit(ks[0], (6, 1, 5, 5), 1 * 5 * 5),
        "conv1_b": uinit(ks[1], (6,), 1 * 5 * 5),
        "conv2_w": uinit(ks[2], (16, 6, 5, 5), 6 * 5 * 5),
        "conv2_b": uinit(ks[3], (16,), 6 * 5 * 5),
        "fc1_w": uinit(ks[4], (120, 256), 256),
        "fc1_b": uinit(ks[5], (120,), 256),
        "fc2_w": uinit(ks[6], (84, 120), 120),
        "fc2_b": uinit(ks[7], (84,), 120),
        "fc3_w": uinit(ks[8], (10, 84), 84),
        "fc3_b": uinit(ks[9], (10,), 84),
    }


def reference_forward(x, p):
    # Pure-JAX reference with PyTorch semantics (full-precision matmuls).
    prec = lax.Precision.HIGHEST

    def conv(x, w, b):
        y = lax.conv_general_dilated(
            x, w, window_strides=(1, 1), padding="VALID",
            dimension_numbers=("NCHW", "OIHW", "NCHW"), precision=prec)
        return y + b[None, :, None, None]

    def pool(x):
        return lax.reduce_window(x, -jnp.inf, lax.max,
                                 (1, 1, 2, 2), (1, 1, 2, 2), "VALID")

    x = pool(jax.nn.relu(conv(x, p["conv1_w"], p["conv1_b"])))
    x = pool(jax.nn.relu(conv(x, p["conv2_w"], p["conv2_b"])))
    x = x.reshape(x.shape[0], -1)
    x = jax.nn.relu(jnp.dot(x, p["fc1_w"].T, precision=prec) + p["fc1_b"])
    x = jax.nn.relu(jnp.dot(x, p["fc2_w"].T, precision=prec) + p["fc2_b"])
    return jnp.dot(x, p["fc3_w"].T, precision=prec) + p["fc3_b"]


if __name__ == "__main__":
    key = jax.random.PRNGKey(0)
    kx, kp = jax.random.split(key)
    x = jax.random.normal(kx, (2, 1, 28, 28), jnp.float32)   # LeNet-5 input
    params = init_params(kp)

    prepped = prepare_params(params)           # one-time weight re-layout
    fwd = jax.jit(convnet_forward)

    out = jax.block_until_ready(fwd(x, prepped))
    ref = jax.block_until_ready(reference_forward(x, params))

    assert out.shape == (2, 10), out.shape
    max_err = float(jnp.max(jnp.abs(out - ref)))
    # Tolerance covers f32 MXU pass-ordering differences across TPU generations;
    # any indexing/layout bug would produce O(1) errors.
    assert jnp.allclose(out, ref, rtol=1e-3, atol=1e-3), max_err
    print("KERNEL_OK")
</pallas_src>

<mosaic_0001>
module attributes {stable_mosaic.version = 11 : i64} {
  func.func @_lenet_kernel(%arg0: i32, %arg1: memref<1x576x32xf32, #tpu.memory_space<vmem>>, %arg2: memref<32x128xf32, #tpu.memory_space<vmem>>, %arg3: memref<1x128xf32, #tpu.memory_space<vmem>>, %arg4: memref<25x128x128xf32, #tpu.memory_space<vmem>>, %arg5: memref<1x128xf32, #tpu.memory_space<vmem>>, %arg6: memref<64x64xf32, #tpu.memory_space<vmem>>, %arg7: memref<2048x128xf32, #tpu.memory_space<vmem>>, %arg8: memref<1x128xf32, #tpu.memory_space<vmem>>, %arg9: memref<128x128xf32, #tpu.memory_space<vmem>>, %arg10: memref<1x128xf32, #tpu.memory_space<vmem>>, %arg11: memref<128x128xf32, #tpu.memory_space<vmem>>, %arg12: memref<1x128xf32, #tpu.memory_space<vmem>>, %arg13: memref<1x8x128xf32, #tpu.memory_space<vmem>>, %arg14: memref<144x128xf32, #tpu.memory_space<vmem>>, %arg15: memref<16x128xf32, #tpu.memory_space<vmem>>) attributes {dimension_semantics = [#tpu.dimension_semantics<parallel>], iteration_bounds = array<i64: 2>, scalar_prefetch = 0 : i64, scratch_operands = 2 : i64, tpu.core_type = #tpu.core_type<tc>, window_params = [{transform_indices = @transform_0, window_bounds = array<i64: 1, 576, 32>}, {pipeline_mode = #tpu.pipeline_mode<synchronous>, transform_indices = @transform_1, window_bounds = array<i64: 32, 128>}, {pipeline_mode = #tpu.pipeline_mode<synchronous>, transform_indices = @transform_2, window_bounds = array<i64: 1, 128>}, {pipeline_mode = #tpu.pipeline_mode<synchronous>, transform_indices = @transform_3, window_bounds = array<i64: 25, 128, 128>}, {pipeline_mode = #tpu.pipeline_mode<synchronous>, transform_indices = @transform_4, window_bounds = array<i64: 1, 128>}, {pipeline_mode = #tpu.pipeline_mode<synchronous>, transform_indices = @transform_5, window_bounds = array<i64: 64, 64>}, {pipeline_mode = #tpu.pipeline_mode<synchronous>, transform_indices = @transform_6, window_bounds = array<i64: 2048, 128>}, {pipeline_mode = #tpu.pipeline_mode<synchronous>, transform_indices = @transform_7, window_bounds = array<i64: 1, 128>}, {pipeline_mode = #tpu.pipeline_mode<synchronous>, transform_indices = @transform_8, window_bounds = array<i64: 128, 128>}, {pipeline_mode = #tpu.pipeline_mode<synchronous>, transform_indices = @transform_9, window_bounds = array<i64: 1, 128>}, {pipeline_mode = #tpu.pipeline_mode<synchronous>, transform_indices = @transform_10, window_bounds = array<i64: 128, 128>}, {pipeline_mode = #tpu.pipeline_mode<synchronous>, transform_indices = @transform_11, window_bounds = array<i64: 1, 128>}, {transform_indices = @transform_12, window_bounds = array<i64: 1, 8, 128>}]} {
    %c0 = arith.constant 0 : index
    %c0_0 = arith.constant 0 : index
    %c0_1 = arith.constant 0 : index
    %0 = vector.load %arg1[%c0, %c0_0, %c0_1] : memref<1x576x32xf32, #tpu.memory_space<vmem>>, vector<1x576x32xf32>
    %1 = vector.shape_cast %0 : vector<1x576x32xf32> to vector<576x32xf32>
    %c0_2 = arith.constant 0 : index
    %c0_3 = arith.constant 0 : index
    %2 = vector.load %arg2[%c0_2, %c0_3] : memref<32x128xf32, #tpu.memory_space<vmem>>, vector<32x128xf32>
    %cst = arith.constant dense<0.000000e+00> : vector<576x128xf32>
    %3 = tpu.matmul %1, %2, %cst {dimension_numbers = #tpu.dot_dimension_numbers<[1], [0], [0], [1], [0, 0, 1, 1], [], []>} : vector<576x32xf32>, vector<32x128xf32>, vector<576x128xf32> -> vector<576x128xf32>
    %c0_4 = arith.constant 0 : index
    %c0_5 = arith.constant 0 : index
    %4 = vector.load %arg3[%c0_4, %c0_5] : memref<1x128xf32, #tpu.memory_space<vmem>>, vector<1x128xf32>
    %5 = vector.broadcast %4 : vector<1x128xf32> to vector<576x128xf32>
    %6 = arith.addf %3, %5 : vector<576x128xf32>
    %cst_6 = arith.constant 0.000000e+00 : f32
    %7 = vector.broadcast %cst_6 : f32 to vector<576x128xf32>
    %8 = arith.maximumf %6, %7 : vector<576x128xf32>
    %9 = vector.extract_strided_slice %8 {offsets = [0, 0], sizes = [144, 128], strides = [1, 1]} : vector<576x128xf32> to vector<144x128xf32>
    %10 = vector.extract_strided_slice %8 {offsets = [144, 0], sizes = [144, 128], strides = [1, 1]} : vector<576x128xf32> to vector<144x128xf32>
    %11 = arith.maximumf %9, %10 : vector<144x128xf32>
    %12 = vector.extract_strided_slice %8 {offsets = [288, 0], sizes = [144, 128], strides = [1, 1]} : vector<576x128xf32> to vector<144x128xf32>
    %13 = vector.extract_strided_slice %8 {offsets = [432, 0], sizes = [144, 128], strides = [1, 1]} : vector<576x128xf32> to vector<144x128xf32>
    %14 = arith.maximumf %12, %13 : vector<144x128xf32>
    %15 = arith.maximumf %11, %14 : vector<144x128xf32>
    %c0_7 = arith.constant 0 : index
    %c0_8 = arith.constant 0 : index
    %16 = vector.load %arg14[%c0_7, %c0_8] : memref<144x128xf32, #tpu.memory_space<vmem>>, vector<144x128xf32>
    tpu.vector_store %arg14[%c0_7, %c0_8], %15 {strides = array<i32>} : memref<144x128xf32, #tpu.memory_space<vmem>>, vector<144x128xf32>,
    %cst_9 = arith.constant 0.000000e+00 : f32
    %17 = vector.broadcast %cst_9 : f32 to vector<64x128xf32>
    %c0_10 = arith.constant 0 : index
    %c0_11 = arith.constant 0 : index
    %18 = vector.load %arg14[%c0_10, %c0_11] : memref<144x128xf32, #tpu.memory_space<vmem>>, vector<8x128xf32>
    %c12 = arith.constant 12 : index
    %c0_12 = arith.constant 0 : index
    %19 = vector.load %arg14[%c12, %c0_12] : memref<144x128xf32, #tpu.memory_space<vmem>>, vector<8x128xf32>
    %c24 = arith.constant 24 : index
    %c0_13 = arith.constant 0 : index
    %20 = vector.load %arg14[%c24, %c0_13] : memref<144x128xf32, #tpu.memory_space<vmem>>, vector<8x128xf32>
    %c36 = arith.constant 36 : index
    %c0_14 = arith.constant 0 : index
    %21 = vector.load %arg14[%c36, %c0_14] : memref<144x128xf32, #tpu.memory_space<vmem>>, vector<8x128xf32>
    %c48 = arith.constant 48 : index
    %c0_15 = arith.constant 0 : index
    %22 = vector.load %arg14[%c48, %c0_15] : memref<144x128xf32, #tpu.memory_space<vmem>>, vector<8x128xf32>
    %c60 = arith.constant 60 : index
    %c0_16 = arith.constant 0 : index
    %23 = vector.load %arg14[%c60, %c0_16] : memref<144x128xf32, #tpu.memory_space<vmem>>, vector<8x128xf32>
    %c72 = arith.constant 72 : index
    %c0_17 = arith.constant 0 : index
    %24 = vector.load %arg14[%c72, %c0_17] : memref<144x128xf32, #tpu.memory_space<vmem>>, vector<8x128xf32>
    %c84 = arith.constant 84 : index
    %c0_18 = arith.constant 0 : index
    %25 = vector.load %arg14[%c84, %c0_18] : memref<144x128xf32, #tpu.memory_space<vmem>>, vector<8x128xf32>
    %26 = tpu.concatenate %18, %19, %20, %21, %22, %23, %24, %25 in 0 : vector<8x128xf32>, vector<8x128xf32>, vector<8x128xf32>, vector<8x128xf32>, vector<8x128xf32>, vector<8x128xf32>, vector<8x128xf32>, vector<8x128xf32> -> vector<64x128xf32>
    %c0_19 = arith.constant 0 : index
    %c0_20 = arith.constant 0 : index
    %c0_21 = arith.constant 0 : index
    %27 = vector.load %arg4[%c0_19, %c0_20, %c0_21] : memref<25x128x128xf32, #tpu.memory_space<vmem>>, vector<1x128x128xf32>
    %28 = vector.shape_cast %27 : vector<1x128x128xf32> to vector<128x128xf32>
    %cst_22 = arith.constant dense<0.000000e+00> : vector<64x128xf32>
    %29 = tpu.matmul %26, %28, %cst_22 {dimension_numbers = #tpu.dot_dimension_numbers<[1], [0], [0], [1], [0, 0, 1, 1], [], []>} : vector<64x128xf32>, vector<128x128xf32>, vector<64x128xf32> -> vector<64x128xf32>
    %30 = arith.addf %17, %29 : vector<64x128xf32>
    %c1 = arith.constant 1 : index
    %c0_23 = arith.constant 0 : index
    %31 = vector.load %arg14[%c1, %c0_23] : memref<144x128xf32, #tpu.memory_space<vmem>>, vector<8x128xf32>
    %c13 = arith.constant 13 : index
    %c0_24 = arith.constant 0 : index
    %32 = vector.load %arg14[%c13, %c0_24] : memref<144x128xf32, #tpu.memory_space<vmem>>, vector<8x128xf32>
    %c25 = arith.constant 25 : index
    %c0_25 = arith.constant 0 : index
    %33 = vector.load %arg14[%c25, %c0_25] : memref<144x128xf32, #tpu.memory_space<vmem>>, vector<8x128xf32>
    %c37 = arith.constant 37 : index
    %c0_26 = arith.constant 0 : index
    %34 = vector.load %arg14[%c37, %c0_26] : memref<144x128xf32, #tpu.memory_space<vmem>>, vector<8x128xf32>
    %c49 = arith.constant 49 : index
    %c0_27 = arith.constant 0 : index
    %35 = vector.load %arg14[%c49, %c0_27] : memref<144x128xf32, #tpu.memory_space<vmem>>, vector<8x128xf32>
    %c61 = arith.constant 61 : index
    %c0_28 = arith.constant 0 : index
    %36 = vector.load %arg14[%c61, %c0_28] : memref<144x128xf32, #tpu.memory_space<vmem>>, vector<8x128xf32>
    %c73 = arith.constant 73 : index
    %c0_29 = arith.constant 0 : index
    %37 = vector.load %arg14[%c73, %c0_29] : memref<144x128xf32, #tpu.memory_space<vmem>>, vector<8x128xf32>
    %c85 = arith.constant 85 : index
    %c0_30 = arith.constant 0 : index
    %38 = vector.load %arg14[%c85, %c0_30] : memref<144x128xf32, #tpu.memory_space<vmem>>, vector<8x128xf32>
    %39 = tpu.concatenate %31, %32, %33, %34, %35, %36, %37, %38 in 0 : vector<8x128xf32>, vector<8x128xf32>, vector<8x128xf32>, vector<8x128xf32>, vector<8x128xf32>, vector<8x128xf32>, vector<8x128xf32>, vector<8x128xf32> -> vector<64x128xf32>
    %c1_31 = arith.constant 1 : index
    %c0_32 = arith.constant 0 : index
    %c0_33 = arith.constant 0 : index
    %40 = vector.load %arg4[%c1_31, %c0_32, %c0_33] : memref<25x128x128xf32, #tpu.memory_space<vmem>>, vector<1x128x128xf32>
    %41 = vector.shape_cast %40 : vector<1x128x128xf32> to vector<128x128xf32>
    %cst_34 = arith.constant dense<0.000000e+00> : vector<64x128xf32>
    %42 = tpu.matmul %39, %41, %cst_34 {dimension_numbers = #tpu.dot_dimension_numbers<[1], [0], [0], [1], [0, 0, 1, 1], [], []>} : vector<64x128xf32>, vector<128x128xf32>, vector<64x128xf32> -> vector<64x128xf32>
    %43 = arith.addf %30, %42 : vector<64x128xf32>
    %c2 = arith.constant 2 : index
    %c0_35 = arith.constant 0 : index
    %44 = vector.load %arg14[%c2, %c0_35] : memref<144x128xf32, #tpu.memory_space<vmem>>, vector<8x128xf32>
    %c14 = arith.constant 14 : index
    %c0_36 = arith.constant 0 : index
    %45 = vector.load %arg14[%c14, %c0_36] : memref<144x128xf32, #tpu.memory_space<vmem>>, vector<8x128xf32>
    %c26 = arith.constant 26 : index
    %c0_37 = arith.constant 0 : index
    %46 = vector.load %arg14[%c26, %c0_37] : memref<144x128xf32, #tpu.memory_space<vmem>>, vector<8x128xf32>
    %c38 = arith.constant 38 : index
    %c0_38 = arith.constant 0 : index
    %47 = vector.load %arg14[%c38, %c0_38] : memref<144x128xf32, #tpu.memory_space<vmem>>, vector<8x128xf32>
    %c50 = arith.constant 50 : index
    %c0_39 = arith.constant 0 : index
    %48 = vector.load %arg14[%c50, %c0_39] : memref<144x128xf32, #tpu.memory_space<vmem>>, vector<8x128xf32>
    %c62 = arith.constant 62 : index
    %c0_40 = arith.constant 0 : index
    %49 = vector.load %arg14[%c62, %c0_40] : memref<144x128xf32, #tpu.memory_space<vmem>>, vector<8x128xf32>
    %c74 = arith.constant 74 : index
    %c0_41 = arith.constant 0 : index
    %50 = vector.load %arg14[%c74, %c0_41] : memref<144x128xf32, #tpu.memory_space<vmem>>, vector<8x128xf32>
    %c86 = arith.constant 86 : index
    %c0_42 = arith.constant 0 : index
    %51 = vector.load %arg14[%c86, %c0_42] : memref<144x128xf32, #tpu.memory_space<vmem>>, vector<8x128xf32>
    %52 = tpu.concatenate %44, %45, %46, %47, %48, %49, %50, %51 in 0 : vector<8x128xf32>, vector<8x128xf32>, vector<8x128xf32>, vector<8x128xf32>, vector<8x128xf32>, vector<8x128xf32>, vector<8x128xf32>, vector<8x128xf32> -> vector<64x128xf32>
    %c2_43 = arith.constant 2 : index
    %c0_44 = arith.constant 0 : index
    %c0_45 = arith.constant 0 : index
    %53 = vector.load %arg4[%c2_43, %c0_44, %c0_45] : memref<25x128x128xf32, #tpu.memory_space<vmem>>, vector<1x128x128xf32>
    %54 = vector.shape_cast %53 : vector<1x128x128xf32> to vector<128x128xf32>
    %cst_46 = arith.constant dense<0.000000e+00> : vector<64x128xf32>
    %55 = tpu.matmul %52, %54, %cst_46 {dimension_numbers = #tpu.dot_dimension_numbers<[1], [0], [0], [1], [0, 0, 1, 1], [], []>} : vector<64x128xf32>, vector<128x128xf32>, vector<64x128xf32> -> vector<64x128xf32>
    %56 = arith.addf %43, %55 : vector<64x128xf32>
    %c3 = arith.constant 3 : index
    %c0_47 = arith.constant 0 : index
    %57 = vector.load %arg14[%c3, %c0_47] : memref<144x128xf32, #tpu.memory_space<vmem>>, vector<8x128xf32>
    %c15 = arith.constant 15 : index
    %c0_48 = arith.constant 0 : index
    %58 = vector.load %arg14[%c15, %c0_48] : memref<144x128xf32, #tpu.memory_space<vmem>>, vector<8x128xf32>
    %c27 = arith.constant 27 : index
    %c0_49 = arith.constant 0 : index
    %59 = vector.load %arg14[%c27, %c0_49] : memref<144x128xf32, #tpu.memory_space<vmem>>, vector<8x128xf32>
    %c39 = arith.constant 39 : index
    %c0_50 = arith.constant 0 : index
    %60 = vector.load %arg14[%c39, %c0_50] : memref<144x128xf32, #tpu.memory_space<vmem>>, vector<8x128xf32>
    %c51 = arith.constant 51 : index
    %c0_51 = arith.constant 0 : index
    %61 = vector.load %arg14[%c51, %c0_51] : memref<144x128xf32, #tpu.memory_space<vmem>>, vector<8x128xf32>
    %c63 = arith.constant 63 : index
    %c0_52 = arith.constant 0 : index
    %62 = vector.load %arg14[%c63, %c0_52] : memref<144x128xf32, #tpu.memory_space<vmem>>, vector<8x128xf32>
    %c75 = arith.constant 75 : index
    %c0_53 = arith.constant 0 : index
    %63 = vector.load %arg14[%c75, %c0_53] : memref<144x128xf32, #tpu.memory_space<vmem>>, vector<8x128xf32>
    %c87 = arith.constant 87 : index
    %c0_54 = arith.constant 0 : index
    %64 = vector.load %arg14[%c87, %c0_54] : memref<144x128xf32, #tpu.memory_space<vmem>>, vector<8x128xf32>
    %65 = tpu.concatenate %57, %58, %59, %60, %61, %62, %63, %64 in 0 : vector<8x128xf32>, vector<8x128xf32>, vector<8x128xf32>, vector<8x128xf32>, vector<8x128xf32>, vector<8x128xf32>, vector<8x128xf32>, vector<8x128xf32> -> vector<64x128xf32>
    %c3_55 = arith.constant 3 : index
    %c0_56 = arith.constant 0 : index
    %c0_57 = arith.constant 0 : index
    %66 = vector.load %arg4[%c3_55, %c0_56, %c0_57] : memref<25x128x128xf32, #tpu.memory_space<vmem>>, vector<1x128x128xf32>
    %67 = vector.shape_cast %66 : vector<1x128x128xf32> to vector<128x128xf32>
    %cst_58 = arith.constant dense<0.000000e+00> : vector<64x128xf32>
    %68 = tpu.matmul %65, %67, %cst_58 {dimension_numbers = #tpu.dot_dimension_numbers<[1], [0], [0], [1], [0, 0, 1, 1], [], []>} : vector<64x128xf32>, vector<128x128xf32>, vector<64x128xf32> -> vector<64x128xf32>
    %69 = arith.addf %56, %68 : vector<64x128xf32>
    %c4 = arith.constant 4 : index
    %c0_59 = arith.constant 0 : index
    %70 = vector.load %arg14[%c4, %c0_59] : memref<144x128xf32, #tpu.memory_space<vmem>>, vector<8x128xf32>
    %c16 = arith.constant 16 : index
    %c0_60 = arith.constant 0 : index
    %71 = vector.load %arg14[%c16, %c0_60] : memref<144x128xf32, #tpu.memory_space<vmem>>, vector<8x128xf32>
    %c28 = arith.constant 28 : index
    %c0_61 = arith.constant 0 : index
    %72 = vector.load %arg14[%c28, %c0_61] : memref<144x128xf32, #tpu.memory_space<vmem>>, vector<8x128xf32>
    %c40 = arith.constant 40 : index
    %c0_62 = arith.constant 0 : index
    %73 = vector.load %arg14[%c40, %c0_62] : memref<144x128xf32, #tpu.memory_space<vmem>>, vector<8x128xf32>
    %c52 = arith.constant 52 : index
    %c0_63 = arith.constant 0 : index
    %74 = vector.load %arg14[%c52, %c0_63] : memref<144x128xf32, #tpu.memory_space<vmem>>, vector<8x128xf32>
    %c64 = arith.constant 64 : index
    %c0_64 = arith.constant 0 : index
    %75 = vector.load %arg14[%c64, %c0_64] : memref<144x128xf32, #tpu.memory_space<vmem>>, vector<8x128xf32>
    %c76 = arith.constant 76 : index
    %c0_65 = arith.constant 0 : index
    %76 = vector.load %arg14[%c76, %c0_65] : memref<144x128xf32, #tpu.memory_space<vmem>>, vector<8x128xf32>
    %c88 = arith.constant 88 : index
    %c0_66 = arith.constant 0 : index
    %77 = vector.load %arg14[%c88, %c0_66] : memref<144x128xf32, #tpu.memory_space<vmem>>, vector<8x128xf32>
    %78 = tpu.concatenate %70, %71, %72, %73, %74, %75, %76, %77 in 0 : vector<8x128xf32>, vector<8x128xf32>, vector<8x128xf32>, vector<8x128xf32>, vector<8x128xf32>, vector<8x128xf32>, vector<8x128xf32>, vector<8x128xf32> -> vector<64x128xf32>
    %c4_67 = arith.constant 4 : index
    %c0_68 = arith.constant 0 : index
    %c0_69 = arith.constant 0 : index
    %79 = vector.load %arg4[%c4_67, %c0_68, %c0_69] : memref<25x128x128xf32, #tpu.memory_space<vmem>>, vector<1x128x128xf32>
    %80 = vector.shape_cast %79 : vector<1x128x128xf32> to vector<128x128xf32>
    %cst_70 = arith.constant dense<0.000000e+00> : vector<64x128xf32>
    %81 = tpu.matmul %78, %80, %cst_70 {dimension_numbers = #tpu.dot_dimension_numbers<[1], [0], [0], [1], [0, 0, 1, 1], [], []>} : vector<64x128xf32>, vector<128x128xf32>, vector<64x128xf32> -> vector<64x128xf32>
    %82 = arith.addf %69, %81 : vector<64x128xf32>
    %c12_71 = arith.constant 12 : index
    %c0_72 = arith.constant 0 : index
    %83 = vector.load %arg14[%c12_71, %c0_72] : memref<144x128xf32, #tpu.memory_space<vmem>>, vector<8x128xf32>
    %c24_73 = arith.constant 24 : index
    %c0_74 = arith.constant 0 : index
    %84 = vector.load %arg14[%c24_73, %c0_74] : memref<144x128xf32, #tpu.memory_space<vmem>>, vector<8x128xf32>
    %c36_75 = arith.constant 36 : index
    %c0_76 = arith.constant 0 : index
    %85 = vector.load %arg14[%c36_75, %c0_76] : memref<144x128xf32, #tpu.memory_space<vmem>>, vector<8x128xf32>
    %c48_77 = arith.constant 48 : index
    %c0_78 = arith.constant 0 : index
    %86 = vector.load %arg14[%c48_77, %c0_78] : memref<144x128xf32, #tpu.memory_space<vmem>>, vector<8x128xf32>
    %c60_79 = arith.constant 60 : index
    %c0_80 = arith.constant 0 : index
    %87 = vector.load %arg14[%c60_79, %c0_80] : memref<144x128xf32, #tpu.memory_space<vmem>>, vector<8x128xf32>
    %c72_81 = arith.constant 72 : index
    %c0_82 = arith.constant 0 : index
    %88 = vector.load %arg14[%c72_81, %c0_82] : memref<144x128xf32, #tpu.memory_space<vmem>>, vector<8x128xf32>
    %c84_83 = arith.constant 84 : index
    %c0_84 = arith.constant 0 : index
    %89 = vector.load %arg14[%c84_83, %c0_84] : memref<144x128xf32, #tpu.memory_space<vmem>>, vector<8x128xf32>
    %c96 = arith.constant 96 : index
    %c0_85 = arith.constant 0 : index
    %90 = vector.load %arg14[%c96, %c0_85] : memref<144x128xf32, #tpu.memory_space<vmem>>, vector<8x128xf32>
    %91 = tpu.concatenate %83, %84, %85, %86, %87, %88, %89, %90 in 0 : vector<8x128xf32>, vector<8x128xf32>, vector<8x128xf32>, vector<8x128xf32>, vector<8x128xf32>, vector<8x128xf32>, vector<8x128xf32>, vector<8x128xf32> -> vector<64x128xf32>
    %c5 = arith.constant 5 : index
    %c0_86 = arith.constant 0 : index
    %c0_87 = arith.constant 0 : index
    %92 = vector.load %arg4[%c5, %c0_86, %c0_87] : memref<25x128x128xf32, #tpu.memory_space<vmem>>, vector<1x128x128xf32>
    %93 = vector.shape_cast %92 : vector<1x128x128xf32> to vector<128x128xf32>
    %cst_88 = arith.constant dense<0.000000e+00> : vector<64x128xf32>
    %94 = tpu.matmul %91, %93, %cst_88 {dimension_numbers = #tpu.dot_dimension_numbers<[1], [0], [0], [1], [0, 0, 1, 1], [], []>} : vector<64x128xf32>, vector<128x128xf32>, vector<64x128xf32> -> vector<64x128xf32>
    %95 = arith.addf %82, %94 : vector<64x128xf32>
    %c13_89 = arith.constant 13 : index
    %c0_90 = arith.constant 0 : index
    %96 = vector.load %arg14[%c13_89, %c0_90] : memref<144x128xf32, #tpu.memory_space<vmem>>, vector<8x128xf32>
    %c25_91 = arith.constant 25 : index
    %c0_92 = arith.constant 0 : index
    %97 = vector.load %arg14[%c25_91, %c0_92] : memref<144x128xf32, #tpu.memory_space<vmem>>, vector<8x128xf32>
    %c37_93 = arith.constant 37 : index
    %c0_94 = arith.constant 0 : index
    %98 = vector.load %arg14[%c37_93, %c0_94] : memref<144x128xf32, #tpu.memory_space<vmem>>, vector<8x128xf32>
    %c49_95 = arith.constant 49 : index
    %c0_96 = arith.constant 0 : index
    %99 = vector.load %arg14[%c49_95, %c0_96] : memref<144x128xf32, #tpu.memory_space<vmem>>, vector<8x128xf32>
    %c61_97 = arith.constant 61 : index
    %c0_98 = arith.constant 0 : index
    %100 = vector.load %arg14[%c61_97, %c0_98] : memref<144x128xf32, #tpu.memory_space<vmem>>, vector<8x128xf32>
    %c73_99 = arith.constant 73 : index
    %c0_100 = arith.constant 0 : index
    %101 = vector.load %arg14[%c73_99, %c0_100] : memref<144x128xf32, #tpu.memory_space<vmem>>, vector<8x128xf32>
    %c85_101 = arith.constant 85 : index
    %c0_102 = arith.constant 0 : index
    %102 = vector.load %arg14[%c85_101, %c0_102] : memref<144x128xf32, #tpu.memory_space<vmem>>, vector<8x128xf32>
    %c97 = arith.constant 97 : index
    %c0_103 = arith.constant 0 : index
    %103 = vector.load %arg14[%c97, %c0_103] : memref<144x128xf32, #tpu.memory_space<vmem>>, vector<8x128xf32>
    %104 = tpu.concatenate %96, %97, %98, %99, %100, %101, %102, %103 in 0 : vector<8x128xf32>, vector<8x128xf32>, vector<8x128xf32>, vector<8x128xf32>, vector<8x128xf32>, vector<8x128xf32>, vector<8x128xf32>, vector<8x128xf32> -> vector<64x128xf32>
    %c6 = arith.constant 6 : index
    %c0_104 = arith.constant 0 : index
    %c0_105 = arith.constant 0 : index
    %105 = vector.load %arg4[%c6, %c0_104, %c0_105] : memref<25x128x128xf32, #tpu.memory_space<vmem>>, vector<1x128x128xf32>
    %106 = vector.shape_cast %105 : vector<1x128x128xf32> to vector<128x128xf32>
    %cst_106 = arith.constant dense<0.000000e+00> : vector<64x128xf32>
    %107 = tpu.matmul %104, %106, %cst_106 {dimension_numbers = #tpu.dot_dimension_numbers<[1], [0], [0], [1], [0, 0, 1, 1], [], []>} : vector<64x128xf32>, vector<128x128xf32>, vector<64x128xf32> -> vector<64x128xf32>
    %108 = arith.addf %95, %107 : vector<64x128xf32>
    %c14_107 = arith.constant 14 : index
    %c0_108 = arith.constant 0 : index
    %109 = vector.load %arg14[%c14_107, %c0_108] : memref<144x128xf32, #tpu.memory_space<vmem>>, vector<8x128xf32>
    %c26_109 = arith.constant 26 : index
    %c0_110 = arith.constant 0 : index
    %110 = vector.load %arg14[%c26_109, %c0_110] : memref<144x128xf32, #tpu.memory_space<vmem>>, vector<8x128xf32>
    %c38_111 = arith.constant 38 : index
    %c0_112 = arith.constant 0 : index
    %111 = vector.load %arg14[%c38_111, %c0_112] : memref<144x128xf32, #tpu.memory_space<vmem>>, vector<8x128xf32>
    %c50_113 = arith.constant 50 : index
    %c0_114 = arith.constant 0 : index
    %112 = vector.load %arg14[%c50_113, %c0_114] : memref<144x128xf32, #tpu.memory_space<vmem>>, vector<8x128xf32>
    %c62_115 = arith.constant 62 : index
    %c0_116 = arith.constant 0 : index
    %113 = vector.load %arg14[%c62_115, %c0_116] : memref<144x128xf32, #tpu.memory_space<vmem>>, vector<8x128xf32>
    %c74_117 = arith.constant 74 : index
    %c0_118 = arith.constant 0 : index
    %114 = vector.load %arg14[%c74_117, %c0_118] : memref<144x128xf32, #tpu.memory_space<vmem>>, vector<8x128xf32>
    %c86_119 = arith.constant 86 : index
    %c0_120 = arith.constant 0 : index
    %115 = vector.load %arg14[%c86_119, %c0_120] : memref<144x128xf32, #tpu.memory_space<vmem>>, vector<8x128xf32>
    %c98 = arith.constant 98 : index
    %c0_121 = arith.constant 0 : index
    %116 = vector.load %arg14[%c98, %c0_121] : memref<144x128xf32, #tpu.memory_space<vmem>>, vector<8x128xf32>
    %117 = tpu.concatenate %109, %110, %111, %112, %113, %114, %115, %116 in 0 : vector<8x128xf32>, vector<8x128xf32>, vector<8x128xf32>, vector<8x128xf32>, vector<8x128xf32>, vector<8x128xf32>, vector<8x128xf32>, vector<8x128xf32> -> vector<64x128xf32>
    %c7 = arith.constant 7 : index
    %c0_122 = arith.constant 0 : index
    %c0_123 = arith.constant 0 : index
    %118 = vector.load %arg4[%c7, %c0_122, %c0_123] : memref<25x128x128xf32, #tpu.memory_space<vmem>>, vector<1x128x128xf32>
    %119 = vector.shape_cast %118 : vector<1x128x128xf32> to vector<128x128xf32>
    %cst_124 = arith.constant dense<0.000000e+00> : vector<64x128xf32>
    %120 = tpu.matmul %117, %119, %cst_124 {dimension_numbers = #tpu.dot_dimension_numbers<[1], [0], [0], [1], [0, 0, 1, 1], [], []>} : vector<64x128xf32>, vector<128x128xf32>, vector<64x128xf32> -> vector<64x128xf32>
    %121 = arith.addf %108, %120 : vector<64x128xf32>
    %c15_125 = arith.constant 15 : index
    %c0_126 = arith.constant 0 : index
    %122 = vector.load %arg14[%c15_125, %c0_126] : memref<144x128xf32, #tpu.memory_space<vmem>>, vector<8x128xf32>
    %c27_127 = arith.constant 27 : index
    %c0_128 = arith.constant 0 : index
    %123 = vector.load %arg14[%c27_127, %c0_128] : memref<144x128xf32, #tpu.memory_space<vmem>>, vector<8x128xf32>
    %c39_129 = arith.constant 39 : index
    %c0_130 = arith.constant 0 : index
    %124 = vector.load %arg14[%c39_129, %c0_130] : memref<144x128xf32, #tpu.memory_space<vmem>>, vector<8x128xf32>
    %c51_131 = arith.constant 51 : index
    %c0_132 = arith.constant 0 : index
    %125 = vector.load %arg14[%c51_131, %c0_132] : memref<144x128xf32, #tpu.memory_space<vmem>>, vector<8x128xf32>
    %c63_133 = arith.constant 63 : index
    %c0_134 = arith.constant 0 : index
    %126 = vector.load %arg14[%c63_133, %c0_134] : memref<144x128xf32, #tpu.memory_space<vmem>>, vector<8x128xf32>
    %c75_135 = arith.constant 75 : index
    %c0_136 = arith.constant 0 : index
    %127 = vector.load %arg14[%c75_135, %c0_136] : memref<144x128xf32, #tpu.memory_space<vmem>>, vector<8x128xf32>
    %c87_137 = arith.constant 87 : index
    %c0_138 = arith.constant 0 : index
    %128 = vector.load %arg14[%c87_137, %c0_138] : memref<144x128xf32, #tpu.memory_space<vmem>>, vector<8x128xf32>
    %c99 = arith.constant 99 : index
    %c0_139 = arith.constant 0 : index
    %129 = vector.load %arg14[%c99, %c0_139] : memref<144x128xf32, #tpu.memory_space<vmem>>, vector<8x128xf32>
    %130 = tpu.concatenate %122, %123, %124, %125, %126, %127, %128, %129 in 0 : vector<8x128xf32>, vector<8x128xf32>, vector<8x128xf32>, vector<8x128xf32>, vector<8x128xf32>, vector<8x128xf32>, vector<8x128xf32>, vector<8x128xf32> -> vector<64x128xf32>
    %c8 = arith.constant 8 : index
    %c0_140 = arith.constant 0 : index
    %c0_141 = arith.constant 0 : index
    %131 = vector.load %arg4[%c8, %c0_140, %c0_141] : memref<25x128x128xf32, #tpu.memory_space<vmem>>, vector<1x128x128xf32>
    %132 = vector.shape_cast %131 : vector<1x128x128xf32> to vector<128x128xf32>
    %cst_142 = arith.constant dense<0.000000e+00> : vector<64x128xf32>
    %133 = tpu.matmul %130, %132, %cst_142 {dimension_numbers = #tpu.dot_dimension_numbers<[1], [0], [0], [1], [0, 0, 1, 1], [], []>} : vector<64x128xf32>, vector<128x128xf32>, vector<64x128xf32> -> vector<64x128xf32>
    %134 = arith.addf %121, %133 : vector<64x128xf32>
    %c16_143 = arith.constant 16 : index
    %c0_144 = arith.constant 0 : index
    %135 = vector.load %arg14[%c16_143, %c0_144] : memref<144x128xf32, #tpu.memory_space<vmem>>, vector<8x128xf32>
    %c28_145 = arith.constant 28 : index
    %c0_146 = arith.constant 0 : index
    %136 = vector.load %arg14[%c28_145, %c0_146] : memref<144x128xf32, #tpu.memory_space<vmem>>, vector<8x128xf32>
    %c40_147 = arith.constant 40 : index
    %c0_148 = arith.constant 0 : index
    %137 = vector.load %arg14[%c40_147, %c0_148] : memref<144x128xf32, #tpu.memory_space<vmem>>, vector<8x128xf32>
    %c52_149 = arith.constant 52 : index
    %c0_150 = arith.constant 0 : index
    %138 = vector.load %arg14[%c52_149, %c0_150] : memref<144x128xf32, #tpu.memory_space<vmem>>, vector<8x128xf32>
    %c64_151 = arith.constant 64 : index
    %c0_152 = arith.constant 0 : index
    %139 = vector.load %arg14[%c64_151, %c0_152] : memref<144x128xf32, #tpu.memory_space<vmem>>, vector<8x128xf32>
    %c76_153 = arith.constant 76 : index
    %c0_154 = arith.constant 0 : index
    %140 = vector.load %arg14[%c76_153, %c0_154] : memref<144x128xf32, #tpu.memory_space<vmem>>, vector<8x128xf32>
    %c88_155 = arith.constant 88 : index
    %c0_156 = arith.constant 0 : index
    %141 = vector.load %arg14[%c88_155, %c0_156] : memref<144x128xf32, #tpu.memory_space<vmem>>, vector<8x128xf32>
    %c100 = arith.constant 100 : index
    %c0_157 = arith.constant 0 : index
    %142 = vector.load %arg14[%c100, %c0_157] : memref<144x128xf32, #tpu.memory_space<vmem>>, vector<8x128xf32>
    %143 = tpu.concatenate %135, %136, %137, %138, %139, %140, %141, %142 in 0 : vector<8x128xf32>, vector<8x128xf32>, vector<8x128xf32>, vector<8x128xf32>, vector<8x128xf32>, vector<8x128xf32>, vector<8x128xf32>, vector<8x128xf32> -> vector<64x128xf32>
    %c9 = arith.constant 9 : index
    %c0_158 = arith.constant 0 : index
    %c0_159 = arith.constant 0 : index
    %144 = vector.load %arg4[%c9, %c0_158, %c0_159] : memref<25x128x128xf32, #tpu.memory_space<vmem>>, vector<1x128x128xf32>
    %145 = vector.shape_cast %144 : vector<1x128x128xf32> to vector<128x128xf32>
    %cst_160 = arith.constant dense<0.000000e+00> : vector<64x128xf32>
    %146 = tpu.matmul %143, %145, %cst_160 {dimension_numbers = #tpu.dot_dimension_numbers<[1], [0], [0], [1], [0, 0, 1, 1], [], []>} : vector<64x128xf32>, vector<128x128xf32>, vector<64x128xf32> -> vector<64x128xf32>
    %147 = arith.addf %134, %146 : vector<64x128xf32>
    %c24_161 = arith.constant 24 : index
    %c0_162 = arith.constant 0 : index
    %148 = vector.load %arg14[%c24_161, %c0_162] : memref<144x128xf32, #tpu.memory_space<vmem>>, vector<8x128xf32>
    %c36_163 = arith.constant 36 : index
    %c0_164 = arith.constant 0 : index
    %149 = vector.load %arg14[%c36_163, %c0_164] : memref<144x128xf32, #tpu.memory_space<vmem>>, vector<8x128xf32>
    %c48_165 = arith.constant 48 : index
    %c0_166 = arith.constant 0 : index
    %150 = vector.load %arg14[%c48_165, %c0_166] : memref<144x128xf32, #tpu.memory_space<vmem>>, vector<8x128xf32>
    %c60_167 = arith.constant 60 : index
    %c0_168 = arith.constant 0 : index
    %151 = vector.load %arg14[%c60_167, %c0_168] : memref<144x128xf32, #tpu.memory_space<vmem>>, vector<8x128xf32>
    %c72_169 = arith.constant 72 : index
    %c0_170 = arith.constant 0 : index
    %152 = vector.load %arg14[%c72_169, %c0_170] : memref<144x128xf32, #tpu.memory_space<vmem>>, vector<8x128xf32>
    %c84_171 = arith.constant 84 : index
    %c0_172 = arith.constant 0 : index
    %153 = vector.load %arg14[%c84_171, %c0_172] : memref<144x128xf32, #tpu.memory_space<vmem>>, vector<8x128xf32>
    %c96_173 = arith.constant 96 : index
    %c0_174 = arith.constant 0 : index
    %154 = vector.load %arg14[%c96_173, %c0_174] : memref<144x128xf32, #tpu.memory_space<vmem>>, vector<8x128xf32>
    %c108 = arith.constant 108 : index
    %c0_175 = arith.constant 0 : index
    %155 = vector.load %arg14[%c108, %c0_175] : memref<144x128xf32, #tpu.memory_space<vmem>>, vector<8x128xf32>
    %156 = tpu.concatenate %148, %149, %150, %151, %152, %153, %154, %155 in 0 : vector<8x128xf32>, vector<8x128xf32>, vector<8x128xf32>, vector<8x128xf32>, vector<8x128xf32>, vector<8x128xf32>, vector<8x128xf32>, vector<8x128xf32> -> vector<64x128xf32>
    %c10 = arith.constant 10 : index
    %c0_176 = arith.constant 0 : index
    %c0_177 = arith.constant 0 : index
    %157 = vector.load %arg4[%c10, %c0_176, %c0_177] : memref<25x128x128xf32, #tpu.memory_space<vmem>>, vector<1x128x128xf32>
    %158 = vector.shape_cast %157 : vector<1x128x128xf32> to vector<128x128xf32>
    %cst_178 = arith.constant dense<0.000000e+00> : vector<64x128xf32>
    %159 = tpu.matmul %156, %158, %cst_178 {dimension_numbers = #tpu.dot_dimension_numbers<[1], [0], [0], [1], [0, 0, 1, 1], [], []>} : vector<64x128xf32>, vector<128x128xf32>, vector<64x128xf32> -> vector<64x128xf32>
    %160 = arith.addf %147, %159 : vector<64x128xf32>
    %c25_179 = arith.constant 25 : index
    %c0_180 = arith.constant 0 : index
    %161 = vector.load %arg14[%c25_179, %c0_180] : memref<144x128xf32, #tpu.memory_space<vmem>>, vector<8x128xf32>
    %c37_181 = arith.constant 37 : index
    %c0_182 = arith.constant 0 : index
    %162 = vector.load %arg14[%c37_181, %c0_182] : memref<144x128xf32, #tpu.memory_space<vmem>>, vector<8x128xf32>
    %c49_183 = arith.constant 49 : index
    %c0_184 = arith.constant 0 : index
    %163 = vector.load %arg14[%c49_183, %c0_184] : memref<144x128xf32, #tpu.memory_space<vmem>>, vector<8x128xf32>
    %c61_185 = arith.constant 61 : index
    %c0_186 = arith.constant 0 : index
    %164 = vector.load %arg14[%c61_185, %c0_186] : memref<144x128xf32, #tpu.memory_space<vmem>>, vector<8x128xf32>
    %c73_187 = arith.constant 73 : index
    %c0_188 = arith.constant 0 : index
    %165 = vector.load %arg14[%c73_187, %c0_188] : memref<144x128xf32, #tpu.memory_space<vmem>>, vector<8x128xf32>
    %c85_189 = arith.constant 85 : index
    %c0_190 = arith.constant 0 : index
    %166 = vector.load %arg14[%c85_189, %c0_190] : memref<144x128xf32, #tpu.memory_space<vmem>>, vector<8x128xf32>
    %c97_191 = arith.constant 97 : index
    %c0_192 = arith.constant 0 : index
    %167 = vector.load %arg14[%c97_191, %c0_192] : memref<144x128xf32, #tpu.memory_space<vmem>>, vector<8x128xf32>
    %c109 = arith.constant 109 : index
    %c0_193 = arith.constant 0 : index
    %168 = vector.load %arg14[%c109, %c0_193] : memref<144x128xf32, #tpu.memory_space<vmem>>, vector<8x128xf32>
    %169 = tpu.concatenate %161, %162, %163, %164, %165, %166, %167, %168 in 0 : vector<8x128xf32>, vector<8x128xf32>, vector<8x128xf32>, vector<8x128xf32>, vector<8x128xf32>, vector<8x128xf32>, vector<8x128xf32>, vector<8x128xf32> -> vector<64x128xf32>
    %c11 = arith.constant 11 : index
    %c0_194 = arith.constant 0 : index
    %c0_195 = arith.constant 0 : index
    %170 = vector.load %arg4[%c11, %c0_194, %c0_195] : memref<25x128x128xf32, #tpu.memory_space<vmem>>, vector<1x128x128xf32>
    %171 = vector.shape_cast %170 : vector<1x128x128xf32> to vector<128x128xf32>
    %cst_196 = arith.constant dense<0.000000e+00> : vector<64x128xf32>
    %172 = tpu.matmul %169, %171, %cst_196 {dimension_numbers = #tpu.dot_dimension_numbers<[1], [0], [0], [1], [0, 0, 1, 1], [], []>} : vector<64x128xf32>, vector<128x128xf32>, vector<64x128xf32> -> vector<64x128xf32>
    %173 = arith.addf %160, %172 : vector<64x128xf32>
    %c26_197 = arith.constant 26 : index
    %c0_198 = arith.constant 0 : index
    %174 = vector.load %arg14[%c26_197, %c0_198] : memref<144x128xf32, #tpu.memory_space<vmem>>, vector<8x128xf32>
    %c38_199 = arith.constant 38 : index
    %c0_200 = arith.constant 0 : index
    %175 = vector.load %arg14[%c38_199, %c0_200] : memref<144x128xf32, #tpu.memory_space<vmem>>, vector<8x128xf32>
    %c50_201 = arith.constant 50 : index
    %c0_202 = arith.constant 0 : index
    %176 = vector.load %arg14[%c50_201, %c0_202] : memref<144x128xf32, #tpu.memory_space<vmem>>, vector<8x128xf32>
    %c62_203 = arith.constant 62 : index
    %c0_204 = arith.constant 0 : index
    %177 = vector.load %arg14[%c62_203, %c0_204] : memref<144x128xf32, #tpu.memory_space<vmem>>, vector<8x128xf32>
    %c74_205 = arith.constant 74 : index
    %c0_206 = arith.constant 0 : index
    %178 = vector.load %arg14[%c74_205, %c0_206] : memref<144x128xf32, #tpu.memory_space<vmem>>, vector<8x128xf32>
    %c86_207 = arith.constant 86 : index
    %c0_208 = arith.constant 0 : index
    %179 = vector.load %arg14[%c86_207, %c0_208] : memref<144x128xf32, #tpu.memory_space<vmem>>, vector<8x128xf32>
    %c98_209 = arith.constant 98 : index
    %c0_210 = arith.constant 0 : index
    %180 = vector.load %arg14[%c98_209, %c0_210] : memref<144x128xf32, #tpu.memory_space<vmem>>, vector<8x128xf32>
    %c110 = arith.constant 110 : index
    %c0_211 = arith.constant 0 : index
    %181 = vector.load %arg14[%c110, %c0_211] : memref<144x128xf32, #tpu.memory_space<vmem>>, vector<8x128xf32>
    %182 = tpu.concatenate %174, %175, %176, %177, %178, %179, %180, %181 in 0 : vector<8x128xf32>, vector<8x128xf32>, vector<8x128xf32>, vector<8x128xf32>, vector<8x128xf32>, vector<8x128xf32>, vector<8x128xf32>, vector<8x128xf32> -> vector<64x128xf32>
    %c12_212 = arith.constant 12 : index
    %c0_213 = arith.constant 0 : index
    %c0_214 = arith.constant 0 : index
    %183 = vector.load %arg4[%c12_212, %c0_213, %c0_214] : memref<25x128x128xf32, #tpu.memory_space<vmem>>, vector<1x128x128xf32>
    %184 = vector.shape_cast %183 : vector<1x128x128xf32> to vector<128x128xf32>
    %cst_215 = arith.constant dense<0.000000e+00> : vector<64x128xf32>
    %185 = tpu.matmul %182, %184, %cst_215 {dimension_numbers = #tpu.dot_dimension_numbers<[1], [0], [0], [1], [0, 0, 1, 1], [], []>} : vector<64x128xf32>, vector<128x128xf32>, vector<64x128xf32> -> vector<64x128xf32>
    %186 = arith.addf %173, %185 : vector<64x128xf32>
    %c27_216 = arith.constant 27 : index
    %c0_217 = arith.constant 0 : index
    %187 = vector.load %arg14[%c27_216, %c0_217] : memref<144x128xf32, #tpu.memory_space<vmem>>, vector<8x128xf32>
    %c39_218 = arith.constant 39 : index
    %c0_219 = arith.constant 0 : index
    %188 = vector.load %arg14[%c39_218, %c0_219] : memref<144x128xf32, #tpu.memory_space<vmem>>, vector<8x128xf32>
    %c51_220 = arith.constant 51 : index
    %c0_221 = arith.constant 0 : index
    %189 = vector.load %arg14[%c51_220, %c0_221] : memref<144x128xf32, #tpu.memory_space<vmem>>, vector<8x128xf32>
    %c63_222 = arith.constant 63 : index
    %c0_223 = arith.constant 0 : index
    %190 = vector.load %arg14[%c63_222, %c0_223] : memref<144x128xf32, #tpu.memory_space<vmem>>, vector<8x128xf32>
    %c75_224 = arith.constant 75 : index
    %c0_225 = arith.constant 0 : index
    %191 = vector.load %arg14[%c75_224, %c0_225] : memref<144x128xf32, #tpu.memory_space<vmem>>, vector<8x128xf32>
    %c87_226 = arith.constant 87 : index
    %c0_227 = arith.constant 0 : index
    %192 = vector.load %arg14[%c87_226, %c0_227] : memref<144x128xf32, #tpu.memory_space<vmem>>, vector<8x128xf32>
    %c99_228 = arith.constant 99 : index
    %c0_229 = arith.constant 0 : index
    %193 = vector.load %arg14[%c99_228, %c0_229] : memref<144x128xf32, #tpu.memory_space<vmem>>, vector<8x128xf32>
    %c111 = arith.constant 111 : index
    %c0_230 = arith.constant 0 : index
    %194 = vector.load %arg14[%c111, %c0_230] : memref<144x128xf32, #tpu.memory_space<vmem>>, vector<8x128xf32>
    %195 = tpu.concatenate %187, %188, %189, %190, %191, %192, %193, %194 in 0 : vector<8x128xf32>, vector<8x128xf32>, vector<8x128xf32>, vector<8x128xf32>, vector<8x128xf32>, vector<8x128xf32>, vector<8x128xf32>, vector<8x128xf32> -> vector<64x128xf32>
    %c13_231 = arith.constant 13 : index
    %c0_232 = arith.constant 0 : index
    %c0_233 = arith.constant 0 : index
    %196 = vector.load %arg4[%c13_231, %c0_232, %c0_233] : memref<25x128x128xf32, #tpu.memory_space<vmem>>, vector<1x128x128xf32>
    %197 = vector.shape_cast %196 : vector<1x128x128xf32> to vector<128x128xf32>
    %cst_234 = arith.constant dense<0.000000e+00> : vector<64x128xf32>
    %198 = tpu.matmul %195, %197, %cst_234 {dimension_numbers = #tpu.dot_dimension_numbers<[1], [0], [0], [1], [0, 0, 1, 1], [], []>} : vector<64x128xf32>, vector<128x128xf32>, vector<64x128xf32> -> vector<64x128xf32>
    %199 = arith.addf %186, %198 : vector<64x128xf32>
    %c28_235 = arith.constant 28 : index
    %c0_236 = arith.constant 0 : index
    %200 = vector.load %arg14[%c28_235, %c0_236] : memref<144x128xf32, #tpu.memory_space<vmem>>, vector<8x128xf32>
    %c40_237 = arith.constant 40 : index
    %c0_238 = arith.constant 0 : index
    %201 = vector.load %arg14[%c40_237, %c0_238] : memref<144x128xf32, #tpu.memory_space<vmem>>, vector<8x128xf32>
    %c52_239 = arith.constant 52 : index
    %c0_240 = arith.constant 0 : index
    %202 = vector.load %arg14[%c52_239, %c0_240] : memref<144x128xf32, #tpu.memory_space<vmem>>, vector<8x128xf32>
    %c64_241 = arith.constant 64 : index
    %c0_242 = arith.constant 0 : index
    %203 = vector.load %arg14[%c64_241, %c0_242] : memref<144x128xf32, #tpu.memory_space<vmem>>, vector<8x128xf32>
    %c76_243 = arith.constant 76 : index
    %c0_244 = arith.constant 0 : index
    %204 = vector.load %arg14[%c76_243, %c0_244] : memref<144x128xf32, #tpu.memory_space<vmem>>, vector<8x128xf32>
    %c88_245 = arith.constant 88 : index
    %c0_246 = arith.constant 0 : index
    %205 = vector.load %arg14[%c88_245, %c0_246] : memref<144x128xf32, #tpu.memory_space<vmem>>, vector<8x128xf32>
    %c100_247 = arith.constant 100 : index
    %c0_248 = arith.constant 0 : index
    %206 = vector.load %arg14[%c100_247, %c0_248] : memref<144x128xf32, #tpu.memory_space<vmem>>, vector<8x128xf32>
    %c112 = arith.constant 112 : index
    %c0_249 = arith.constant 0 : index
    %207 = vector.load %arg14[%c112, %c0_249] : memref<144x128xf32, #tpu.memory_space<vmem>>, vector<8x128xf32>
    %208 = tpu.concatenate %200, %201, %202, %203, %204, %205, %206, %207 in 0 : vector<8x128xf32>, vector<8x128xf32>, vector<8x128xf32>, vector<8x128xf32>, vector<8x128xf32>, vector<8x128xf32>, vector<8x128xf32>, vector<8x128xf32> -> vector<64x128xf32>
    %c14_250 = arith.constant 14 : index
    %c0_251 = arith.constant 0 : index
    %c0_252 = arith.constant 0 : index
    %209 = vector.load %arg4[%c14_250, %c0_251, %c0_252] : memref<25x128x128xf32, #tpu.memory_space<vmem>>, vector<1x128x128xf32>
    %210 = vector.shape_cast %209 : vector<1x128x128xf32> to vector<128x128xf32>
    %cst_253 = arith.constant dense<0.000000e+00> : vector<64x128xf32>
    %211 = tpu.matmul %208, %210, %cst_253 {dimension_numbers = #tpu.dot_dimension_numbers<[1], [0], [0], [1], [0, 0, 1, 1], [], []>} : vector<64x128xf32>, vector<128x128xf32>, vector<64x128xf32> -> vector<64x128xf32>
    %212 = arith.addf %199, %211 : vector<64x128xf32>
    %c36_254 = arith.constant 36 : index
    %c0_255 = arith.constant 0 : index
    %213 = vector.load %arg14[%c36_254, %c0_255] : memref<144x128xf32, #tpu.memory_space<vmem>>, vector<8x128xf32>
    %c48_256 = arith.constant 48 : index
    %c0_257 = arith.constant 0 : index
    %214 = vector.load %arg14[%c48_256, %c0_257] : memref<144x128xf32, #tpu.memory_space<vmem>>, vector<8x128xf32>
    %c60_258 = arith.constant 60 : index
    %c0_259 = arith.constant 0 : index
    %215 = vector.load %arg14[%c60_258, %c0_259] : memref<144x128xf32, #tpu.memory_space<vmem>>, vector<8x128xf32>
    %c72_260 = arith.constant 72 : index
    %c0_261 = arith.constant 0 : index
    %216 = vector.load %arg14[%c72_260, %c0_261] : memref<144x128xf32, #tpu.memory_space<vmem>>, vector<8x128xf32>
    %c84_262 = arith.constant 84 : index
    %c0_263 = arith.constant 0 : index
    %217 = vector.load %arg14[%c84_262, %c0_263] : memref<144x128xf32, #tpu.memory_space<vmem>>, vector<8x128xf32>
    %c96_264 = arith.constant 96 : index
    %c0_265 = arith.constant 0 : index
    %218 = vector.load %arg14[%c96_264, %c0_265] : memref<144x128xf32, #tpu.memory_space<vmem>>, vector<8x128xf32>
    %c108_266 = arith.constant 108 : index
    %c0_267 = arith.constant 0 : index
    %219 = vector.load %arg14[%c108_266, %c0_267] : memref<144x128xf32, #tpu.memory_space<vmem>>, vector<8x128xf32>
    %c120 = arith.constant 120 : index
    %c0_268 = arith.constant 0 : index
    %220 = vector.load %arg14[%c120, %c0_268] : memref<144x128xf32, #tpu.memory_space<vmem>>, vector<8x128xf32>
    %221 = tpu.concatenate %213, %214, %215, %216, %217, %218, %219, %220 in 0 : vector<8x128xf32>, vector<8x128xf32>, vector<8x128xf32>, vector<8x128xf32>, vector<8x128xf32>, vector<8x128xf32>, vector<8x128xf32>, vector<8x128xf32> -> vector<64x128xf32>
    %c15_269 = arith.constant 15 : index
    %c0_270 = arith.constant 0 : index
    %c0_271 = arith.constant 0 : index
    %222 = vector.load %arg4[%c15_269, %c0_270, %c0_271] : memref<25x128x128xf32, #tpu.memory_space<vmem>>, vector<1x128x128xf32>
    %223 = vector.shape_cast %222 : vector<1x128x128xf32> to vector<128x128xf32>
    %cst_272 = arith.constant dense<0.000000e+00> : vector<64x128xf32>
    %224 = tpu.matmul %221, %223, %cst_272 {dimension_numbers = #tpu.dot_dimension_numbers<[1], [0], [0], [1], [0, 0, 1, 1], [], []>} : vector<64x128xf32>, vector<128x128xf32>, vector<64x128xf32> -> vector<64x128xf32>
    %225 = arith.addf %212, %224 : vector<64x128xf32>
    %c37_273 = arith.constant 37 : index
    %c0_274 = arith.constant 0 : index
    %226 = vector.load %arg14[%c37_273, %c0_274] : memref<144x128xf32, #tpu.memory_space<vmem>>, vector<8x128xf32>
    %c49_275 = arith.constant 49 : index
    %c0_276 = arith.constant 0 : index
    %227 = vector.load %arg14[%c49_275, %c0_276] : memref<144x128xf32, #tpu.memory_space<vmem>>, vector<8x128xf32>
    %c61_277 = arith.constant 61 : index
    %c0_278 = arith.constant 0 : index
    %228 = vector.load %arg14[%c61_277, %c0_278] : memref<144x128xf32, #tpu.memory_space<vmem>>, vector<8x128xf32>
    %c73_279 = arith.constant 73 : index
    %c0_280 = arith.constant 0 : index
    %229 = vector.load %arg14[%c73_279, %c0_280] : memref<144x128xf32, #tpu.memory_space<vmem>>, vector<8x128xf32>
    %c85_281 = arith.constant 85 : index
    %c0_282 = arith.constant 0 : index
    %230 = vector.load %arg14[%c85_281, %c0_282] : memref<144x128xf32, #tpu.memory_space<vmem>>, vector<8x128xf32>
    %c97_283 = arith.constant 97 : index
    %c0_284 = arith.constant 0 : index
    %231 = vector.load %arg14[%c97_283, %c0_284] : memref<144x128xf32, #tpu.memory_space<vmem>>, vector<8x128xf32>
    %c109_285 = arith.constant 109 : index
    %c0_286 = arith.constant 0 : index
    %232 = vector.load %arg14[%c109_285, %c0_286] : memref<144x128xf32, #tpu.memory_space<vmem>>, vector<8x128xf32>
    %c121 = arith.constant 121 : index
    %c0_287 = arith.constant 0 : index
    %233 = vector.load %arg14[%c121, %c0_287] : memref<144x128xf32, #tpu.memory_space<vmem>>, vector<8x128xf32>
    %234 = tpu.concatenate %226, %227, %228, %229, %230, %231, %232, %233 in 0 : vector<8x128xf32>, vector<8x128xf32>, vector<8x128xf32>, vector<8x128xf32>, vector<8x128xf32>, vector<8x128xf32>, vector<8x128xf32>, vector<8x128xf32> -> vector<64x128xf32>
    %c16_288 = arith.constant 16 : index
    %c0_289 = arith.constant 0 : index
    %c0_290 = arith.constant 0 : index
    %235 = vector.load %arg4[%c16_288, %c0_289, %c0_290] : memref<25x128x128xf32, #tpu.memory_space<vmem>>, vector<1x128x128xf32>
    %236 = vector.shape_cast %235 : vector<1x128x128xf32> to vector<128x128xf32>
    %cst_291 = arith.constant dense<0.000000e+00> : vector<64x128xf32>
    %237 = tpu.matmul %234, %236, %cst_291 {dimension_numbers = #tpu.dot_dimension_numbers<[1], [0], [0], [1], [0, 0, 1, 1], [], []>} : vector<64x128xf32>, vector<128x128xf32>, vector<64x128xf32> -> vector<64x128xf32>
    %238 = arith.addf %225, %237 : vector<64x128xf32>
    %c38_292 = arith.constant 38 : index
    %c0_293 = arith.constant 0 : index
    %239 = vector.load %arg14[%c38_292, %c0_293] : memref<144x128xf32, #tpu.memory_space<vmem>>, vector<8x128xf32>
    %c50_294 = arith.constant 50 : index
    %c0_295 = arith.constant 0 : index
    %240 = vector.load %arg14[%c50_294, %c0_295] : memref<144x128xf32, #tpu.memory_space<vmem>>, vector<8x128xf32>
    %c62_296 = arith.constant 62 : index
    %c0_297 = arith.constant 0 : index
    %241 = vector.load %arg14[%c62_296, %c0_297] : memref<144x128xf32, #tpu.memory_space<vmem>>, vector<8x128xf32>
    %c74_298 = arith.constant 74 : index
    %c0_299 = arith.constant 0 : index
    %242 = vector.load %arg14[%c74_298, %c0_299] : memref<144x128xf32, #tpu.memory_space<vmem>>, vector<8x128xf32>
    %c86_300 = arith.constant 86 : index
    %c0_301 = arith.constant 0 : index
    %243 = vector.load %arg14[%c86_300, %c0_301] : memref<144x128xf32, #tpu.memory_space<vmem>>, vector<8x128xf32>
    %c98_302 = arith.constant 98 : index
    %c0_303 = arith.constant 0 : index
    %244 = vector.load %arg14[%c98_302, %c0_303] : memref<144x128xf32, #tpu.memory_space<vmem>>, vector<8x128xf32>
    %c110_304 = arith.constant 110 : index
    %c0_305 = arith.constant 0 : index
    %245 = vector.load %arg14[%c110_304, %c0_305] : memref<144x128xf32, #tpu.memory_space<vmem>>, vector<8x128xf32>
    %c122 = arith.constant 122 : index
    %c0_306 = arith.constant 0 : index
    %246 = vector.load %arg14[%c122, %c0_306] : memref<144x128xf32, #tpu.memory_space<vmem>>, vector<8x128xf32>
    %247 = tpu.concatenate %239, %240, %241, %242, %243, %244, %245, %246 in 0 : vector<8x128xf32>, vector<8x128xf32>, vector<8x128xf32>, vector<8x128xf32>, vector<8x128xf32>, vector<8x128xf32>, vector<8x128xf32>, vector<8x128xf32> -> vector<64x128xf32>
    %c17 = arith.constant 17 : index
    %c0_307 = arith.constant 0 : index
    %c0_308 = arith.constant 0 : index
    %248 = vector.load %arg4[%c17, %c0_307, %c0_308] : memref<25x128x128xf32, #tpu.memory_space<vmem>>, vector<1x128x128xf32>
    %249 = vector.shape_cast %248 : vector<1x128x128xf32> to vector<128x128xf32>
    %cst_309 = arith.constant dense<0.000000e+00> : vector<64x128xf32>
    %250 = tpu.matmul %247, %249, %cst_309 {dimension_numbers = #tpu.dot_dimension_numbers<[1], [0], [0], [1], [0, 0, 1, 1], [], []>} : vector<64x128xf32>, vector<128x128xf32>, vector<64x128xf32> -> vector<64x128xf32>
    %251 = arith.addf %238, %250 : vector<64x128xf32>
    %c39_310 = arith.constant 39 : index
    %c0_311 = arith.constant 0 : index
    %252 = vector.load %arg14[%c39_310, %c0_311] : memref<144x128xf32, #tpu.memory_space<vmem>>, vector<8x128xf32>
    %c51_312 = arith.constant 51 : index
    %c0_313 = arith.constant 0 : index
    %253 = vector.load %arg14[%c51_312, %c0_313] : memref<144x128xf32, #tpu.memory_space<vmem>>, vector<8x128xf32>
    %c63_314 = arith.constant 63 : index
    %c0_315 = arith.constant 0 : index
    %254 = vector.load %arg14[%c63_314, %c0_315] : memref<144x128xf32, #tpu.memory_space<vmem>>, vector<8x128xf32>
    %c75_316 = arith.constant 75 : index
    %c0_317 = arith.constant 0 : index
    %255 = vector.load %arg14[%c75_316, %c0_317] : memref<144x128xf32, #tpu.memory_space<vmem>>, vector<8x128xf32>
    %c87_318 = arith.constant 87 : index
    %c0_319 = arith.constant 0 : index
    %256 = vector.load %arg14[%c87_318, %c0_319] : memref<144x128xf32, #tpu.memory_space<vmem>>, vector<8x128xf32>
    %c99_320 = arith.constant 99 : index
    %c0_321 = arith.constant 0 : index
    %257 = vector.load %arg14[%c99_320, %c0_321] : memref<144x128xf32, #tpu.memory_space<vmem>>, vector<8x128xf32>
    %c111_322 = arith.constant 111 : index
    %c0_323 = arith.constant 0 : index
    %258 = vector.load %arg14[%c111_322, %c0_323] : memref<144x128xf32, #tpu.memory_space<vmem>>, vector<8x128xf32>
    %c123 = arith.constant 123 : index
    %c0_324 = arith.constant 0 : index
    %259 = vector.load %arg14[%c123, %c0_324] : memref<144x128xf32, #tpu.memory_space<vmem>>, vector<8x128xf32>
    %260 = tpu.concatenate %252, %253, %254, %255, %256, %257, %258, %259 in 0 : vector<8x128xf32>, vector<8x128xf32>, vector<8x128xf32>, vector<8x128xf32>, vector<8x128xf32>, vector<8x128xf32>, vector<8x128xf32>, vector<8x128xf32> -> vector<64x128xf32>
    %c18 = arith.constant 18 : index
    %c0_325 = arith.constant 0 : index
    %c0_326 = arith.constant 0 : index
    %261 = vector.load %arg4[%c18, %c0_325, %c0_326] : memref<25x128x128xf32, #tpu.memory_space<vmem>>, vector<1x128x128xf32>
    %262 = vector.shape_cast %261 : vector<1x128x128xf32> to vector<128x128xf32>
    %cst_327 = arith.constant dense<0.000000e+00> : vector<64x128xf32>
    %263 = tpu.matmul %260, %262, %cst_327 {dimension_numbers = #tpu.dot_dimension_numbers<[1], [0], [0], [1], [0, 0, 1, 1], [], []>} : vector<64x128xf32>, vector<128x128xf32>, vector<64x128xf32> -> vector<64x128xf32>
    %264 = arith.addf %251, %263 : vector<64x128xf32>
    %c40_328 = arith.constant 40 : index
    %c0_329 = arith.constant 0 : index
    %265 = vector.load %arg14[%c40_328, %c0_329] : memref<144x128xf32, #tpu.memory_space<vmem>>, vector<8x128xf32>
    %c52_330 = arith.constant 52 : index
    %c0_331 = arith.constant 0 : index
    %266 = vector.load %arg14[%c52_330, %c0_331] : memref<144x128xf32, #tpu.memory_space<vmem>>, vector<8x128xf32>
    %c64_332 = arith.constant 64 : index
    %c0_333 = arith.constant 0 : index
    %267 = vector.load %arg14[%c64_332, %c0_333] : memref<144x128xf32, #tpu.memory_space<vmem>>, vector<8x128xf32>
    %c76_334 = arith.constant 76 : index
    %c0_335 = arith.constant 0 : index
    %268 = vector.load %arg14[%c76_334, %c0_335] : memref<144x128xf32, #tpu.memory_space<vmem>>, vector<8x128xf32>
    %c88_336 = arith.constant 88 : index
    %c0_337 = arith.constant 0 : index
    %269 = vector.load %arg14[%c88_336, %c0_337] : memref<144x128xf32, #tpu.memory_space<vmem>>, vector<8x128xf32>
    %c100_338 = arith.constant 100 : index
    %c0_339 = arith.constant 0 : index
    %270 = vector.load %arg14[%c100_338, %c0_339] : memref<144x128xf32, #tpu.memory_space<vmem>>, vector<8x128xf32>
    %c112_340 = arith.constant 112 : index
    %c0_341 = arith.constant 0 : index
    %271 = vector.load %arg14[%c112_340, %c0_341] : memref<144x128xf32, #tpu.memory_space<vmem>>, vector<8x128xf32>
    %c124 = arith.constant 124 : index
    %c0_342 = arith.constant 0 : index
    %272 = vector.load %arg14[%c124, %c0_342] : memref<144x128xf32, #tpu.memory_space<vmem>>, vector<8x128xf32>
    %273 = tpu.concatenate %265, %266, %267, %268, %269, %270, %271, %272 in 0 : vector<8x128xf32>, vector<8x128xf32>, vector<8x128xf32>, vector<8x128xf32>, vector<8x128xf32>, vector<8x128xf32>, vector<8x128xf32>, vector<8x128xf32> -> vector<64x128xf32>
    %c19 = arith.constant 19 : index
    %c0_343 = arith.constant 0 : index
    %c0_344 = arith.constant 0 : index
    %274 = vector.load %arg4[%c19, %c0_343, %c0_344] : memref<25x128x128xf32, #tpu.memory_space<vmem>>, vector<1x128x128xf32>
    %275 = vector.shape_cast %274 : vector<1x128x128xf32> to vector<128x128xf32>
    %cst_345 = arith.constant dense<0.000000e+00> : vector<64x128xf32>
    %276 = tpu.matmul %273, %275, %cst_345 {dimension_numbers = #tpu.dot_dimension_numbers<[1], [0], [0], [1], [0, 0, 1, 1], [], []>} : vector<64x128xf32>, vector<128x128xf32>, vector<64x128xf32> -> vector<64x128xf32>
    %277 = arith.addf %264, %276 : vector<64x128xf32>
    %c48_346 = arith.constant 48 : index
    %c0_347 = arith.constant 0 : index
    %278 = vector.load %arg14[%c48_346, %c0_347] : memref<144x128xf32, #tpu.memory_space<vmem>>, vector<8x128xf32>
    %c60_348 = arith.constant 60 : index
    %c0_349 = arith.constant 0 : index
    %279 = vector.load %arg14[%c60_348, %c0_349] : memref<144x128xf32, #tpu.memory_space<vmem>>, vector<8x128xf32>
    %c72_350 = arith.constant 72 : index
    %c0_351 = arith.constant 0 : index
    %280 = vector.load %arg14[%c72_350, %c0_351] : memref<144x128xf32, #tpu.memory_space<vmem>>, vector<8x128xf32>
    %c84_352 = arith.constant 84 : index
    %c0_353 = arith.constant 0 : index
    %281 = vector.load %arg14[%c84_352, %c0_353] : memref<144x128xf32, #tpu.memory_space<vmem>>, vector<8x128xf32>
    %c96_354 = arith.constant 96 : index
    %c0_355 = arith.constant 0 : index
    %282 = vector.load %arg14[%c96_354, %c0_355] : memref<144x128xf32, #tpu.memory_space<vmem>>, vector<8x128xf32>
    %c108_356 = arith.constant 108 : index
    %c0_357 = arith.constant 0 : index
    %283 = vector.load %arg14[%c108_356, %c0_357] : memref<144x128xf32, #tpu.memory_space<vmem>>, vector<8x128xf32>
    %c120_358 = arith.constant 120 : index
    %c0_359 = arith.constant 0 : index
    %284 = vector.load %arg14[%c120_358, %c0_359] : memref<144x128xf32, #tpu.memory_space<vmem>>, vector<8x128xf32>
    %c132 = arith.constant 132 : index
    %c0_360 = arith.constant 0 : index
    %285 = vector.load %arg14[%c132, %c0_360] : memref<144x128xf32, #tpu.memory_space<vmem>>, vector<8x128xf32>
    %286 = tpu.concatenate %278, %279, %280, %281, %282, %283, %284, %285 in 0 : vector<8x128xf32>, vector<8x128xf32>, vector<8x128xf32>, vector<8x128xf32>, vector<8x128xf32>, vector<8x128xf32>, vector<8x128xf32>, vector<8x128xf32> -> vector<64x128xf32>
    %c20 = arith.constant 20 : index
    %c0_361 = arith.constant 0 : index
    %c0_362 = arith.constant 0 : index
    %287 = vector.load %arg4[%c20, %c0_361, %c0_362] : memref<25x128x128xf32, #tpu.memory_space<vmem>>, vector<1x128x128xf32>
    %288 = vector.shape_cast %287 : vector<1x128x128xf32> to vector<128x128xf32>
    %cst_363 = arith.constant dense<0.000000e+00> : vector<64x128xf32>
    %289 = tpu.matmul %286, %288, %cst_363 {dimension_numbers = #tpu.dot_dimension_numbers<[1], [0], [0], [1], [0, 0, 1, 1], [], []>} : vector<64x128xf32>, vector<128x128xf32>, vector<64x128xf32> -> vector<64x128xf32>
    %290 = arith.addf %277, %289 : vector<64x128xf32>
    %c49_364 = arith.constant 49 : index
    %c0_365 = arith.constant 0 : index
    %291 = vector.load %arg14[%c49_364, %c0_365] : memref<144x128xf32, #tpu.memory_space<vmem>>, vector<8x128xf32>
    %c61_366 = arith.constant 61 : index
    %c0_367 = arith.constant 0 : index
    %292 = vector.load %arg14[%c61_366, %c0_367] : memref<144x128xf32, #tpu.memory_space<vmem>>, vector<8x128xf32>
    %c73_368 = arith.constant 73 : index
    %c0_369 = arith.constant 0 : index
    %293 = vector.load %arg14[%c73_368, %c0_369] : memref<144x128xf32, #tpu.memory_space<vmem>>, vector<8x128xf32>
    %c85_370 = arith.constant 85 : index
    %c0_371 = arith.constant 0 : index
    %294 = vector.load %arg14[%c85_370, %c0_371] : memref<144x128xf32, #tpu.memory_space<vmem>>, vector<8x128xf32>
    %c97_372 = arith.constant 97 : index
    %c0_373 = arith.constant 0 : index
    %295 = vector.load %arg14[%c97_372, %c0_373] : memref<144x128xf32, #tpu.memory_space<vmem>>, vector<8x128xf32>
    %c109_374 = arith.constant 109 : index
    %c0_375 = arith.constant 0 : index
    %296 = vector.load %arg14[%c109_374, %c0_375] : memref<144x128xf32, #tpu.memory_space<vmem>>, vector<8x128xf32>
    %c121_376 = arith.constant 121 : index
    %c0_377 = arith.constant 0 : index
    %297 = vector.load %arg14[%c121_376, %c0_377] : memref<144x128xf32, #tpu.memory_space<vmem>>, vector<8x128xf32>
    %c133 = arith.constant 133 : index
    %c0_378 = arith.constant 0 : index
    %298 = vector.load %arg14[%c133, %c0_378] : memref<144x128xf32, #tpu.memory_space<vmem>>, vector<8x128xf32>
    %299 = tpu.concatenate %291, %292, %293, %294, %295, %296, %297, %298 in 0 : vector<8x128xf32>, vector<8x128xf32>, vector<8x128xf32>, vector<8x128xf32>, vector<8x128xf32>, vector<8x128xf32>, vector<8x128xf32>, vector<8x128xf32> -> vector<64x128xf32>
    %c21 = arith.constant 21 : index
    %c0_379 = arith.constant 0 : index
    %c0_380 = arith.constant 0 : index
    %300 = vector.load %arg4[%c21, %c0_379, %c0_380] : memref<25x128x128xf32, #tpu.memory_space<vmem>>, vector<1x128x128xf32>
    %301 = vector.shape_cast %300 : vector<1x128x128xf32> to vector<128x128xf32>
    %cst_381 = arith.constant dense<0.000000e+00> : vector<64x128xf32>
    %302 = tpu.matmul %299, %301, %cst_381 {dimension_numbers = #tpu.dot_dimension_numbers<[1], [0], [0], [1], [0, 0, 1, 1], [], []>} : vector<64x128xf32>, vector<128x128xf32>, vector<64x128xf32> -> vector<64x128xf32>
    %303 = arith.addf %290, %302 : vector<64x128xf32>
    %c50_382 = arith.constant 50 : index
    %c0_383 = arith.constant 0 : index
    %304 = vector.load %arg14[%c50_382, %c0_383] : memref<144x128xf32, #tpu.memory_space<vmem>>, vector<8x128xf32>
    %c62_384 = arith.constant 62 : index
    %c0_385 = arith.constant 0 : index
    %305 = vector.load %arg14[%c62_384, %c0_385] : memref<144x128xf32, #tpu.memory_space<vmem>>, vector<8x128xf32>
    %c74_386 = arith.constant 74 : index
    %c0_387 = arith.constant 0 : index
    %306 = vector.load %arg14[%c74_386, %c0_387] : memref<144x128xf32, #tpu.memory_space<vmem>>, vector<8x128xf32>
    %c86_388 = arith.constant 86 : index
    %c0_389 = arith.constant 0 : index
    %307 = vector.load %arg14[%c86_388, %c0_389] : memref<144x128xf32, #tpu.memory_space<vmem>>, vector<8x128xf32>
    %c98_390 = arith.constant 98 : index
    %c0_391 = arith.constant 0 : index
    %308 = vector.load %arg14[%c98_390, %c0_391] : memref<144x128xf32, #tpu.memory_space<vmem>>, vector<8x128xf32>
    %c110_392 = arith.constant 110 : index
    %c0_393 = arith.constant 0 : index
    %309 = vector.load %arg14[%c110_392, %c0_393] : memref<144x128xf32, #tpu.memory_space<vmem>>, vector<8x128xf32>
    %c122_394 = arith.constant 122 : index
    %c0_395 = arith.constant 0 : index
    %310 = vector.load %arg14[%c122_394, %c0_395] : memref<144x128xf32, #tpu.memory_space<vmem>>, vector<8x128xf32>
    %c134 = arith.constant 134 : index
    %c0_396 = arith.constant 0 : index
    %311 = vector.load %arg14[%c134, %c0_396] : memref<144x128xf32, #tpu.memory_space<vmem>>, vector<8x128xf32>
    %312 = tpu.concatenate %304, %305, %306, %307, %308, %309, %310, %311 in 0 : vector<8x128xf32>, vector<8x128xf32>, vector<8x128xf32>, vector<8x128xf32>, vector<8x128xf32>, vector<8x128xf32>, vector<8x128xf32>, vector<8x128xf32> -> vector<64x128xf32>
    %c22 = arith.constant 22 : index
    %c0_397 = arith.constant 0 : index
    %c0_398 = arith.constant 0 : index
    %313 = vector.load %arg4[%c22, %c0_397, %c0_398] : memref<25x128x128xf32, #tpu.memory_space<vmem>>, vector<1x128x128xf32>
    %314 = vector.shape_cast %313 : vector<1x128x128xf32> to vector<128x128xf32>
    %cst_399 = arith.constant dense<0.000000e+00> : vector<64x128xf32>
    %315 = tpu.matmul %312, %314, %cst_399 {dimension_numbers = #tpu.dot_dimension_numbers<[1], [0], [0], [1], [0, 0, 1, 1], [], []>} : vector<64x128xf32>, vector<128x128xf32>, vector<64x128xf32> -> vector<64x128xf32>
    %316 = arith.addf %303, %315 : vector<64x128xf32>
    %c51_400 = arith.constant 51 : index
    %c0_401 = arith.constant 0 : index
    %317 = vector.load %arg14[%c51_400, %c0_401] : memref<144x128xf32, #tpu.memory_space<vmem>>, vector<8x128xf32>
    %c63_402 = arith.constant 63 : index
    %c0_403 = arith.constant 0 : index
    %318 = vector.load %arg14[%c63_402, %c0_403] : memref<144x128xf32, #tpu.memory_space<vmem>>, vector<8x128xf32>
    %c75_404 = arith.constant 75 : index
    %c0_405 = arith.constant 0 : index
    %319 = vector.load %arg14[%c75_404, %c0_405] : memref<144x128xf32, #tpu.memory_space<vmem>>, vector<8x128xf32>
    %c87_406 = arith.constant 87 : index
    %c0_407 = arith.constant 0 : index
    %320 = vector.load %arg14[%c87_406, %c0_407] : memref<144x128xf32, #tpu.memory_space<vmem>>, vector<8x128xf32>
    %c99_408 = arith.constant 99 : index
    %c0_409 = arith.constant 0 : index
    %321 = vector.load %arg14[%c99_408, %c0_409] : memref<144x128xf32, #tpu.memory_space<vmem>>, vector<8x128xf32>
    %c111_410 = arith.constant 111 : index
    %c0_411 = arith.constant 0 : index
    %322 = vector.load %arg14[%c111_410, %c0_411] : memref<144x128xf32, #tpu.memory_space<vmem>>, vector<8x128xf32>
    %c123_412 = arith.constant 123 : index
    %c0_413 = arith.constant 0 : index
    %323 = vector.load %arg14[%c123_412, %c0_413] : memref<144x128xf32, #tpu.memory_space<vmem>>, vector<8x128xf32>
    %c135 = arith.constant 135 : index
    %c0_414 = arith.constant 0 : index
    %324 = vector.load %arg14[%c135, %c0_414] : memref<144x128xf32, #tpu.memory_space<vmem>>, vector<8x128xf32>
    %325 = tpu.concatenate %317, %318, %319, %320, %321, %322, %323, %324 in 0 : vector<8x128xf32>, vector<8x128xf32>, vector<8x128xf32>, vector<8x128xf32>, vector<8x128xf32>, vector<8x128xf32>, vector<8x128xf32>, vector<8x128xf32> -> vector<64x128xf32>
    %c23 = arith.constant 23 : index
    %c0_415 = arith.constant 0 : index
    %c0_416 = arith.constant 0 : index
    %326 = vector.load %arg4[%c23, %c0_415, %c0_416] : memref<25x128x128xf32, #tpu.memory_space<vmem>>, vector<1x128x128xf32>
    %327 = vector.shape_cast %326 : vector<1x128x128xf32> to vector<128x128xf32>
    %cst_417 = arith.constant dense<0.000000e+00> : vector<64x128xf32>
    %328 = tpu.matmul %325, %327, %cst_417 {dimension_numbers = #tpu.dot_dimension_numbers<[1], [0], [0], [1], [0, 0, 1, 1], [], []>} : vector<64x128xf32>, vector<128x128xf32>, vector<64x128xf32> -> vector<64x128xf32>
    %329 = arith.addf %316, %328 : vector<64x128xf32>
    %c52_418 = arith.constant 52 : index
    %c0_419 = arith.constant 0 : index
    %330 = vector.load %arg14[%c52_418, %c0_419] : memref<144x128xf32, #tpu.memory_space<vmem>>, vector<8x128xf32>
    %c64_420 = arith.constant 64 : index
    %c0_421 = arith.constant 0 : index
    %331 = vector.load %arg14[%c64_420, %c0_421] : memref<144x128xf32, #tpu.memory_space<vmem>>, vector<8x128xf32>
    %c76_422 = arith.constant 76 : index
    %c0_423 = arith.constant 0 : index
    %332 = vector.load %arg14[%c76_422, %c0_423] : memref<144x128xf32, #tpu.memory_space<vmem>>, vector<8x128xf32>
    %c88_424 = arith.constant 88 : index
    %c0_425 = arith.constant 0 : index
    %333 = vector.load %arg14[%c88_424, %c0_425] : memref<144x128xf32, #tpu.memory_space<vmem>>, vector<8x128xf32>
    %c100_426 = arith.constant 100 : index
    %c0_427 = arith.constant 0 : index
    %334 = vector.load %arg14[%c100_426, %c0_427] : memref<144x128xf32, #tpu.memory_space<vmem>>, vector<8x128xf32>
    %c112_428 = arith.constant 112 : index
    %c0_429 = arith.constant 0 : index
    %335 = vector.load %arg14[%c112_428, %c0_429] : memref<144x128xf32, #tpu.memory_space<vmem>>, vector<8x128xf32>
    %c124_430 = arith.constant 124 : index
    %c0_431 = arith.constant 0 : index
    %336 = vector.load %arg14[%c124_430, %c0_431] : memref<144x128xf32, #tpu.memory_space<vmem>>, vector<8x128xf32>
    %c136 = arith.constant 136 : index
    %c0_432 = arith.constant 0 : index
    %337 = vector.load %arg14[%c136, %c0_432] : memref<144x128xf32, #tpu.memory_space<vmem>>, vector<8x128xf32>
    %338 = tpu.concatenate %330, %331, %332, %333, %334, %335, %336, %337 in 0 : vector<8x128xf32>, vector<8x128xf32>, vector<8x128xf32>, vector<8x128xf32>, vector<8x128xf32>, vector<8x128xf32>, vector<8x128xf32>, vector<8x128xf32> -> vector<64x128xf32>
    %c24_433 = arith.constant 24 : index
    %c0_434 = arith.constant 0 : index
    %c0_435 = arith.constant 0 : index
    %339 = vector.load %arg4[%c24_433, %c0_434, %c0_435] : memref<25x128x128xf32, #tpu.memory_space<vmem>>, vector<1x128x128xf32>
    %340 = vector.shape_cast %339 : vector<1x128x128xf32> to vector<128x128xf32>
    %cst_436 = arith.constant dense<0.000000e+00> : vector<64x128xf32>
    %341 = tpu.matmul %338, %340, %cst_436 {dimension_numbers = #tpu.dot_dimension_numbers<[1], [0], [0], [1], [0, 0, 1, 1], [], []>} : vector<64x128xf32>, vector<128x128xf32>, vector<64x128xf32> -> vector<64x128xf32>
    %342 = arith.addf %329, %341 : vector<64x128xf32>
    %c0_437 = arith.constant 0 : index
    %c0_438 = arith.constant 0 : index
    %343 = vector.load %arg5[%c0_437, %c0_438] : memref<1x128xf32, #tpu.memory_space<vmem>>, vector<1x128xf32>
    %344 = vector.broadcast %343 : vector<1x128xf32> to vector<64x128xf32>
    %345 = arith.addf %342, %344 : vector<64x128xf32>
    %cst_439 = arith.constant 0.000000e+00 : f32
    %346 = vector.broadcast %cst_439 : f32 to vector<64x128xf32>
    %347 = arith.maximumf %345, %346 : vector<64x128xf32>
    %c0_440 = arith.constant 0 : index
    %c0_441 = arith.constant 0 : index
    %348 = vector.load %arg6[%c0_440, %c0_441] : memref<64x64xf32, #tpu.memory_space<vmem>>, vector<64x64xf32>
    %cst_442 = arith.constant dense<0.000000e+00> : vector<64x128xf32>
    %349 = tpu.matmul %348, %347, %cst_442 {dimension_numbers = #tpu.dot_dimension_numbers<[1], [0], [0], [1], [0, 0, 1, 1], [], []>} : vector<64x64xf32>, vector<64x128xf32>, vector<64x128xf32> -> vector<64x128xf32>
    %350 = vector.extract_strided_slice %349 {offsets = [0, 0], sizes = [16, 128], strides = [1, 1]} : vector<64x128xf32> to vector<16x128xf32>
    %351 = vector.extract_strided_slice %349 {offsets = [16, 0], sizes = [16, 128], strides = [1, 1]} : vector<64x128xf32> to vector<16x128xf32>
    %352 = arith.maximumf %350, %351 : vector<16x128xf32>
    %353 = vector.extract_strided_slice %349 {offsets = [32, 0], sizes = [16, 128], strides = [1, 1]} : vector<64x128xf32> to vector<16x128xf32>
    %354 = vector.extract_strided_slice %349 {offsets = [48, 0], sizes = [16, 128], strides = [1, 1]} : vector<64x128xf32> to vector<16x128xf32>
    %355 = arith.maximumf %353, %354 : vector<16x128xf32>
    %356 = arith.maximumf %352, %355 : vector<16x128xf32>
    %c0_443 = arith.constant 0 : index
    %c0_444 = arith.constant 0 : index
    %357 = vector.load %arg15[%c0_443, %c0_444] : memref<16x128xf32, #tpu.memory_space<vmem>>, vector<16x128xf32>
    tpu.vector_store %arg15[%c0_443, %c0_444], %356 {strides = array<i32>} : memref<16x128xf32, #tpu.memory_space<vmem>>, vector<16x128xf32>,
    %c0_445 = arith.constant 0 : index
    %c0_446 = arith.constant 0 : index
    %358 = vector.load %arg15[%c0_445, %c0_446] : memref<16x128xf32, #tpu.memory_space<vmem>>, vector<1x128xf32>
    %c1_447 = arith.constant 1 : index
    %c0_448 = arith.constant 0 : index
    %359 = vector.load %arg15[%c1_447, %c0_448] : memref<16x128xf32, #tpu.memory_space<vmem>>, vector<1x128xf32>
    %c2_449 = arith.constant 2 : index
    %c0_450 = arith.constant 0 : index
    %360 = vector.load %arg15[%c2_449, %c0_450] : memref<16x128xf32, #tpu.memory_space<vmem>>, vector<1x128xf32>
    %c3_451 = arith.constant 3 : index
    %c0_452 = arith.constant 0 : index
    %361 = vector.load %arg15[%c3_451, %c0_452] : memref<16x128xf32, #tpu.memory_space<vmem>>, vector<1x128xf32>
    %c4_453 = arith.constant 4 : index
    %c0_454 = arith.constant 0 : index
    %362 = vector.load %arg15[%c4_453, %c0_454] : memref<16x128xf32, #tpu.memory_space<vmem>>, vector<1x128xf32>
    %c5_455 = arith.constant 5 : index
    %c0_456 = arith.constant 0 : index
    %363 = vector.load %arg15[%c5_455, %c0_456] : memref<16x128xf32, #tpu.memory_space<vmem>>, vector<1x128xf32>
    %c6_457 = arith.constant 6 : index
    %c0_458 = arith.constant 0 : index
    %364 = vector.load %arg15[%c6_457, %c0_458] : memref<16x128xf32, #tpu.memory_space<vmem>>, vector<1x128xf32>
    %c7_459 = arith.constant 7 : index
    %c0_460 = arith.constant 0 : index
    %365 = vector.load %arg15[%c7_459, %c0_460] : memref<16x128xf32, #tpu.memory_space<vmem>>, vector<1x128xf32>
    %c8_461 = arith.constant 8 : index
    %c0_462 = arith.constant 0 : index
    %366 = vector.load %arg15[%c8_461, %c0_462] : memref<16x128xf32, #tpu.memory_space<vmem>>, vector<1x128xf32>
    %c9_463 = arith.constant 9 : index
    %c0_464 = arith.constant 0 : index
    %367 = vector.load %arg15[%c9_463, %c0_464] : memref<16x128xf32, #tpu.memory_space<vmem>>, vector<1x128xf32>
    %c10_465 = arith.constant 10 : index
    %c0_466 = arith.constant 0 : index
    %368 = vector.load %arg15[%c10_465, %c0_466] : memref<16x128xf32, #tpu.memory_space<vmem>>, vector<1x128xf32>
    %c11_467 = arith.constant 11 : index
    %c0_468 = arith.constant 0 : index
    %369 = vector.load %arg15[%c11_467, %c0_468] : memref<16x128xf32, #tpu.memory_space<vmem>>, vector<1x128xf32>
    %c12_469 = arith.constant 12 : index
    %c0_470 = arith.constant 0 : index
    %370 = vector.load %arg15[%c12_469, %c0_470] : memref<16x128xf32, #tpu.memory_space<vmem>>, vector<1x128xf32>
    %c13_471 = arith.constant 13 : index
    %c0_472 = arith.constant 0 : index
    %371 = vector.load %arg15[%c13_471, %c0_472] : memref<16x128xf32, #tpu.memory_space<vmem>>, vector<1x128xf32>
    %c14_473 = arith.constant 14 : index
    %c0_474 = arith.constant 0 : index
    %372 = vector.load %arg15[%c14_473, %c0_474] : memref<16x128xf32, #tpu.memory_space<vmem>>, vector<1x128xf32>
    %c15_475 = arith.constant 15 : index
    %c0_476 = arith.constant 0 : index
    %373 = vector.load %arg15[%c15_475, %c0_476] : memref<16x128xf32, #tpu.memory_space<vmem>>, vector<1x128xf32>
    %374 = tpu.concatenate %358, %359, %360, %361, %362, %363, %364, %365, %366, %367, %368, %369, %370, %371, %372, %373 in 1 : vector<1x128xf32>, vector<1x128xf32>, vector<1x128xf32>, vector<1x128xf32>, vector<1x128xf32>, vector<1x128xf32>, vector<1x128xf32>, vector<1x128xf32>, vector<1x128xf32>, vector<1x128xf32>, vector<1x128xf32>, vector<1x128xf32>, vector<1x128xf32>, vector<1x128xf32>, vector<1x128xf32>, vector<1x128xf32> -> vector<1x2048xf32>
    %c0_477 = arith.constant 0 : index
    %c0_478 = arith.constant 0 : index
    %375 = vector.load %arg7[%c0_477, %c0_478] : memref<2048x128xf32, #tpu.memory_space<vmem>>, vector<2048x128xf32>
    %cst_479 = arith.constant dense<0.000000e+00> : vector<1x128xf32>
    %376 = tpu.matmul %374, %375, %cst_479 {dimension_numbers = #tpu.dot_dimension_numbers<[1], [0], [0], [1], [0, 0, 1, 1], [], []>} : vector<1x2048xf32>, vector<2048x128xf32>, vector<1x128xf32> -> vector<1x128xf32>
    %c0_480 = arith.constant 0 : index
    %c0_481 = arith.constant 0 : index
    %377 = vector.load %arg8[%c0_480, %c0_481] : memref<1x128xf32, #tpu.memory_space<vmem>>, vector<1x128xf32>
    %378 = arith.addf %376, %377 : vector<1x128xf32>
    %cst_482 = arith.constant 0.000000e+00 : f32
    %379 = vector.broadcast %cst_482 : f32 to vector<1x128xf32>
    %380 = arith.maximumf %378, %379 : vector<1x128xf32>
    %c0_483 = arith.constant 0 : index
    %c0_484 = arith.constant 0 : index
    %381 = vector.load %arg9[%c0_483, %c0_484] : memref<128x128xf32, #tpu.memory_space<vmem>>, vector<128x128xf32>
    %cst_485 = arith.constant dense<0.000000e+00> : vector<1x128xf32>
    %382 = tpu.matmul %380, %381, %cst_485 {dimension_numbers = #tpu.dot_dimension_numbers<[1], [0], [0], [1], [0, 0, 1, 1], [], []>} : vector<1x128xf32>, vector<128x128xf32>, vector<1x128xf32> -> vector<1x128xf32>
    %c0_486 = arith.constant 0 : index
    %c0_487 = arith.constant 0 : index
    %383 = vector.load %arg10[%c0_486, %c0_487] : memref<1x128xf32, #tpu.memory_space<vmem>>, vector<1x128xf32>
    %384 = arith.addf %382, %383 : vector<1x128xf32>
    %cst_488 = arith.constant 0.000000e+00 : f32
    %385 = vector.broadcast %cst_488 : f32 to vector<1x128xf32>
    %386 = arith.maximumf %384, %385 : vector<1x128xf32>
    %c0_489 = arith.constant 0 : index
    %c0_490 = arith.constant 0 : index
    %387 = vector.load %arg11[%c0_489, %c0_490] : memref<128x128xf32, #tpu.memory_space<vmem>>, vector<128x128xf32>
    %cst_491 = arith.constant dense<0.000000e+00> : vector<1x128xf32>
    %388 = tpu.matmul %386, %387, %cst_491 {dimension_numbers = #tpu.dot_dimension_numbers<[1], [0], [0], [1], [0, 0, 1, 1], [], []>} : vector<1x128xf32>, vector<128x128xf32>, vector<1x128xf32> -> vector<1x128xf32>
    %c0_492 = arith.constant 0 : index
    %c0_493 = arith.constant 0 : index
    %389 = vector.load %arg12[%c0_492, %c0_493] : memref<1x128xf32, #tpu.memory_space<vmem>>, vector<1x128xf32>
    %390 = arith.addf %388, %389 : vector<1x128xf32>
    %391 = vector.shape_cast %390 : vector<1x128xf32> to vector<1x128xf32>
    %392 = vector.broadcast %391 : vector<1x128xf32> to vector<8x128xf32>
    %c0_494 = arith.constant 0 : index
    %c0_495 = arith.constant 0 : index
    %c0_496 = arith.constant 0 : index
    %393 = vector.load %arg13[%c0_494, %c0_495, %c0_496] : memref<1x8x128xf32, #tpu.memory_space<vmem>>, vector<1x8x128xf32>
    %394 = vector.shape_cast %393 : vector<1x8x128xf32> to vector<8x128xf32>
    %395 = vector.shape_cast %392 : vector<8x128xf32> to vector<1x8x128xf32>
    tpu.vector_store %arg13[%c0_494, %c0_495, %c0_496], %395 {strides = array<i32>} : memref<1x8x128xf32, #tpu.memory_space<vmem>>, vector<1x8x128xf32>,
    return
  }
  func.func @transform_0(%arg0: i32) -> (i32, i32, i32) {
    %c0_i32 = arith.constant 0 : i32
    %c0_i32_0 = arith.constant 0 : i32
    %c0_i32_1 = arith.constant 0 : i32
    return %arg0, %c0_i32, %c0_i32_0 : i32, i32, i32
  }
  func.func @transform_1(%arg0: i32) -> (i32, i32) {
    %c0_i32 = arith.constant 0 : i32
    %c0_i32_0 = arith.constant 0 : i32
    %c0_i32_1 = arith.constant 0 : i32
    return %c0_i32, %c0_i32_0 : i32, i32
  }
  func.func @transform_2(%arg0: i32) -> (i32, i32) {
    %c0_i32 = arith.constant 0 : i32
    %c0_i32_0 = arith.constant 0 : i32
    %c0_i32_1 = arith.constant 0 : i32
    return %c0_i32, %c0_i32_0 : i32, i32
  }
  func.func @transform_3(%arg0: i32) -> (i32, i32, i32) {
    %c0_i32 = arith.constant 0 : i32
    %c0_i32_0 = arith.constant 0 : i32
    %c0_i32_1 = arith.constant 0 : i32
    %c0_i32_2 = arith.constant 0 : i32
    return %c0_i32, %c0_i32_0, %c0_i32_1 : i32, i32, i32
  }
  func.func @transform_4(%arg0: i32) -> (i32, i32) {
    %c0_i32 = arith.constant 0 : i32
    %c0_i32_0 = arith.constant 0 : i32
    %c0_i32_1 = arith.constant 0 : i32
    return %c0_i32, %c0_i32_0 : i32, i32
  }
  func.func @transform_5(%arg0: i32) -> (i32, i32) {
    %c0_i32 = arith.constant 0 : i32
    %c0_i32_0 = arith.constant 0 : i32
    %c0_i32_1 = arith.constant 0 : i32
    return %c0_i32, %c0_i32_0 : i32, i32
  }
  func.func @transform_6(%arg0: i32) -> (i32, i32) {
    %c0_i32 = arith.constant 0 : i32
    %c0_i32_0 = arith.constant 0 : i32
    %c0_i32_1 = arith.constant 0 : i32
    return %c0_i32, %c0_i32_0 : i32, i32
  }
  func.func @transform_7(%arg0: i32) -> (i32, i32) {
    %c0_i32 = arith.constant 0 : i32
    %c0_i32_0 = arith.constant 0 : i32
    %c0_i32_1 = arith.constant 0 : i32
    return %c0_i32, %c0_i32_0 : i32, i32
  }
  func.func @transform_8(%arg0: i32) -> (i32, i32) {
    %c0_i32 = arith.constant 0 : i32
    %c0_i32_0 = arith.constant 0 : i32
    %c0_i32_1 = arith.constant 0 : i32
    return %c0_i32, %c0_i32_0 : i32, i32
  }
  func.func @transform_9(%arg0: i32) -> (i32, i32) {
    %c0_i32 = arith.constant 0 : i32
    %c0_i32_0 = arith.constant 0 : i32
    %c0_i32_1 = arith.constant 0 : i32
    return %c0_i32, %c0_i32_0 : i32, i32
  }
  func.func @transform_10(%arg0: i32) -> (i32, i32) {
    %c0_i32 = arith.constant 0 : i32
    %c0_i32_0 = arith.constant 0 : i32
    %c0_i32_1 = arith.constant 0 : i32
    return %c0_i32, %c0_i32_0 : i32, i32
  }
  func.func @transform_11(%arg0: i32) -> (i32, i32) {
    %c0_i32 = arith.constant 0 : i32
    %c0_i32_0 = arith.constant 0 : i32
    %c0_i32_1 = arith.constant 0 : i32
    return %c0_i32, %c0_i32_0 : i32, i32
  }
  func.func @transform_12(%arg0: i32) -> (i32, i32, i32) {
    %c0_i32 = arith.constant 0 : i32
    %c0_i32_0 = arith.constant 0 : i32
    %c0_i32_1 = arith.constant 0 : i32
    return %arg0, %c0_i32, %c0_i32_0 : i32, i32, i32
  }
}

</mosaic_0001>

<bundles_post_ra>
// kernel: convnet_forward.1
= control target key start
LH: loop header
LB: loop body
LE: loop exit
PB: predicated region body
PF: predicated region fallthrough
CT: control target
= control target key end

     0   :  { %s10047_s21 = smov 0   ;;  %s12907_s0 = inlined_call_operand.vmem [shape: f32[2,576,32], index: 0, kind: input, shape index: {}]   ;;  %s12908_s1 = inlined_call_operand.vmem [shape: f32[32,128], index: 1, kind: input, shape index: {}]   ;;  %s12909_s2 = inlined_call_operand.vmem [shape: f32[1,128], index: 2, kind: input, shape index: {}]   ;;  %s12910_s3 = inlined_call_operand.vmem [shape: f32[25,128,128], index: 3, kind: input, shape index: {}]   ;;  %s12911_s4 = inlined_call_operand.vmem [shape: f32[1,128], index: 4, kind: input, shape index: {}]   ;;  %s12912_s5 = inlined_call_operand.vmem [shape: f32[64,64], index: 5, kind: input, shape index: {}]   ;;  %s12913_s6 = inlined_call_operand.vmem [shape: f32[2048,128], index: 6, kind: input, shape index: {}]   ;;  %s12914_s7 = inlined_call_operand.vmem [shape: f32[1,128], index: 7, kind: input, shape index: {}]   ;;  %s12915_s8 = inlined_call_operand.vmem [shape: f32[128,128], index: 8, kind: input, shape index: {}]   ;;  %s12916_s9 = inlined_call_operand.vmem [shape: f32[1,128], index: 9, kind: input, shape index: {}]   ;;  %s12917_s10 = inlined_call_operand.vmem [shape: f32[128,128], index: 10, kind: input, shape index: {}]   ;;  %s12918_s11 = inlined_call_operand.vmem [shape: f32[1,128], index: 11, kind: input, shape index: {}]   ;;  %s12919_s12 = inlined_call_operand.vmem [shape: f32[2,8,128], index: 12, kind: output, shape index: {}]  }
   0x1 LB: > { %s5810_s22 = sadd.s32 4294967295, %s9977_s21   ;;  %p5814_p0 = scmp.ge.s32.totalorder %s9977_s21, 1  ;;  %s9977_s21 = sphi %s10047_s21, %s22_s21  }
   0x2   : > { %p362_p1 = scmp.lt.s32.totalorder %s9977_s21, 3 }
   0x4   : > { %p363_p2 = pnand %p5814_p0, %p362_p1 }
   0x5   : > { %v484_v0 = vld [vmem:[%s12908_s1] sm:$0xff] (!%p363_p2)  ;;  %v485_v1 = vld [vmem:[%s12908_s1 + $0x8] sm:$0xff] (!%p363_p2)  ;;  %v486_v2 = vld [vmem:[%s12908_s1 + $0x10] sm:$0xff] (!%p363_p2)  ;;  %p403_p3 = scmp.lt.s32.totalorder (!%p363_p2), %s5810_s22, 1  ;;  %vm495_vm0 = vcmask (!%p363_p2), 261120   ;;  %vm4605_vm1 = vcmask (!%p363_p2), 523264  }
   0x6   : > { %366 = sbr.rel (%p363_p2) target bundleno = 2296 (0x8f8), region = 68  ;;  %v8605_v3 = vpack.c.bf16 (!%p363_p2), %v485_v1, %v484_v0  ;;  %v487_v4 = vld [vmem:[%s12908_s1 + $0x18] sm:$0xff] (!%p363_p2)  ;;  %vm9980_vm2 = vmmov (!%p363_p2), 0  }
   0x7   : > { %v8609_v5 = vpack.c.bf16 (!%p363_p2), %v487_v4, %v486_v2 }
   0x8   : > { %8606 = vmatprep.subr.bf16.mxu0 (!%p363_p2), %v8605_v3 }
   0x9   : > { %8608 = vmatpush3.bf16.msra.mxu0 (!%p363_p2), %v8605_v3 }
   0xa   : > { %8610 = vmatprep.subr.bf16.mxu0 (!%p363_p2), %v8609_v5 }
   0xd   : > { %s12921_s22 = smov (!%p403_p3, %s5810_s22), 1  ;;  %8612 = vmatpush3.bf16.msra.mxu0 %v8609_v5 }
   0xe   : > { %s9925_s13 = smul.u32 576, %s12921_s22  ;;  %s5816_s29 = sshll.u32 %s12921_s22, 3 }
   0xf   : > { %s411_s14 = scalar_lea.vmem %s12919_s12, %s5816_s29 }
  0x10   : > { %s10073_s16 = scalar_lea.vmem %s12907_s0, %s9925_s13 }
  0x11   : > { %v412_v6 = vld [vmem:[%s10073_s16] sm:$0xff]  ;;  %v413_v7 = vld [vmem:[%s10073_s16 + $0x8] sm:$0xff]  ;;  %v414_v8 = vld [vmem:[%s10073_s16 + $0x10] sm:$0xff] }
  0x12   : > { %7299 = vmatprep.mubr.msk.f32.mxu0 %vm495_vm0, %v412_v6  ;;  %v415_v9 = vld [vmem:[%s10073_s16 + $0x18] sm:$0xff]  ;;  %v416_v10 = vld [vmem:[%s10073_s16 + $0x20] sm:$0xff]  ;;  %v417_v11 = vld [vmem:[%s10073_s16 + $0x28] sm:$0xff] }
  0x13   : > { %7300 = vmatmul.mubr.msk.f32.vlgmr.msra.gmra.mrb[0].mxu0 %vm495_vm0, %v413_v7  ;;  %v418_v12 = vld [vmem:[%s10073_s16 + $0x30] sm:$0xff]  ;;  %v419_v13 = vld [vmem:[%s10073_s16 + $0x38] sm:$0xff]  ;;  %v420_v14 = vld [vmem:[%s10073_s16 + $0x40] sm:$0xff] }
  0x14   : > { %7302 = vmatprep.mubr.msk.f32.mxu0 %vm495_vm0, %v414_v8  ;;  %v421_v15 = vld [vmem:[%s10073_s16 + $0x48] sm:$0xff]  ;;  %v422_v16 = vld [vmem:[%s10073_s16 + $0x50] sm:$0xff]  ;;  %v423_v17 = vld [vmem:[%s10073_s16 + $0x58] sm:$0xff] }
  0x15   : > { %v424_v18 = vld [vmem:[%s10073_s16 + $0x60] sm:$0xff]  ;;  %v425_v19 = vld [vmem:[%s10073_s16 + $0x68] sm:$0xff]  ;;  %v426_v20 = vld [vmem:[%s10073_s16 + $0x70] sm:$0xff] }
  0x16   : > { %v427_v21 = vld [vmem:[%s10073_s16 + $0x78] sm:$0xff]  ;;  %v428_v22 = vld [vmem:[%s10073_s16 + $0x80] sm:$0xff]  ;;  %v429_v23 = vld [vmem:[%s10073_s16 + $0x88] sm:$0xff] }
  0x17   : > { %7303 = vmatmul.mubr.msk.f32.gmra.mrb[2].mxu0 %vm495_vm0, %v415_v9  ;;  %v430_v24 = vld [vmem:[%s10073_s16 + $0x90] sm:$0xff]  ;;  %v431_v25 = vld [vmem:[%s10073_s16 + $0x98] sm:$0xff]  ;;  %v432_v26 = vld [vmem:[%s10073_s16 + $0xa0] sm:$0xff] }
  0x18   : > { %7305 = vmatprep.mubr.msk.f32.mxu0 %vm495_vm0, %v416_v10  ;;  %v433_v27 = vld [vmem:[%s10073_s16 + $0xa8] sm:$0xff]  ;;  %v434_v28 = vld [vmem:[%s10073_s16 + $0xb0] sm:$0xff]  ;;  %v435_v29 = vld [vmem:[%s10073_s16 + $0xb8] sm:$0xff] }
  0x19   : > { %v436_v30 = vld [vmem:[%s10073_s16 + $0xc0] sm:$0xff]  ;;  %v437_v31 = vld [vmem:[%s10073_s16 + $0xc8] sm:$0xff]  ;;  %v438_v32 = vld [vmem:[%s10073_s16 + $0xd0] sm:$0xff] }
  0x1a   : > { %v439_v33 = vld [vmem:[%s10073_s16 + $0xd8] sm:$0xff]  ;;  %v440_v34 = vld [vmem:[%s10073_s16 + $0xe0] sm:$0xff]  ;;  %v441_v35 = vld [vmem:[%s10073_s16 + $0xe8] sm:$0xff] }
  0x1b   : > { %7306 = vmatmul.mubr.msk.f32.gmra.mrb[4].mxu0 %vm495_vm0, %v417_v11  ;;  %v442_v36 = vld [vmem:[%s10073_s16 + $0xf0] sm:$0xff]  ;;  %v443_v37 = vld [vmem:[%s10073_s16 + $0xf8] sm:$0xff]  ;;  %v444_v38 = vld [vmem:[%s10073_s16 + $0x100] sm:$0xff] }
  0x1c   : > { %7308 = vmatprep.mubr.msk.f32.mxu0 %vm495_vm0, %v418_v12  ;;  %v445_v39 = vld [vmem:[%s10073_s16 + $0x108] sm:$0xff]  ;;  %v446_v40 = vld [vmem:[%s10073_s16 + $0x110] sm:$0xff]  ;;  %v447_v41 = vld [vmem:[%s10073_s16 + $0x118] sm:$0xff] }
  0x1d   : > { %v448_v42 = vld [vmem:[%s10073_s16 + $0x120] sm:$0xff]  ;;  %v449_v43 = vld [vmem:[%s10073_s16 + $0x128] sm:$0xff]  ;;  %v450_v44 = vld [vmem:[%s10073_s16 + $0x130] sm:$0xff] }
  0x1e   : > { %v451_v45 = vld [vmem:[%s10073_s16 + $0x138] sm:$0xff]  ;;  %v452_v46 = vld [vmem:[%s10073_s16 + $0x140] sm:$0xff]  ;;  %v453_v47 = vld [vmem:[%s10073_s16 + $0x148] sm:$0xff] }
  0x1f   : > { %7309 = vmatmul.mubr.msk.f32.gmra.mrb[6].mxu0 %vm495_vm0, %v419_v13  ;;  %v454_v48 = vld [vmem:[%s10073_s16 + $0x150] sm:$0xff]  ;;  %v455_v49 = vld [vmem:[%s10073_s16 + $0x158] sm:$0xff]  ;;  %v456_v50 = vld [vmem:[%s10073_s16 + $0x160] sm:$0xff] }
  0x20   : > { %7311 = vmatprep.mubr.msk.f32.mxu0 %vm495_vm0, %v420_v14  ;;  %v457_v51 = vld [vmem:[%s10073_s16 + $0x168] sm:$0xff]  ;;  %v458_v52 = vld [vmem:[%s10073_s16 + $0x170] sm:$0xff]  ;;  %v459_v53 = vld [vmem:[%s10073_s16 + $0x178] sm:$0xff] }
  0x21   : > { %v460_v54 = vld [vmem:[%s10073_s16 + $0x180] sm:$0xff]  ;;  %v461_v55 = vld [vmem:[%s10073_s16 + $0x188] sm:$0xff]  ;;  %v462_v56 = vld [vmem:[%s10073_s16 + $0x190] sm:$0xff] }
  0x22   : > { %v463_v57 = vld [vmem:[%s10073_s16 + $0x198] sm:$0xff]  ;;  %v464_v58 = vld [vmem:[%s10073_s16 + $0x1a0] sm:$0xff]  ;;  %v465_v59 = vld [vmem:[%s10073_s16 + $0x1a8] sm:$0xff] }
  0x23   : > { %7312 = vmatmul.mubr.msk.f32.gmra.mrb[8].mxu0 %vm495_vm0, %v421_v15  ;;  %v466_v60 = vld [vmem:[%s10073_s16 + $0x1b0] sm:$0xff]  ;;  %v467_v61 = vld [vmem:[%s10073_s16 + $0x1b8] sm:$0xff]  ;;  %v468_v62 = vld [vmem:[%s10073_s16 + $0x1c0] sm:$0xff] }
  0x24   : > { %7314 = vmatprep.mubr.msk.f32.mxu0 %vm495_vm0, %v422_v16  ;;  %v469_v63 = vld [vmem:[%s10073_s16 + $0x1c8] sm:$0xff]  ;;  %v470_v0 = vld [vmem:[%s10073_s16 + $0x1d0] sm:$0xff]  ;;  %v471_v1 = vld [vmem:[%s10073_s16 + $0x1d8] sm:$0xff] }
  0x25   : > { %v472_v2 = vld [vmem:[%s10073_s16 + $0x1e0] sm:$0xff]  ;;  %v473_v3 = vld [vmem:[%s10073_s16 + $0x1e8] sm:$0xff]  ;;  %v474_v4 = vld [vmem:[%s10073_s16 + $0x1f0] sm:$0xff] }
  0x26   : > { %v475_v5 = vld [vmem:[%s10073_s16 + $0x1f8] sm:$0xff]  ;;  %v476_v6 = vld [vmem:[%s10073_s16 + $0x200] sm:$0xff]  ;;  %v477_v7 = vld [vmem:[%s10073_s16 + $0x208] sm:$0xff] }
  0x27   : > { %7315 = vmatmul.mubr.msk.f32.gmra.mrb[10].mxu0 %vm495_vm0, %v423_v17  ;;  %v478_v8 = vld [vmem:[%s10073_s16 + $0x210] sm:$0xff]  ;;  %v479_v9 = vld [vmem:[%s10073_s16 + $0x218] sm:$0xff]  ;;  %v480_v10 = vld [vmem:[%s10073_s16 + $0x220] sm:$0xff] }
  0x28   : > { %7317 = vmatprep.mubr.msk.f32.mxu0 %vm495_vm0, %v424_v18  ;;  %v481_v11 = vld [vmem:[%s10073_s16 + $0x228] sm:$0xff]  ;;  %v482_v12 = vld [vmem:[%s10073_s16 + $0x230] sm:$0xff]  ;;  %v483_v13 = vld [vmem:[%s10073_s16 + $0x238] sm:$0xff] }
  0x29   : > { %v5890_v14 = vld [vmem:[%s12910_s3 + $0x80] sm:$0xff]  ;;  %v5891_v15 = vld [vmem:[%s12910_s3 + $0x88] sm:$0xff]  ;;  %v5892_v17 = vld [vmem:[%s12910_s3 + $0x90] sm:$0xff] }
  0x2a   : > { %v8613_v16 = vpack.c.bf16 %v5891_v15, %v5890_v14  ;;  %v5893_v18 = vld [vmem:[%s12910_s3 + $0x98] sm:$0xff] }
  0x2b   : > { %7318 = vmatmul.mubr.msk.f32.gmra.mrb[12].mxu0 %vm495_vm0, %v425_v19  ;;  %v5970_v19 = vld [vmem:[%s12910_s3 + $0x300] sm:$0xff] }
  0x2c   : > { %7320 = vmatprep.mubr.msk.f32.mxu0 %vm495_vm0, %v426_v20  ;;  %8614 = vmatprep.subr.bf16.mxu0 %v8613_v16  ;;  %v8617_v20 = vpack.c.bf16 %v5893_v18, %v5892_v17 }
  0x2d   : > { %8616 = vmatpush3.bf16.msra.mxu0 %v8613_v16 }
  0x2e   : > { %8618 = vmatprep.subr.bf16.mxu0 %v8617_v20 }
  0x2f   : > { %7321 = vmatmul.mubr.msk.f32.gmra.mrb[14].mxu0 %vm495_vm0, %v427_v21  ;;  %v5971_v21 = vld [vmem:[%s12910_s3 + $0x308] sm:$0xff] }
  0x30   : > { %7323 = vmatprep.mubr.msk.f32.mxu0 %vm495_vm0, %v428_v22  ;;  %v8805_v22 = vpack.c.bf16 %v5971_v21, %v5970_v19 }
  0x31   : > { %8620 = vmatpush3.bf16.msra.mxu0 %v8617_v20  ;;  %v10348_v20 = vld [vmem:[%s12909_s2] ss:$0 sm:$0xff] }
  0x32   : > { %8806 = vmatprep.subr.bf16.mxu1 %v8805_v22 }
  0x33   : > { %7324 = vmatmul.mubr.msk.f32.gmra.mrb[16].mxu0 %vm495_vm0, %v429_v23  ;;  %v5894_v23 = vld [vmem:[%s12910_s3 + $0xa0] sm:$0xff]  ;;  %8808 = vmatpush3.bf16.msra.mxu1 %v8805_v22 }
  0x34   : > { %7326 = vmatprep.mubr.msk.f32.mxu0 %vm495_vm0, %v430_v24  ;;  %v5895_v24 = vld [vmem:[%s12910_s3 + $0xa8] sm:$0xff] }
  0x37   : > { %7327 = vmatmul.mubr.msk.f32.gmra.mrb[18].mxu0 %vm495_vm0, %v431_v25  ;;  %v5972_v25 = vld [vmem:[%s12910_s3 + $0x310] sm:$0xff] }
  0x38   : > { %7329 = vmatprep.mubr.msk.f32.mxu0 %vm495_vm0, %v432_v26  ;;  %v8621_v26 = vpack.c.bf16 %v5895_v24, %v5894_v23 }
  0x3a   : > { %8622 = vmatprep.subr.bf16.mxu0 %v8621_v26 }
  0x3b   : > { %7330 = vmatmul.mubr.msk.f32.gmra.mrb[20].mxu0 %vm495_vm0, %v433_v27  ;;  %v5973_v27 = vld [vmem:[%s12910_s3 + $0x318] sm:$0xff] }
  0x3c   : > { %7332 = vmatprep.mubr.msk.f32.mxu0 %vm495_vm0, %v434_v28  ;;  %v8809_v28 = vpack.c.bf16 %v5973_v27, %v5972_v25  ;;  %8624 = vmatpush3.bf16.msra.mxu0 %v8621_v26 }
  0x3e   : > { %8810 = vmatprep.subr.bf16.mxu1 %v8809_v28 }
  0x3f   : > { %7333 = vmatmul.mubr.msk.f32.gmra.mrb[22].mxu0 %vm495_vm0, %v435_v29  ;;  %v5896_v29 = vld [vmem:[%s12910_s3 + $0xb0] sm:$0xff]  ;;  %8812 = vmatpush3.bf16.msra.mxu1 %v8809_v28 }
  0x40   : > { %7335 = vmatprep.mubr.msk.f32.mxu0 %vm495_vm0, %v436_v30  ;;  %v5897_v30 = vld [vmem:[%s12910_s3 + $0xb8] sm:$0xff] }
  0x43   : > { %7336 = vmatmul.mubr.msk.f32.gmra.mrb[24].mxu0 %vm495_vm0, %v437_v31  ;;  %v5974_v31 = vld [vmem:[%s12910_s3 + $0x320] sm:$0xff] }
  0x44   : > { %7338 = vmatprep.mubr.msk.f32.mxu0 %vm495_vm0, %v438_v32  ;;  %v8625_v32 = vpack.c.bf16 %v5897_v30, %v5896_v29 }
  0x46   : > { %8626 = vmatprep.subr.bf16.mxu0 %v8625_v32 }
  0x47   : > { %7339 = vmatmul.mubr.msk.f32.gmra.mrb[26].mxu0 %vm495_vm0, %v439_v33  ;;  %v5975_v33 = vld [vmem:[%s12910_s3 + $0x328] sm:$0xff] }
  0x48   : > { %7341 = vmatprep.mubr.msk.f32.mxu0 %vm495_vm0, %v440_v34  ;;  %v8813_v34 = vpack.c.bf16 %v5975_v33, %v5974_v31  ;;  %8628 = vmatpush3.bf16.msra.mxu0 %v8625_v32 }
  0x4a   : > { %8814 = vmatprep.subr.bf16.mxu1 %v8813_v34 }
  0x4b   : > { %7342 = vmatmul.mubr.msk.f32.gmra.mrb[28].mxu0 %vm495_vm0, %v441_v35  ;;  %v5898_v35 = vld [vmem:[%s12910_s3 + $0xc0] sm:$0xff]  ;;  %8816 = vmatpush3.bf16.msra.mxu1 %v8813_v34 }
  0x4c   : > { %7344 = vmatprep.mubr.msk.f32.mxu0 %vm495_vm0, %v442_v36  ;;  %v5899_v36 = vld [vmem:[%s12910_s3 + $0xc8] sm:$0xff] }
  0x4f   : > { %7345 = vmatmul.mubr.msk.f32.gmra.mrb[30].mxu0 %vm495_vm0, %v443_v37  ;;  %v5976_v37 = vld [vmem:[%s12910_s3 + $0x330] sm:$0xff] }
  0x50   : > { %7347 = vmatprep.mubr.msk.f32.mxu0 %vm495_vm0, %v444_v38  ;;  %v8629_v38 = vpack.c.bf16 %v5899_v36, %v5898_v35 }
  0x52   : > { %8630 = vmatprep.subr.bf16.mxu0 %v8629_v38 }
  0x53   : > { %7348 = vmatmul.mubr.msk.f32.gmra.mrb[32].mxu0 %vm495_vm0, %v445_v39  ;;  %v5977_v39 = vld [vmem:[%s12910_s3 + $0x338] sm:$0xff] }
  0x54   : > { %7350 = vmatprep.mubr.msk.f32.mxu0 %vm495_vm0, %v446_v40  ;;  %v8817_v40 = vpack.c.bf16 %v5977_v39, %v5976_v37  ;;  %8632 = vmatpush3.bf16.msra.mxu0 %v8629_v38 }
  0x56   : > { %8818 = vmatprep.subr.bf16.mxu1 %v8817_v40 }
  0x57   : > { %7351 = vmatmul.mubr.msk.f32.gmra.mrb[34].mxu0 %vm495_vm0, %v447_v41  ;;  %v5900_v41 = vld [vmem:[%s12910_s3 + $0xd0] sm:$0xff]  ;;  %8820 = vmatpush3.bf16.msra.mxu1 %v8817_v40 }
  0x58   : > { %7353 = vmatprep.mubr.msk.f32.mxu0 %vm495_vm0, %v448_v42  ;;  %v5901_v42 = vld [vmem:[%s12910_s3 + $0xd8] sm:$0xff] }
  0x5b   : > { %7354 = vmatmul.mubr.msk.f32.gmra.mrb[36].mxu0 %vm495_vm0, %v449_v43  ;;  %v5978_v43 = vld [vmem:[%s12910_s3 + $0x340] sm:$0xff] }
  0x5c   : > { %7356 = vmatprep.mubr.msk.f32.mxu0 %vm495_vm0, %v450_v44  ;;  %v8633_v44 = vpack.c.bf16 %v5901_v42, %v5900_v41 }
  0x5e   : > { %8634 = vmatprep.subr.bf16.mxu0 %v8633_v44 }
  0x5f   : > { %7357 = vmatmul.mubr.msk.f32.gmra.mrb[38].mxu0 %vm495_vm0, %v451_v45  ;;  %v5979_v45 = vld [vmem:[%s12910_s3 + $0x348] sm:$0xff] }
  0x60   : > { %7359 = vmatprep.mubr.msk.f32.mxu0 %vm495_vm0, %v452_v46  ;;  %v8821_v46 = vpack.c.bf16 %v5979_v45, %v5978_v43  ;;  %8636 = vmatpush3.bf16.msra.mxu0 %v8633_v44 }
  0x62   : > { %8822 = vmatprep.subr.bf16.mxu1 %v8821_v46 }
  0x63   : > { %7360 = vmatmul.mubr.msk.f32.gmra.mrb[40].mxu0 %vm495_vm0, %v453_v47  ;;  %v5902_v47 = vld [vmem:[%s12910_s3 + $0xe0] sm:$0xff]  ;;  %8824 = vmatpush3.bf16.msra.mxu1 %v8821_v46 }
  0x64   : > { %7362 = vmatprep.mubr.msk.f32.mxu0 %vm495_vm0, %v454_v48  ;;  %v5903_v48 = vld [vmem:[%s12910_s3 + $0xe8] sm:$0xff] }
  0x67   : > { %7363 = vmatmul.mubr.msk.f32.gmra.mrb[42].mxu0 %vm495_vm0, %v455_v49  ;;  %v5980_v49 = vld [vmem:[%s12910_s3 + $0x350] sm:$0xff] }
  0x68   : > { %7365 = vmatprep.mubr.msk.f32.mxu0 %vm495_vm0, %v456_v50  ;;  %v8637_v50 = vpack.c.bf16 %v5903_v48, %v5902_v47 }
  0x6a   : > { %8638 = vmatprep.subr.bf16.mxu0 %v8637_v50 }
  0x6b   : > { %7366 = vmatmul.mubr.msk.f32.gmra.mrb[44].mxu0 %vm495_vm0, %v457_v51  ;;  %v5981_v51 = vld [vmem:[%s12910_s3 + $0x358] sm:$0xff] }
  0x6c   : > { %7368 = vmatprep.mubr.msk.f32.mxu0 %vm495_vm0, %v458_v52  ;;  %v8825_v52 = vpack.c.bf16 %v5981_v51, %v5980_v49  ;;  %8640 = vmatpush3.bf16.msra.mxu0 %v8637_v50 }
  0x6e   : > { %8826 = vmatprep.subr.bf16.mxu1 %v8825_v52 }
  0x6f   : > { %7369 = vmatmul.mubr.msk.f32.gmra.mrb[46].mxu0 %vm495_vm0, %v459_v53  ;;  %v5904_v53 = vld [vmem:[%s12910_s3 + $0xf0] sm:$0xff]  ;;  %8828 = vmatpush3.bf16.msra.mxu1 %v8825_v52 }
  0x70   : > { %7371 = vmatprep.mubr.msk.f32.mxu0 %vm495_vm0, %v460_v54  ;;  %v5905_v54 = vld [vmem:[%s12910_s3 + $0xf8] sm:$0xff] }
  0x73   : > { %7372 = vmatmul.mubr.msk.f32.gmra.mrb[48].mxu0 %vm495_vm0, %v461_v55  ;;  %v5982_v55 = vld [vmem:[%s12910_s3 + $0x360] sm:$0xff] }
  0x74   : > { %7374 = vmatprep.mubr.msk.f32.mxu0 %vm495_vm0, %v462_v56  ;;  %v8641_v56 = vpack.c.bf16 %v5905_v54, %v5904_v53 }
  0x76   : > { %8642 = vmatprep.subr.bf16.mxu0 %v8641_v56 }
  0x77   : > { %7375 = vmatmul.mubr.msk.f32.gmra.mrb[50].mxu0 %vm495_vm0, %v463_v57  ;;  %v5983_v57 = vld [vmem:[%s12910_s3 + $0x368] sm:$0xff] }
  0x78   : > { %7377 = vmatprep.mubr.msk.f32.mxu0 %vm495_vm0, %v464_v58  ;;  %v8829_v58 = vpack.c.bf16 %v5983_v57, %v5982_v55  ;;  %8644 = vmatpush3.bf16.msra.mxu0 %v8641_v56 }
  0x7a   : > { %8830 = vmatprep.subr.bf16.mxu1 %v8829_v58 }
  0x7b   : > { %7378 = vmatmul.mubr.msk.f32.gmra.mrb[52].mxu0 %vm495_vm0, %v465_v59  ;;  %v1289_v59 = vld [vmem:[%s12910_s3] sm:$0xff]  ;;  %8832 = vmatpush3.bf16.msra.mxu1 %v8829_v58 }
  0x7c   : > { %7380 = vmatprep.mubr.msk.f32.mxu0 %vm495_vm0, %v466_v60  ;;  %v1290_v60 = vld [vmem:[%s12910_s3 + $0x8] sm:$0xff] }
  0x7f   : > { %7381 = vmatmul.mubr.msk.f32.gmra.mrb[54].mxu0 %vm495_vm0, %v467_v61  ;;  %v5984_v61 = vld [vmem:[%s12910_s3 + $0x370] sm:$0xff] }
  0x80   : > { %7383 = vmatprep.mubr.msk.f32.mxu0 %vm495_vm0, %v468_v62  ;;  %v10318_v62 = vpack.c.bf16 %v1290_v60, %v1289_v59 }
  0x82   : > { %8646 = vmatprep.subr.bf16.mxu0 %v10318_v62 }
  0x83   : > { %7384 = vmatmul.mubr.msk.f32.gmra.mrb[56].mxu0 %vm495_vm0, %v469_v63  ;;  %v5985_v63 = vld [vmem:[%s12910_s3 + $0x378] sm:$0xff] }
  0x84   : > { %7386 = vmatprep.mubr.msk.f32.mxu0 %vm495_vm0, %v470_v0 }
  0x87   : > { %7387 = vmatmul.mubr.msk.f32.gmra.mrb[58].mxu0 %vm495_vm0, %v471_v1  ;;  %v8833_v1 = vpack.c.bf16 %v5985_v63, %v5984_v61 }
  0x88   : > { %7389 = vmatprep.mubr.msk.f32.mxu0 %vm495_vm0, %v472_v2 }
  0x89   : > { %8834 = vmatprep.subr.bf16.mxu1 %v8833_v1 }
  0x8a   : > { %8836 = vmatpush3.bf16.msra.mxu1 %v8833_v1 }
  0x8b   : > { %7390 = vmatmul.mubr.msk.f32.gmra.mrb[60].mxu0 %vm495_vm0, %v473_v3  ;;  %v5986_v3 = vld [vmem:[%s12910_s3 + $0x380] sm:$0xff] }
  0x8c   : > { %7392 = vmatprep.mubr.msk.f32.mxu0 %vm495_vm0, %v474_v4 }
  0x8f   : > { %7393 = vmatmul.mubr.msk.f32.gmra.mrb[62].mxu0 %vm495_vm0, %v475_v5  ;;  %v5987_v5 = vld [vmem:[%s12910_s3 + $0x388] sm:$0xff] }
  0x90   : > { %7395 = vmatprep.mubr.msk.f32.mxu0 %vm495_vm0, %v476_v6 }
  0x93   : > { %7396 = vmatmul.mubr.msk.f32.gmra.mrb[64].mxu0 %vm495_vm0, %v477_v7  ;;  %v10330_v7 = vpack.c.bf16 %v5987_v5, %v5986_v3 }
  0x94   : > { %7398 = vmatprep.mubr.msk.f32.mxu0 %vm495_vm0, %v478_v8 }
  0x95   : > { %8838 = vmatprep.subr.bf16.mxu1 %v10330_v7 }
  0x97   : > { %7399 = vmatmul.mubr.msk.f32.gmra.mrb[66].mxu0 %vm495_vm0, %v479_v9 }
  0x98   : > { %7401 = vmatprep.mubr.msk.f32.mxu0 %vm495_vm0, %v480_v10 }
  0x9b   : > { %7402 = vmatmul.mubr.msk.f32.gmra.mrb[68].mxu0 %vm495_vm0, %v481_v11 }
  0x9c   : > { %7404 = vmatprep.mubr.msk.f32.mxu0 %vm495_vm0, %v482_v12 }
  0x9f   : > { %7405 = vmatmul.mubr.msk.f32.gmra.mrb[70].mxu0 %vm495_vm0, %v483_v13 }
  0xe6   : > { %v7301_v0 = vpop.f32.mrb[0].mxu0 }
  0xe7   : > { %v778_v2 = vpop.f32.mrb[1].mxu0  ;;  %v784_v23 = vadd.f32 %v7301_v0, %v10348_v20 }
  0xe8   : > { %v779_v24 = vadd.f32 %v10348_v20, %v778_v2 }
  0xe9   : > { %v1138_v29 = vmax.f32 %v784_v23, 0.0 }
  0xea   : > { %v7304_v4 = vpop.f32.mrb[2].mxu0  ;;  %v1137_v32 = vmax.f32 %v779_v24, 0.0 }
  0xeb   : > { %v788_v6 = vpop.f32.mrb[3].mxu0  ;;  %v794_v30 = vadd.f32 %v7304_v4, %v10348_v20 }
  0xec   : > { %v789_v33 = vadd.f32 %v10348_v20, %v788_v6 }
  0xed   : > { %v1140_v41 = vmax.f32 %v794_v30, 0.0 }
  0xee   : > { %v7307_v8 = vpop.f32.mrb[4].mxu0  ;;  %v1139_v44 = vmax.f32 %v789_v33, 0.0 }
  0xef   : > { %v798_v9 = vpop.f32.mrb[5].mxu0  ;;  %v804_v42 = vadd.f32 %v7307_v8, %v10348_v20 }
  0xf0   : > { %v799_v45 = vadd.f32 %v10348_v20, %v798_v9 }
  0xf1   : > { %v1142_v53 = vmax.f32 %v804_v42, 0.0 }
  0xf2   : > { %v7310_v10 = vpop.f32.mrb[6].mxu0  ;;  %v1141_v56 = vmax.f32 %v799_v45, 0.0 }
  0xf3   : > { %v808_v11 = vpop.f32.mrb[7].mxu0  ;;  %v814_v54 = vadd.f32 %v7310_v10, %v10348_v20 }
  0xf4   : > { %v809_v57 = vadd.f32 %v10348_v20, %v808_v11 }
  0xf5   : > { %v1144_v2 = vmax.f32 %v814_v54, 0.0 }
  0xf6   : > { %v7313_v12 = vpop.f32.mrb[8].mxu0  ;;  %v1143_v5 = vmax.f32 %v809_v57, 0.0 }
  0xf7   : > { %v818_v13 = vpop.f32.mrb[9].mxu0  ;;  %v824_v3 = vadd.f32 %v7313_v12, %v10348_v20 }
  0xf8   : > { %v819_v6 = vadd.f32 %v10348_v20, %v818_v13 }
  0xfa   : > { %v10333_v14 = vpop.f32.mrb[10].mxu0 }
  0xfb   : > { %v10335_v15 = vpop.f32.mrb[11].mxu0 }
  0xfc   : > { %v829_v13 = vadd.f32 %v10348_v20, %v10335_v15 }
  0xfe   : > { %v10337_v16 = vpop.f32.mrb[12].mxu0 }
  0xff   : > { %v10339_v17 = vpop.f32.mrb[13].mxu0 }
 0x100   : > { %v839_v15 = vadd.f32 %v10348_v20, %v10339_v17 }
 0x102   : > { %v10341_v18 = vpop.f32.mrb[14].mxu0 }
 0x103   : > { %v10343_v19 = vpop.f32.mrb[15].mxu0 }
 0x104   : > { %v849_v17 = vadd.f32 %v10348_v20, %v10343_v19 }
 0x106   : > { %v10350_v21 = vpop.f32.mrb[16].mxu0 }
 0x107   : > { %v10352_v22 = vpop.f32.mrb[17].mxu0 }
 0x108   : > { %v859_v19 = vadd.f32 %v10348_v20, %v10352_v22 }
 0x10a   : > { %v7328_v25 = vpop.f32.mrb[18].mxu0 }
 0x10b   : > { %v874_v26 = vadd.f32 %v7328_v25, %v10348_v20  ;;  %v868_v27 = vpop.f32.mrb[19].mxu0 }
 0x10c   : > { %v869_v28 = vadd.f32 %v10348_v20, %v868_v27  ;;  %v834_v27 = vadd.f32 %v10333_v14, %v10348_v20  ;;  %v844_v14 = vadd.f32 %v10337_v16, %v10348_v20  ;;  %v854_v16 = vadd.f32 %v10341_v18, %v10348_v20 }
 0x10d   : > { %v1156_v31 = vmax.f32 %v874_v26, 0.0  ;;  %v1146_v26 = vmax.f32 %v824_v3, 0.0  ;;  %v864_v18 = vadd.f32 %v10350_v21, %v10348_v20 }
 0x10e   : > { %v1155_v34 = vmax.f32 %v869_v28, 0.0  ;;  %v7331_v35 = vpop.f32.mrb[20].mxu0  ;;  %v1145_v28 = vmax.f32 %v819_v6, 0.0 }
 0x10f   : > { %v10360_v36 = vmax.f32 %v1138_v29, %v1156_v31  ;;  %v884_v37 = vadd.f32 %v7331_v35, %v10348_v20  ;;  %v878_v38 = vpop.f32.mrb[21].mxu0 }
 0x110   : > { %v10363_v39 = vmax.f32 %v1137_v32, %v1155_v34  ;;  %v879_v40 = vadd.f32 %v10348_v20, %v878_v38 }
 0x111   : > { %v1158_v43 = vmax.f32 %v884_v37, 0.0  ;;  %v1148_v37 = vmax.f32 %v834_v27, 0.0 }
 0x112   : > { %v1157_v46 = vmax.f32 %v879_v40, 0.0  ;;  %v7334_v47 = vpop.f32.mrb[22].mxu0  ;;  %v1147_v40 = vmax.f32 %v829_v13, 0.0 }
 0x113   : > { %v10368_v48 = vmax.f32 %v1140_v41, %v1158_v43  ;;  %v894_v49 = vadd.f32 %v7334_v47, %v10348_v20  ;;  %v888_v50 = vpop.f32.mrb[23].mxu0 }
 0x114   : > { %v10371_v51 = vmax.f32 %v1139_v44, %v1157_v46  ;;  %v889_v52 = vadd.f32 %v10348_v20, %v888_v50 }
 0x115   : > { %v1160_v55 = vmax.f32 %v894_v49, 0.0  ;;  %v1150_v49 = vmax.f32 %v844_v14, 0.0 }
 0x116   : > { %v1159_v58 = vmax.f32 %v889_v52, 0.0  ;;  %v7337_v59 = vpop.f32.mrb[24].mxu0  ;;  %v1149_v52 = vmax.f32 %v839_v15, 0.0 }
 0x117   : > { %v10376_v60 = vmax.f32 %v1142_v53, %v1160_v55  ;;  %v904_v61 = vadd.f32 %v7337_v59, %v10348_v20  ;;  %v898_v63 = vpop.f32.mrb[25].mxu0 }
 0x118   : > { %v10379_v0 = vmax.f32 %v1141_v56, %v1159_v58  ;;  %v899_v1 = vadd.f32 %v10348_v20, %v898_v63 }
 0x119   : > { %v1162_v4 = vmax.f32 %v904_v61, 0.0  ;;  %v1152_v61 = vmax.f32 %v854_v16, 0.0 }
 0x11a   : > { %v1161_v8 = vmax.f32 %v899_v1, 0.0  ;;  %v7340_v9 = vpop.f32.mrb[26].mxu0  ;;  %v1151_v1 = vmax.f32 %v849_v17, 0.0 }
 0x11b   : > { %v10384_v10 = vmax.f32 %v1144_v2, %v1162_v4  ;;  %v914_v11 = vadd.f32 %v7340_v9, %v10348_v20  ;;  %v908_v23 = vpop.f32.mrb[27].mxu0 }
 0x11c   : > { %v10387_v24 = vmax.f32 %v1143_v5, %v1161_v8  ;;  %v909_v25 = vadd.f32 %v10348_v20, %v908_v23 }
 0x11d   : > { %v1164_v12 = vmax.f32 %v914_v11, 0.0  ;;  %v1154_v11 = vmax.f32 %v864_v18, 0.0 }
 0x11e   : > { %v1163_v29 = vmax.f32 %v909_v25, 0.0  ;;  %v7343_v30 = vpop.f32.mrb[28].mxu0  ;;  %v1153_v25 = vmax.f32 %v859_v19, 0.0 }
 0x11f   : > { %v10394_v31 = vmax.f32 %v1146_v26, %v1164_v12  ;;  %v924_v32 = vadd.f32 %v7343_v30, %v10348_v20  ;;  %v918_v33 = vpop.f32.mrb[29].mxu0 }
 0x120   : > { %v10397_v34 = vmax.f32 %v1145_v28, %v1163_v29  ;;  %v919_v35 = vadd.f32 %v10348_v20, %v918_v33 }
 0x121   : > { %v1166_v38 = vmax.f32 %v924_v32, 0.0 }
 0x122   : > { %v1165_v41 = vmax.f32 %v919_v35, 0.0  ;;  %v7346_v42 = vpop.f32.mrb[30].mxu0 }
 0x123   : > { %v10404_v43 = vmax.f32 %v1148_v37, %v1166_v38  ;;  %v934_v44 = vadd.f32 %v7346_v42, %v10348_v20  ;;  %v928_v45 = vpop.f32.mrb[31].mxu0 }
 0x124   : > { %v10407_v46 = vmax.f32 %v1147_v40, %v1165_v41  ;;  %v929_v47 = vadd.f32 %v10348_v20, %v928_v45 }
 0x125   : > { %v1168_v50 = vmax.f32 %v934_v44, 0.0 }
 0x126   : > { %v1167_v53 = vmax.f32 %v929_v47, 0.0  ;;  %v7349_v54 = vpop.f32.mrb[32].mxu0 }
 0x127   : > { %v10414_v55 = vmax.f32 %v1150_v49, %v1168_v50  ;;  %v944_v56 = vadd.f32 %v7349_v54, %v10348_v20  ;;  %v938_v57 = vpop.f32.mrb[33].mxu0 }
 0x128   : > { %v10417_v58 = vmax.f32 %v1149_v52, %v1167_v53  ;;  %v939_v59 = vadd.f32 %v10348_v20, %v938_v57 }
 0x129   : > { %v1170_v63 = vmax.f32 %v944_v56, 0.0 }
 0x12a   : > { %v1169_v2 = vmax.f32 %v939_v59, 0.0  ;;  %v7352_v3 = vpop.f32.mrb[34].mxu0 }
 0x12b   : > { %v10424_v4 = vmax.f32 %v1152_v61, %v1170_v63  ;;  %v954_v5 = vadd.f32 %v7352_v3, %v10348_v20  ;;  %v948_v6 = vpop.f32.mrb[35].mxu0 }
 0x12c   : > { %v10427_v8 = vmax.f32 %v1151_v1, %v1169_v2  ;;  %v949_v9 = vadd.f32 %v10348_v20, %v948_v6 }
 0x12d   : > { %v1172_v23 = vmax.f32 %v954_v5, 0.0 }
 0x12e   : > { %v1171_v21 = vmax.f32 %v949_v9, 0.0  ;;  %v7355_v26 = vpop.f32.mrb[36].mxu0 }
 0x12f   : > { %v10430_v27 = vmax.f32 %v1154_v11, %v1172_v23  ;;  %v958_v12 = vpop.f32.mrb[37].mxu0  ;;  %v964_v47 = vadd.f32 %v7355_v26, %v10348_v20 }
 0x130   : > { %v10432_v22 = vmax.f32 %v1153_v25, %v1171_v21  ;;  %v959_v49 = vadd.f32 %v10348_v20, %v958_v12 }
 0x131   : > { %v1174_v53 = vmax.f32 %v964_v47, 0.0 }
 0x132   : > { %v7358_v28 = vpop.f32.mrb[38].mxu0  ;;  %v1173_v57 = vmax.f32 %v959_v49, 0.0 }
 0x133   : > { %v968_v13 = vpop.f32.mrb[39].mxu0  ;;  %v974_v54 = vadd.f32 %v7358_v28, %v10348_v20 }
 0x134   : > { %v969_v59 = vadd.f32 %v10348_v20, %v968_v13 }
 0x135   : > { %v1176_v5 = vmax.f32 %v974_v54, 0.0 }
 0x136   : > { %v7361_v29 = vpop.f32.mrb[40].mxu0  ;;  %v1175_v23 = vmax.f32 %v969_v59, 0.0 }
 0x137   : > { %v978_v30 = vpop.f32.mrb[41].mxu0  ;;  %v984_v6 = vadd.f32 %v7361_v29, %v10348_v20 }
 0x138   : > { %v979_v25 = vadd.f32 %v10348_v20, %v978_v30 }
 0x13a   : > { %v7364_v32 = vpop.f32.mrb[42].mxu0 }
 0x13b   : > { %v988_v33 = vpop.f32.mrb[43].mxu0 }
 0x13e   : > { %v7367_v35 = vpop.f32.mrb[44].mxu0 }
 0x13f   : > { %v10434_v37 = vpop.f32.mrb[45].mxu0 }
 0x142   : > { %v10436_v14 = vpop.f32.mrb[46].mxu0 }
 0x143   : > { %v10438_v38 = vpop.f32.mrb[47].mxu0 }
 0x146   : > { %v10440_v40 = vpop.f32.mrb[48].mxu0 }
 0x147   : > { %v10442_v15 = vpop.f32.mrb[49].mxu0 }
 0x14a   : > { %v10444_v41 = vpop.f32.mrb[50].mxu0 }
 0x14b   : > { %v10446_v42 = vpop.f32.mrb[51].mxu0 }
 0x14e   : > { %v10448_v44 = vpop.f32.mrb[52].mxu0 }
 0x14f   : > { %v10450_v45 = vpop.f32.mrb[53].mxu0 }
 0x152   : > { %v7382_v16 = vpop.f32.mrb[54].mxu0 }
 0x153   : > { %v1054_v50 = vadd.f32 %v7382_v16, %v10348_v20  ;;  %v1048_v52 = vpop.f32.mrb[55].mxu0  ;;  %v994_v16 = vadd.f32 %v7364_v32, %v10348_v20 }
 0x154   : > { %v1049_v17 = vadd.f32 %v10348_v20, %v1048_v52  ;;  %v989_v52 = vadd.f32 %v10348_v20, %v988_v33 }
 0x155   : > { %v1192_v56 = vmax.f32 %v1054_v50, 0.0  ;;  %v1177_v50 = vmax.f32 %v979_v25, 0.0 }
 0x156   : > { %v1191_v61 = vmax.f32 %v1049_v17, 0.0  ;;  %v7385_v18 = vpop.f32.mrb[56].mxu0 }
 0x157   : > { %v1228_v63 = vmax.f32 %v1174_v53, %v1192_v56  ;;  %v1064_v1 = vadd.f32 %v7385_v18, %v10348_v20  ;;  %v1058_v19 = vpop.f32.mrb[57].mxu0  ;;  %v1004_v18 = vadd.f32 %v7367_v35, %v10348_v20 }
 0x158   : > { %v1227_v2 = vmax.f32 %v1173_v57, %v1191_v61  ;;  %v1059_v3 = vadd.f32 %v10348_v20, %v1058_v19  ;;  %v1180_v61 = vmax.f32 %v994_v16, 0.0  ;;  %v1179_v19 = vmax.f32 %v989_v52, 0.0 }
 0x159   : > { %v1246_v9 = vmax.f32 %v10360_v36, %v1228_v63  ;;  %v1194_v11 = vmax.f32 %v1064_v1, 0.0  ;;  %v1178_v36 = vmax.f32 %v984_v6, 0.0  ;;  %v1291_v63 = vld [vmem:[%s12910_s3 + $0x10] sm:$0xff]  ;;  %v1292_v1 = vld [vmem:[%s12910_s3 + $0x18] sm:$0xff] }
 0x15a   : > { %v10464_v21 = vmax.f32 %v10363_v39, %v1227_v2  ;;  %v1193_v26 = vmax.f32 %v1059_v3, 0.0  ;;  %v7388_v12 = vpop.f32.mrb[58].mxu0  ;;  %v999_v2 = vadd.f32 %v10348_v20, %v10434_v37  ;;  %v1014_v37 = vadd.f32 %v10436_v14, %v10348_v20 }
 0x15b   : > { %1264 = vst [vmem:[#allocation2 + $0x8] sm:$0xff] %v1246_v9  ;;  %v1230_v28 = vmax.f32 %v1176_v5, %v1194_v11  ;;  %v1074_v13 = vadd.f32 %v7388_v12, %v10348_v20  ;;  %v1068_v47 = vpop.f32.mrb[59].mxu0  ;;  %v1182_v12 = vmax.f32 %v1004_v18, 0.0 }
 0x15c   : > { %1263 = vst [vmem:[#allocation2] sm:$0xff] %v10464_v21  ;;  %v1229_v49 = vmax.f32 %v1175_v23, %v1193_v26  ;;  %v1069_v29 = vadd.f32 %v10348_v20, %v1068_v47  ;;  %v8649_v26 = vpack.c.bf16 %v1292_v1, %v1291_v63  ;;  %v1294_v47 = vld [vmem:[%s12910_s3 + $0x28] sm:$0xff] }
 0x15d   : > { %v10471_v30 = vmax.f32 %v10368_v48, %v1230_v28  ;;  %v1196_v39 = vmax.f32 %v1074_v13, 0.0  ;;  %v1293_v13 = vld [vmem:[%s12910_s3 + $0x20] sm:$0xff]  ;;  %v5991_v63 = vld [vmem:[%s12910_s3 + $0x3a8] sm:$0xff] }
 0x15e   : > { %v10475_v17 = vmax.f32 %v10371_v51, %v1229_v49  ;;  %v1195_v53 = vmax.f32 %v1069_v29, 0.0  ;;  %v7391_v54 = vpop.f32.mrb[60].mxu0  ;;  %v1181_v49 = vmax.f32 %v999_v2, 0.0  ;;  %v1009_v29 = vadd.f32 %v10348_v20, %v10438_v38 }
 0x15f   : > { %1266 = vst [vmem:[#allocation2 + $0x18] sm:$0xff] %v10471_v30  ;;  %v1232_v56 = vmax.f32 %v1178_v36, %v1196_v39  ;;  %v1084_v57 = vadd.f32 %v7391_v54, %v10348_v20  ;;  %v1078_v59 = vpop.f32.mrb[61].mxu0 }
 0x160   : > { %1265 = vst [vmem:[#allocation2 + $0x10] sm:$0xff] %v10475_v17  ;;  %v1231_v32 = vmax.f32 %v1177_v50, %v1195_v53  ;;  %v1079_v48 = vadd.f32 %v10348_v20, %v1078_v59  ;;  %v5988_v53 = vld [vmem:[%s12910_s3 + $0x390] sm:$0xff]  ;;  %v1296_v59 = vld [vmem:[%s12910_s3 + $0x38] sm:$0xff]  ;;  %v1183_v1 = vmax.f32 %v1009_v29, 0.0  ;;  %v1029_v29 = vadd.f32 %v10348_v20, %v10446_v42 }
 0x161   : > { %v10483_v33 = vmax.f32 %v10376_v60, %v1232_v56  ;;  %v1198_v51 = vmax.f32 %v1084_v57, 0.0  ;;  %v5989_v56 = vld [vmem:[%s12910_s3 + $0x398] sm:$0xff]  ;;  %v1295_v57 = vld [vmem:[%s12910_s3 + $0x30] sm:$0xff] }
 0x162   : > { %v1249_v3 = vmax.f32 %v10379_v0, %v1231_v32  ;;  %v1197_v5 = vmax.f32 %v1079_v48, 0.0  ;;  %v7394_v35 = vpop.f32.mrb[62].mxu0  ;;  %v1184_v32 = vmax.f32 %v1014_v37, 0.0  ;;  %v1024_v48 = vadd.f32 %v10440_v40, %v10348_v20 }
 0x163   : > { %1268 = vst [vmem:[#allocation2 + $0x28] sm:$0xff] %v10483_v33  ;;  %v1234_v60 = vmax.f32 %v1180_v61, %v1198_v51  ;;  %v1094_v6 = vadd.f32 %v7394_v35, %v10348_v20  ;;  %v1088_v9 = vpop.f32.mrb[63].mxu0  ;;  %v1305_v11 = vld [vmem:[#allocation2 + $0x1] sm:$0xff]  ;;  %v1034_v37 = vadd.f32 %v10444_v41, %v10348_v20 }
 0x164   : > { %1267 = vst [vmem:[#allocation2 + $0x20] sm:$0xff] %v1249_v3  ;;  %v1233_v23 = vmax.f32 %v1179_v19, %v1197_v5  ;;  %v1089_v25 = vadd.f32 %v10348_v20, %v1088_v9  ;;  %7439 = vmatprep.mubr.f32.mxu0 %v1305_v11  ;;  %v5990_v51 = vld [vmem:[%s12910_s3 + $0x3a0] sm:$0xff]  ;;  %v1019_v19 = vadd.f32 %v10348_v20, %v10442_v15 }
 0x165   : > { %v1252_v0 = vmax.f32 %v10384_v10, %v1234_v60  ;;  %v1200_v28 = vmax.f32 %v1094_v6, 0.0  ;;  %v8841_v6 = vpack.c.bf16 %v5989_v56, %v5988_v53  ;;  %v10547_v9 = vpack.c.bf16 %v1296_v59, %v1295_v57 }
 0x166   : > { %v10509_v36 = vmax.f32 %v10387_v24, %v1233_v23  ;;  %v1199_v16 = vmax.f32 %v1089_v25, 0.0  ;;  %v7397_v14 = vpop.f32.mrb[64].mxu0  ;;  %v10517_v24 = vpack.c.bf16 %v1294_v47, %v1293_v13  ;;  %v8845_v11 = vpack.c.bf16 %v5991_v63, %v5990_v51  ;;  %v1297_v23 = vld [vmem:[%s12910_s3 + $0x40] sm:$0xff]  ;;  %v1298_v25 = vld [vmem:[%s12910_s3 + $0x48] sm:$0xff]  ;;  %v5992_v13 = vld [vmem:[%s12910_s3 + $0x3b0] sm:$0xff] }
 0x167   : > { %1270 = vst [vmem:[#allocation2 + $0x38] sm:$0xff] %v1252_v0  ;;  %v1236_v10 = vmax.f32 %v1182_v12, %v1200_v28  ;;  %v1104_v39 = vadd.f32 %v7397_v14, %v10348_v20  ;;  %v1098_v50 = vpop.f32.mrb[65].mxu0  ;;  %v1306_v52 = vld [vmem:[#allocation2 + $0xd] sm:$0xff]  ;;  %v1186_v12 = vmax.f32 %v1024_v48, 0.0  ;;  %v5993_v47 = vld [vmem:[%s12910_s3 + $0x3b8] sm:$0xff]  ;;  %v1044_v53 = vadd.f32 %v10448_v44, %v10348_v20 }
 0x168   : > { %1269 = vst [vmem:[#allocation2 + $0x30] sm:$0xff] %v10509_v36  ;;  %v1235_v54 = vmax.f32 %v1181_v49, %v1199_v16  ;;  %v1099_v38 = vadd.f32 %v10348_v20, %v1098_v50  ;;  %7440 = vmatmul.mubr.f32.vlgmr.msra.gmra.mrb[72].mxu0 %v1306_v52  ;;  %7703 = vmatprep.mubr.f32.mxu1 %v1306_v52  ;;  %v1185_v49 = vmax.f32 %v1019_v19, 0.0  ;;  %v1188_v52 = vmax.f32 %v1034_v37, 0.0  ;;  %v1300_v63 = vld [vmem:[%s12910_s3 + $0x58] sm:$0xff] }
 0x169   : > { %v10531_v61 = vmax.f32 %v10394_v31, %v1236_v10  ;;  %v1202_v18 = vmax.f32 %v1104_v39, 0.0  ;;  %8648 = vmatpush3.bf16.msra.mxu0 %v10318_v62  ;;  %v8661_v39 = vpack.c.bf16 %v1298_v25, %v1297_v23  ;;  %v1187_v56 = vmax.f32 %v1029_v29, 0.0  ;;  %v5997_v23 = vld [vmem:[%s12910_s3 + $0x3d8] sm:$0xff]  ;;  %v10646_v29 = vld [vmem:[#allocation2 + $0xe] sm:$0xff] }
 0x16a   : > { %v10543_v40 = vmax.f32 %v10397_v34, %v1235_v54  ;;  %v1201_v31 = vmax.f32 %v1099_v38, 0.0  ;;  %v7400_v2 = vpop.f32.mrb[66].mxu0  ;;  %8650 = vmatprep.subr.bf16.mxu0 %v8649_v26  ;;  %v1039_v57 = vadd.f32 %v10348_v20, %v10450_v45 }
 0x16b   : > { %1272 = vst [vmem:[#allocation2 + $0x48] sm:$0xff] %v10531_v61  ;;  %v1238_v62 = vmax.f32 %v1184_v32, %v1202_v18  ;;  %v1114_v3 = vadd.f32 %v7400_v2, %v10348_v20  ;;  %v1108_v5 = vpop.f32.mrb[67].mxu0  ;;  %v1307_v35 = vld [vmem:[#allocation2 + $0x19] sm:$0xff]  ;;  %v1308_v60 = vld [vmem:[#allocation2 + $0x25] sm:$0xff] }
 0x16c   : > { %1271 = vst [vmem:[#allocation2 + $0x40] sm:$0xff] %v10543_v40  ;;  %v1237_v15 = vmax.f32 %v1183_v1, %v1201_v31  ;;  %v1109_v34 = vadd.f32 %v10348_v20, %v1108_v5  ;;  %7442 = vmatprep.mubr.f32.mxu0 %v1307_v35  ;;  %7704 = vmatmul.mubr.f32.vlgmr.msra.gmra.mrb[0].mxu1 %v1307_v35  ;;  %v1190_v1 = vmax.f32 %v1044_v53, 0.0  ;;  %v5995_v2 = vld [vmem:[%s12910_s3 + $0x3c8] sm:$0xff] }
 0x16d   : > { %v10560_v0 = vmax.f32 %v10404_v43, %v1238_v62  ;;  %v1204_v28 = vmax.f32 %v1114_v3, 0.0  ;;  %8652 = vmatpush3.bf16.msra.mxu0 %v8649_v26  ;;  %8840 = vmatpush3.bf16.msra.mxu1 %v10330_v7  ;;  %v1189_v62 = vmax.f32 %v1039_v57, 0.0  ;;  %v10673_v53 = vld [vmem:[#allocation2 + $0xc] sm:$0xff] }
 0x16e   : > { %v1255_v41 = vmax.f32 %v10407_v46, %v1237_v15  ;;  %v1203_v43 = vmax.f32 %v1109_v34, 0.0  ;;  %7443 = vmatmul.mubr.f32.gmra.mrb[74].mxu0 %v1308_v60  ;;  %7706 = vmatprep.mubr.f32.mxu1 %v1308_v60  ;;  %v7403_v26 = vpop.f32.mrb[68].mxu0  ;;  %v8849_v46 = vpack.c.bf16 %v5993_v47, %v5992_v13  ;;  %v1302_v15 = vld [vmem:[%s12910_s3 + $0x68] sm:$0xff]  ;;  %v1304_v13 = vld [vmem:[%s12910_s3 + $0x78] sm:$0xff]  ;;  %v5998_v47 = vld [vmem:[%s12910_s3 + $0x3e0] sm:$0xff] }
 0x16f   : > { %1274 = vst [vmem:[#allocation2 + $0x58] sm:$0xff] %v10560_v0  ;;  %v1240_v7 = vmax.f32 %v1186_v12, %v1204_v28  ;;  %v1124_v16 = vadd.f32 %v7403_v26, %v10348_v20  ;;  %v1118_v14 = vpop.f32.mrb[69].mxu0  ;;  %8654 = vmatprep.subr.bf16.mxu0 %v10517_v24  ;;  %8842 = vmatprep.subr.bf16.mxu1 %v8841_v6  ;;  %v1309_v10 = vld [vmem:[#allocation2 + $0x31] sm:$0xff]  ;;  %v5907_v26 = vld [vmem:[%s12910_s3 + $0x108] sm:$0xff] }
 0x170   : > { %1273 = vst [vmem:[#allocation2 + $0x50] sm:$0xff] %v1255_v41  ;;  %v1239_v50 = vmax.f32 %v1185_v49, %v1203_v43  ;;  %v1119_v42 = vadd.f32 %v10348_v20, %v1118_v14  ;;  %7445 = vmatprep.mubr.f32.mxu0 %v1309_v10  ;;  %7707 = vmatmul.mubr.f32.gmra.mrb[2].mxu1 %v1309_v10  ;;  %v1303_v28 = vld [vmem:[%s12910_s3 + $0x70] sm:$0xff]  ;;  %v5999_v49 = vld [vmem:[%s12910_s3 + $0x3e8] sm:$0xff]  ;;  %v5906_v43 = vld [vmem:[%s12910_s3 + $0x100] sm:$0xff] }
 0x171   : > { %v1258_v54 = vmax.f32 %v10414_v55, %v1240_v7  ;;  %v1206_v38 = vmax.f32 %v1124_v16, 0.0  ;;  %8656 = vmatpush3.bf16.msra.mxu0 %v10517_v24  ;;  %8844 = vmatpush3.bf16.msra.mxu1 %v8841_v6  ;;  %v8861_v41 = vpack.c.bf16 %v5999_v49, %v5998_v47  ;;  %v6000_v7 = vld [vmem:[%s12910_s3 + $0x3f0] sm:$0xff]  ;;  %v6001_v16 = vld [vmem:[%s12910_s3 + $0x3f8] sm:$0xff]  ;;  %v8677_v14 = vpack.c.bf16 %v5907_v26, %v5906_v43  ;;  %v5918_v49 = vld [vmem:[%s12910_s3 + $0x160] sm:$0xff] }
 0x172   : > { %v10583_v59 = vmax.f32 %v10417_v58, %v1239_v50  ;;  %v1205_v32 = vmax.f32 %v1119_v42, 0.0  ;;  %v7406_v48 = vpop.f32.mrb[70].mxu0  ;;  %8658 = vmatprep.subr.bf16.mxu0 %v10547_v9  ;;  %8846 = vmatprep.subr.bf16.mxu1 %v8845_v11  ;;  %v1299_v58 = vld [vmem:[%s12910_s3 + $0x50] sm:$0xff]  ;;  %v8865_v10 = vpack.c.bf16 %v6001_v16, %v6000_v7  ;;  %v5909_v50 = vld [vmem:[%s12910_s3 + $0x118] sm:$0xff]  ;;  %v6002_v42 = vld [vmem:[%s12910_s3 + $0x400] sm:$0xff] }
 0x173   : > { %1276 = vst [vmem:[#allocation2 + $0x68] sm:$0xff] %v1258_v54  ;;  %v1242_v44 = vmax.f32 %v1188_v52, %v1206_v38  ;;  %v1134_v55 = vadd.f32 %v7406_v48, %v10348_v20  ;;  %v1128_v18 = vpop.f32.mrb[71].mxu0  ;;  %v10587_v51 = vld [vmem:[#allocation2 + $0x3d] sm:$0xff]  ;;  %v6004_v57 = vld [vmem:[%s12910_s3 + $0x410] sm:$0xff] }
 0x174   : > { %1275 = vst [vmem:[#allocation2 + $0x60] sm:$0xff] %v10583_v59  ;;  %v1241_v24 = vmax.f32 %v1187_v56, %v1205_v32  ;;  %v1129_v45 = vadd.f32 %v10348_v20, %v1128_v18  ;;  %7446 = vmatmul.mubr.f32.gmra.mrb[76].mxu0 %v10587_v51  ;;  %7709 = vmatprep.mubr.f32.mxu1 %v10587_v51  ;;  %v5994_v20 = vld [vmem:[%s12910_s3 + $0x3c0] sm:$0xff]  ;;  %v5911_v56 = vld [vmem:[%s12910_s3 + $0x128] sm:$0xff]  ;;  %v6005_v32 = vld [vmem:[%s12910_s3 + $0x418] sm:$0xff] }
 0x175   : > { %v1260_v19 = vmax.f32 %v10424_v4, %v1242_v44  ;;  %v1208_v31 = vmax.f32 %v1134_v55, 0.0  ;;  %8660 = vmatpush3.bf16.msra.mxu0 %v10547_v9  ;;  %8848 = vmatpush3.bf16.msra.mxu1 %v8845_v11  ;;  %v1301_v4 = vld [vmem:[%s12910_s3 + $0x60] sm:$0xff]  ;;  %v8665_v9 = vpack.c.bf16 %v1300_v63, %v1299_v58  ;;  %v8853_v34 = vpack.c.bf16 %v5995_v2, %v5994_v20  ;;  %v5996_v11 = vld [vmem:[%s12910_s3 + $0x3d0] sm:$0xff]  ;;  %v6013_v26 = vld [vmem:[%s12910_s3 + $0x458] sm:$0xff] }
 0x176   : > { %v1259_v3 = vmax.f32 %v10427_v8, %v1241_v24  ;;  %v1207_v5 = vmax.f32 %v1129_v45, 0.0  ;;  %8662 = vmatprep.subr.bf16.mxu0 %v8661_v39  ;;  %8850 = vmatprep.subr.bf16.mxu1 %v8849_v46  ;;  %v8669_v37 = vpack.c.bf16 %v1302_v15, %v1301_v4  ;;  %v5910_v38 = vld [vmem:[%s12910_s3 + $0x120] sm:$0xff]  ;;  %v8873_v18 = vpack.c.bf16 %v6005_v32, %v6004_v57  ;;  %v5912_v24 = vld [vmem:[%s12910_s3 + $0x130] sm:$0xff]  ;;  %v5913_v45 = vld [vmem:[%s12910_s3 + $0x138] sm:$0xff] }
 0x177   : > { %1278 = vst [vmem:[#allocation2 + $0x78] sm:$0xff] %v1260_v19  ;;  %v1244_v35 = vmax.f32 %v1190_v1, %v1208_v31  ;;  %v10611_v60 = vld [vmem:[#allocation2 + $0x49] sm:$0xff]  ;;  %v10613_v6 = vld [vmem:[#allocation2 + $0x55] sm:$0xff]  ;;  %v8685_v44 = vpack.c.bf16 %v5911_v56, %v5910_v38  ;;  %v6006_v63 = vld [vmem:[%s12910_s3 + $0x420] sm:$0xff]  ;;  %v8689_v31 = vpack.c.bf16 %v5913_v45, %v5912_v24 }
 0x178   : > { %1277 = vst [vmem:[#allocation2 + $0x70] sm:$0xff] %v1259_v3  ;;  %v1243_v8 = vmax.f32 %v1189_v62, %v1207_v5  ;;  %7448 = vmatprep.mubr.f32.mxu0 %v10611_v60  ;;  %7710 = vmatmul.mubr.f32.gmra.mrb[4].mxu1 %v10611_v60  ;;  %v10689_v48 = vld [vmem:[#allocation2 + $0x24] sm:$0xff]  ;;  %v10692_v55 = vld [vmem:[#allocation2 + $0x1a] sm:$0xff]  ;;  %v10714_v20 = vld [vmem:[#allocation2 + $0x32] sm:$0xff] }
 0x179   : > { %v1262_v25 = vmax.f32 %v10430_v27, %v1244_v35  ;;  %8664 = vmatpush3.bf16.msra.mxu0 %v8661_v39  ;;  %8852 = vmatpush3.bf16.msra.mxu1 %v8849_v46  ;;  %v5908_v39 = vld [vmem:[%s12910_s3 + $0x110] sm:$0xff]  ;;  %v6003_v46 = vld [vmem:[%s12910_s3 + $0x408] sm:$0xff]  ;;  %v10711_v19 = vld [vmem:[#allocation2 + $0x3c] sm:$0xff] }
 0x17a   : > { %v1261_v12 = vmax.f32 %v10432_v22, %v1243_v8  ;;  %7449 = vmatmul.mubr.f32.gmra.mrb[78].mxu0 %v10613_v6  ;;  %7712 = vmatprep.mubr.f32.mxu1 %v10613_v6  ;;  %v8857_v22 = vpack.c.bf16 %v5997_v23, %v5996_v11  ;;  %v8681_v52 = vpack.c.bf16 %v5909_v50, %v5908_v39  ;;  %v10702_v58 = vld [vmem:[#allocation2 + $0x26] sm:$0xff]  ;;  %v10724_v5 = vld [vmem:[#allocation2 + $0x3e] sm:$0xff]  ;;  %v6008_v4 = vld [vmem:[%s12910_s3 + $0x430] sm:$0xff] }
 0x17b   : > { %1280 = vst [vmem:[#allocation2 + $0x88] sm:$0xff] %v1262_v25  ;;  %7483 = vmatprep.mubr.f32.mxu0 %v10464_v21  ;;  %8666 = vmatprep.subr.bf16.mxu0 %v8665_v9  ;;  %v10637_v27 = vld [vmem:[#allocation2 + $0x61] sm:$0xff]  ;;  %v8673_v21 = vpack.c.bf16 %v1304_v13, %v1303_v28  ;;  %v8869_v54 = vpack.c.bf16 %v6003_v46, %v6002_v42  ;;  %v6009_v35 = vld [vmem:[%s12910_s3 + $0x438] sm:$0xff]  ;;  %v5916_v8 = vld [vmem:[%s12910_s3 + $0x150] sm:$0xff] }
 0x17c   : > { %1279 = vst [vmem:[#allocation2 + $0x80] sm:$0xff] %v1261_v12  ;;  %8854 = vmatprep.subr.bf16.mxu1 %v8853_v34  ;;  %7713 = vmatmul.mubr.f32.gmra.mrb[6].mxu1 %v10637_v27  ;;  %v6007_v1 = vld [vmem:[%s12910_s3 + $0x428] sm:$0xff]  ;;  %v5914_v62 = vld [vmem:[%s12910_s3 + $0x140] sm:$0xff]  ;;  %v8881_v23 = vpack.c.bf16 %v6009_v35, %v6008_v4  ;;  %v5917_v25 = vld [vmem:[%s12910_s3 + $0x158] sm:$0xff] }
 0x17d   : > { %8668 = vmatpush3.bf16.msra.mxu0 %v8665_v9  ;;  %8856 = vmatpush3.bf16.msra.mxu1 %v8853_v34  ;;  %v8877_v2 = vpack.c.bf16 %v6007_v1, %v6006_v63  ;;  %v5915_v3 = vld [vmem:[%s12910_s3 + $0x148] sm:$0xff]  ;;  %v10733_v9 = vld [vmem:[#allocation2 + $0x54] sm:$0xff]  ;;  %v8697_v13 = vpack.c.bf16 %v5917_v25, %v5916_v8  ;;  %v6014_v39 = vld [vmem:[%s12910_s3 + $0x460] sm:$0xff] }
 0x17e   : > { %7747 = vmatprep.mubr.f32.mxu1 %v10646_v29  ;;  %8670 = vmatprep.subr.bf16.mxu0 %v8669_v37  ;;  %v8693_v15 = vpack.c.bf16 %v5915_v3, %v5914_v62  ;;  %v10739_v34 = vld [vmem:[#allocation2 + $0x4a] sm:$0xff]  ;;  %v1540_v11 = vld [vmem:[#allocation2 + $0x2] sm:$0xff]  ;;  %v10745_v12 = vld [vmem:[#allocation2 + $0x56] sm:$0xff] }
 0x17f   : > { %8858 = vmatprep.subr.bf16.mxu1 %v8857_v22  ;;  %v6011_v28 = vld [vmem:[%s12910_s3 + $0x448] sm:$0xff]  ;;  %v6012_v43 = vld [vmem:[%s12910_s3 + $0x450] sm:$0xff]  ;;  %v6017_v56 = vld [vmem:[%s12910_s3 + $0x478] sm:$0xff] }
 0x180   : > { %v8889_v16 = vpack.c.bf16 %v6013_v26, %v6012_v43  ;;  %v6015_v50 = vld [vmem:[%s12910_s3 + $0x468] sm:$0xff]  ;;  %v6016_v38 = vld [vmem:[%s12910_s3 + $0x470] sm:$0xff]  ;;  %v6018_v24 = vld [vmem:[%s12910_s3 + $0x480] sm:$0xff] }
 0x181   : > { %8672 = vmatpush3.bf16.msra.mxu0 %v8669_v37  ;;  %8860 = vmatpush3.bf16.msra.mxu1 %v8857_v22  ;;  %v6010_v37 = vld [vmem:[%s12910_s3 + $0x440] sm:$0xff]  ;;  %v8893_v46 = vpack.c.bf16 %v6015_v50, %v6014_v39  ;;  %v8897_v32 = vpack.c.bf16 %v6017_v56, %v6016_v38  ;;  %v6019_v45 = vld [vmem:[%s12910_s3 + $0x488] sm:$0xff]  ;;  %v6020_v62 = vld [vmem:[%s12910_s3 + $0x490] sm:$0xff] }
 0x182   : > { %8674 = vmatprep.subr.bf16.mxu0 %v8673_v21  ;;  %8862 = vmatprep.subr.bf16.mxu1 %v8861_v41  ;;  %v10754_v22 = vld [vmem:[#allocation2 + $0x62] sm:$0xff]  ;;  %v8885_v47 = vpack.c.bf16 %v6011_v28, %v6010_v37  ;;  %v8901_v1 = vpack.c.bf16 %v6019_v45, %v6018_v24  ;;  %v6021_v3 = vld [vmem:[%s12910_s3 + $0x498] sm:$0xff]  ;;  %v6024_v43 = vld [vmem:[%s12910_s3 + $0x4b0] sm:$0xff] }
 0x183   : > { %v10823_v4 = vld [vmem:[#allocation2 + $0x1b] sm:$0xff]  ;;  %v8905_v35 = vpack.c.bf16 %v6021_v3, %v6020_v62  ;;  %v6023_v25 = vld [vmem:[%s12910_s3 + $0x4a8] sm:$0xff]  ;;  %v10843_v28 = vld [vmem:[#allocation2 + $0x33] sm:$0xff] }
 0x184   : > { %v5929_v8 = vld [vmem:[%s12910_s3 + $0x1b8] sm:$0xff]  ;;  %v10881_v38 = vld [vmem:[#allocation2 + $0x63] sm:$0xff] }
 0x185   : > { %8676 = vmatpush3.bf16.msra.mxu0 %v8673_v21  ;;  %8864 = vmatpush3.bf16.msra.mxu1 %v8861_v41  ;;  %v5919_v21 = vld [vmem:[%s12910_s3 + $0x168] sm:$0xff]  ;;  %v6025_v26 = vld [vmem:[%s12910_s3 + $0x4b8] sm:$0xff]  ;;  %v5938_v3 = vld [vmem:[%s12910_s3 + $0x200] sm:$0xff] }
 0x186   : > { %8678 = vmatprep.subr.bf16.mxu0 %v8677_v14  ;;  %8866 = vmatprep.subr.bf16.mxu1 %v8865_v10  ;;  %v10763_v41 = vld [vmem:[#allocation2 + $0xf] sm:$0xff]  ;;  %v8701_v7 = vpack.c.bf16 %v5919_v21, %v5918_v49  ;;  %v10853_v21 = vld [vmem:[#allocation2 + $0x3f] sm:$0xff]  ;;  %v8913_v39 = vpack.c.bf16 %v6025_v26, %v6024_v43 }
 0x187   : > { %v5931_v49 = vld [vmem:[%s12910_s3 + $0x1c8] sm:$0xff]  ;;  %v5933_v50 = vld [vmem:[%s12910_s3 + $0x1d8] sm:$0xff]  ;;  %v5942_v26 = vld [vmem:[%s12910_s3 + $0x220] sm:$0xff] }
 0x188   : > { %7484 = vmatmul.mubr.f32.vlgmr.msra.gmra.mrb[72].mxu0 %v10673_v53 }
 0x189   : > { %7486 = vmatprep.mubr.f32.mxu0 %v10471_v30  ;;  %8680 = vmatpush3.bf16.msra.mxu0 %v8677_v14  ;;  %v5920_v14 = vld [vmem:[%s12910_s3 + $0x170] sm:$0xff] }
 0x18a   : > { %8868 = vmatpush3.bf16.msra.mxu1 %v8865_v10  ;;  %8682 = vmatprep.subr.bf16.mxu0 %v8681_v52  ;;  %v5921_v10 = vld [vmem:[%s12910_s3 + $0x178] sm:$0xff] }
 0x18b   : > { %8870 = vmatprep.subr.bf16.mxu1 %v8869_v54  ;;  %v8705_v42 = vpack.c.bf16 %v5921_v10, %v5920_v14  ;;  %v10866_v14 = vld [vmem:[#allocation2 + $0x4b] sm:$0xff]  ;;  %v1678_v10 = vld [vmem:[#allocation2 + $0x3] sm:$0xff] }
 0x18c   : > { %7487 = vmatmul.mubr.f32.gmra.mrb[74].mxu0 %v10689_v48 }
 0x18d   : > { %7748 = vmatmul.mubr.f32.vlgmr.msra.gmra.mrb[0].mxu1 %v10692_v55  ;;  %7489 = vmatprep.mubr.f32.mxu0 %v10509_v36 }
 0x18e   : > { %8684 = vmatpush3.bf16.msra.mxu0 %v8681_v52  ;;  %7750 = vmatprep.mubr.f32.mxu1 %v10702_v58  ;;  %v5922_v52 = vld [vmem:[%s12910_s3 + $0x180] sm:$0xff] }
 0x18f   : > { %8872 = vmatpush3.bf16.msra.mxu1 %v8869_v54  ;;  %8686 = vmatprep.subr.bf16.mxu0 %v8685_v44  ;;  %v5923_v54 = vld [vmem:[%s12910_s3 + $0x188] sm:$0xff] }
 0x190   : > { %7490 = vmatmul.mubr.f32.gmra.mrb[76].mxu0 %v10711_v19  ;;  %8874 = vmatprep.subr.bf16.mxu1 %v8873_v18  ;;  %v8709_v57 = vpack.c.bf16 %v5923_v54, %v5922_v52  ;;  %v6027_v52 = vld [vmem:[%s12910_s3 + $0x4c8] sm:$0xff] }
 0x191   : > { %7751 = vmatmul.mubr.f32.gmra.mrb[2].mxu1 %v10714_v20  ;;  %7492 = vmatprep.mubr.f32.mxu0 %v10531_v61 }
 0x192   : > { %8688 = vmatpush3.bf16.msra.mxu0 %v8685_v44  ;;  %7753 = vmatprep.mubr.f32.mxu1 %v10724_v5  ;;  %v5924_v44 = vld [vmem:[%s12910_s3 + $0x190] sm:$0xff] }
 0x193   : > { %8876 = vmatpush3.bf16.msra.mxu1 %v8873_v18  ;;  %8690 = vmatprep.subr.bf16.mxu0 %v8689_v31  ;;  %v5925_v18 = vld [vmem:[%s12910_s3 + $0x198] sm:$0xff] }
 0x194   : > { %7493 = vmatmul.mubr.f32.gmra.mrb[78].mxu0 %v10733_v9  ;;  %8878 = vmatprep.subr.bf16.mxu1 %v8877_v2  ;;  %v8713_v63 = vpack.c.bf16 %v5925_v18, %v5924_v44  ;;  %v6028_v44 = vld [vmem:[%s12910_s3 + $0x4d0] sm:$0xff]  ;;  %v6029_v18 = vld [vmem:[%s12910_s3 + $0x4d8] sm:$0xff] }
 0x195   : > { %7754 = vmatmul.mubr.f32.gmra.mrb[4].mxu1 %v10739_v34  ;;  %7527 = vmatprep.mubr.f32.mxu0 %v1540_v11  ;;  %v10833_v11 = vld [vmem:[#allocation2 + $0x27] sm:$0xff]  ;;  %v8921_v45 = vpack.c.bf16 %v6029_v18, %v6028_v44 }
 0x196   : > { %8692 = vmatpush3.bf16.msra.mxu0 %v8689_v31  ;;  %7756 = vmatprep.mubr.f32.mxu1 %v10745_v12  ;;  %v5926_v31 = vld [vmem:[%s12910_s3 + $0x1a0] sm:$0xff] }
 0x197   : > { %8880 = vmatpush3.bf16.msra.mxu1 %v8877_v2  ;;  %8694 = vmatprep.subr.bf16.mxu0 %v8693_v15  ;;  %v5927_v2 = vld [vmem:[%s12910_s3 + $0x1a8] sm:$0xff]  ;;  %v5946_v18 = vld [vmem:[%s12910_s3 + $0x240] sm:$0xff] }
 0x198   : > { %8882 = vmatprep.subr.bf16.mxu1 %v8881_v23 }
 0x199   : > { %7757 = vmatmul.mubr.f32.gmra.mrb[6].mxu1 %v10754_v22 }
 0x19a   : > { %8696 = vmatpush3.bf16.msra.mxu0 %v8693_v15  ;;  %7791 = vmatprep.mubr.f32.mxu1 %v10763_v41  ;;  %v5928_v15 = vld [vmem:[%s12910_s3 + $0x1b0] sm:$0xff] }
 0x19b   : > { %8884 = vmatpush3.bf16.msra.mxu1 %v8881_v23  ;;  %8698 = vmatprep.subr.bf16.mxu0 %v8697_v13  ;;  %v6022_v23 = vld [vmem:[%s12910_s3 + $0x4a0] sm:$0xff]  ;;  %v8721_v37 = vpack.c.bf16 %v5929_v8, %v5928_v15  ;;  %v6033_v15 = vld [vmem:[%s12910_s3 + $0x4f8] sm:$0xff] }
 0x19c   : > { %8886 = vmatprep.subr.bf16.mxu1 %v8885_v47 }
 0x19e   : > { %8700 = vmatpush3.bf16.msra.mxu0 %v8697_v13  ;;  %v8909_v13 = vpack.c.bf16 %v6023_v25, %v6022_v23  ;;  %v5940_v25 = vld [vmem:[%s12910_s3 + $0x210] sm:$0xff] }
 0x19f   : > { %8888 = vmatpush3.bf16.msra.mxu1 %v8885_v47  ;;  %8702 = vmatprep.subr.bf16.mxu0 %v8701_v7  ;;  %v5930_v47 = vld [vmem:[%s12910_s3 + $0x1c0] sm:$0xff] }
 0x1a0   : > { %8890 = vmatprep.subr.bf16.mxu1 %v8889_v16 }
 0x1a2   : > { %8704 = vmatpush3.bf16.msra.mxu0 %v8701_v7  ;;  %v8725_v7 = vpack.c.bf16 %v5931_v49, %v5930_v47  ;;  %v6035_v47 = vld [vmem:[%s12910_s3 + $0x508] sm:$0xff] }
 0x1a3   : > { %8892 = vmatpush3.bf16.msra.mxu1 %v8889_v16  ;;  %8706 = vmatprep.subr.bf16.mxu0 %v8705_v42  ;;  %v5932_v16 = vld [vmem:[%s12910_s3 + $0x1d0] sm:$0xff] }
 0x1a4   : > { %8894 = vmatprep.subr.bf16.mxu1 %v8893_v46  ;;  %v8729_v54 = vpack.c.bf16 %v5933_v50, %v5932_v16  ;;  %v6036_v16 = vld [vmem:[%s12910_s3 + $0x510] sm:$0xff] }
 0x1a6   : > { %8708 = vmatpush3.bf16.msra.mxu0 %v8705_v42  ;;  %v10872_v42 = vld [vmem:[#allocation2 + $0x57] sm:$0xff] }
 0x1a7   : > { %8896 = vmatpush3.bf16.msra.mxu1 %v8893_v46  ;;  %8710 = vmatprep.subr.bf16.mxu0 %v8709_v57  ;;  %v6026_v46 = vld [vmem:[%s12910_s3 + $0x4c0] sm:$0xff] }
 0x1a8   : > { %8898 = vmatprep.subr.bf16.mxu1 %v8897_v32  ;;  %v8917_v56 = vpack.c.bf16 %v6027_v52, %v6026_v46  ;;  %v5944_v46 = vld [vmem:[%s12910_s3 + $0x230] sm:$0xff]  ;;  %v5945_v52 = vld [vmem:[%s12910_s3 + $0x238] sm:$0xff] }
 0x1a9   : > { %7528 = vmatmul.mubr.f32.vlgmr.msra.gmra.mrb[72].mxu0 %v10646_v29  ;;  %v8717_v29 = vpack.c.bf16 %v5927_v2, %v5926_v31  ;;  %v6030_v31 = vld [vmem:[%s12910_s3 + $0x4e0] sm:$0xff] }
 0x1aa   : > { %7530 = vmatprep.mubr.f32.mxu0 %v10692_v55  ;;  %8712 = vmatpush3.bf16.msra.mxu0 %v8709_v57  ;;  %v5934_v57 = vld [vmem:[%s12910_s3 + $0x1e0] sm:$0xff] }
 0x1ab   : > { %8900 = vmatpush3.bf16.msra.mxu1 %v8897_v32  ;;  %8714 = vmatprep.subr.bf16.mxu0 %v8713_v63  ;;  %v5935_v32 = vld [vmem:[%s12910_s3 + $0x1e8] sm:$0xff] }
 0x1ac   : > { %8902 = vmatprep.subr.bf16.mxu1 %v8901_v1  ;;  %v8733_v24 = vpack.c.bf16 %v5935_v32, %v5934_v57  ;;  %v8753_v57 = vpack.c.bf16 %v5945_v52, %v5944_v46  ;;  %v10966_v32 = vld [vmem:[#allocation2 + $0x34] sm:$0xff] }
 0x1ad   : > { %7531 = vmatmul.mubr.f32.gmra.mrb[74].mxu0 %v10702_v58  ;;  %v6048_v46 = vld [vmem:[%s12910_s3 + $0x570] sm:$0xff]  ;;  %v6049_v52 = vld [vmem:[%s12910_s3 + $0x578] sm:$0xff] }
 0x1ae   : > { %7792 = vmatmul.mubr.f32.vlgmr.msra.gmra.mrb[0].mxu1 %v10823_v4  ;;  %7533 = vmatprep.mubr.f32.mxu0 %v10714_v20 }
 0x1af   : > { %8716 = vmatpush3.bf16.msra.mxu0 %v8713_v63  ;;  %7794 = vmatprep.mubr.f32.mxu1 %v10833_v11  ;;  %v5936_v63 = vld [vmem:[%s12910_s3 + $0x1f0] sm:$0xff] }
 0x1b0   : > { %8904 = vmatpush3.bf16.msra.mxu1 %v8901_v1  ;;  %8718 = vmatprep.subr.bf16.mxu0 %v8717_v29  ;;  %v5937_v1 = vld [vmem:[%s12910_s3 + $0x1f8] sm:$0xff] }
 0x1b1   : > { %7534 = vmatmul.mubr.f32.gmra.mrb[76].mxu0 %v10724_v5  ;;  %8906 = vmatprep.subr.bf16.mxu1 %v8905_v35  ;;  %v8737_v2 = vpack.c.bf16 %v5937_v1, %v5936_v63  ;;  %v5948_v1 = vld [vmem:[%s12910_s3 + $0x250] sm:$0xff] }
 0x1b2   : > { %7795 = vmatmul.mubr.f32.gmra.mrb[2].mxu1 %v10843_v28  ;;  %7536 = vmatprep.mubr.f32.mxu0 %v10739_v34 }
 0x1b3   : > { %8720 = vmatpush3.bf16.msra.mxu0 %v8717_v29  ;;  %7797 = vmatprep.mubr.f32.mxu1 %v10853_v21  ;;  %v5939_v29 = vld [vmem:[%s12910_s3 + $0x208] sm:$0xff] }
 0x1b4   : > { %8908 = vmatpush3.bf16.msra.mxu1 %v8905_v35  ;;  %8722 = vmatprep.subr.bf16.mxu0 %v8721_v37  ;;  %v6032_v35 = vld [vmem:[%s12910_s3 + $0x4f0] sm:$0xff]  ;;  %v8741_v8 = vpack.c.bf16 %v5939_v29, %v5938_v3  ;;  %v6042_v3 = vld [vmem:[%s12910_s3 + $0x540] sm:$0xff]  ;;  %v6043_v29 = vld [vmem:[%s12910_s3 + $0x548] sm:$0xff] }
 0x1b5   : > { %7537 = vmatmul.mubr.f32.gmra.mrb[78].mxu0 %v10745_v12  ;;  %8910 = vmatprep.subr.bf16.mxu1 %v8909_v13  ;;  %v8929_v23 = vpack.c.bf16 %v6033_v15, %v6032_v35  ;;  %v11000_v15 = vld [vmem:[#allocation2 + $0x64] sm:$0xff] }
 0x1b6   : > { %7798 = vmatmul.mubr.f32.gmra.mrb[4].mxu1 %v10866_v14  ;;  %7571 = vmatprep.mubr.f32.mxu0 %v1678_v10  ;;  %v6037_v10 = vld [vmem:[%s12910_s3 + $0x518] sm:$0xff] }
 0x1b7   : > { %8724 = vmatpush3.bf16.msra.mxu0 %v8721_v37  ;;  %7800 = vmatprep.mubr.f32.mxu1 %v10872_v42  ;;  %v5941_v37 = vld [vmem:[%s12910_s3 + $0x218] sm:$0xff]  ;;  %v8937_v50 = vpack.c.bf16 %v6037_v10, %v6036_v16 }
 0x1b8   : > { %8912 = vmatpush3.bf16.msra.mxu1 %v8909_v13  ;;  %8726 = vmatprep.subr.bf16.mxu0 %v8725_v7  ;;  %v6034_v13 = vld [vmem:[%s12910_s3 + $0x500] sm:$0xff]  ;;  %v8745_v49 = vpack.c.bf16 %v5941_v37, %v5940_v25  ;;  %v5951_v25 = vld [vmem:[%s12910_s3 + $0x268] sm:$0xff]  ;;  %v6044_v37 = vld [vmem:[%s12910_s3 + $0x550] sm:$0xff] }
 0x1b9   : > { %8914 = vmatprep.subr.bf16.mxu1 %v8913_v39  ;;  %v8933_v43 = vpack.c.bf16 %v6035_v47, %v6034_v13  ;;  %v6045_v13 = vld [vmem:[%s12910_s3 + $0x558] sm:$0xff] }
 0x1ba   : > { %7801 = vmatmul.mubr.f32.gmra.mrb[6].mxu1 %v10881_v38 }
 0x1bb   : > { %8728 = vmatpush3.bf16.msra.mxu0 %v8725_v7  ;;  %7835 = vmatprep.mubr.f32.mxu1 %v10475_v17  ;;  %v6031_v17 = vld [vmem:[%s12910_s3 + $0x4e8] sm:$0xff] }
 0x1bc   : > { %8916 = vmatpush3.bf16.msra.mxu1 %v8913_v39  ;;  %8730 = vmatprep.subr.bf16.mxu0 %v8729_v54  ;;  %v8925_v62 = vpack.c.bf16 %v6031_v17, %v6030_v31  ;;  %v5943_v7 = vld [vmem:[%s12910_s3 + $0x228] sm:$0xff]  ;;  %v10948_v39 = vld [vmem:[#allocation2 + $0x1c] sm:$0xff] }
 0x1bd   : > { %8918 = vmatprep.subr.bf16.mxu1 %v8917_v56  ;;  %v10987_v31 = vld [vmem:[#allocation2 + $0x4c] sm:$0xff]  ;;  %v1816_v17 = vld [vmem:[#allocation2 + $0x4] sm:$0xff] }
 0x1bf   : > { %8732 = vmatpush3.bf16.msra.mxu0 %v8729_v54  ;;  %v6038_v54 = vld [vmem:[%s12910_s3 + $0x520] sm:$0xff] }
 0x1c0   : > { %8920 = vmatpush3.bf16.msra.mxu1 %v8917_v56  ;;  %8734 = vmatprep.subr.bf16.mxu0 %v8733_v24  ;;  %v6039_v56 = vld [vmem:[%s12910_s3 + $0x528] sm:$0xff] }
 0x1c1   : > { %8922 = vmatprep.subr.bf16.mxu1 %v8921_v45  ;;  %v8941_v44 = vpack.c.bf16 %v6039_v56, %v6038_v54  ;;  %v8961_v56 = vpack.c.bf16 %v6049_v52, %v6048_v46  ;;  %v5967_v46 = vld [vmem:[%s12910_s3 + $0x2e8] sm:$0xff]  ;;  %v6060_v52 = vld [vmem:[%s12910_s3 + $0x5d0] sm:$0xff] }
 0x1c3   : > { %8736 = vmatpush3.bf16.msra.mxu0 %v8733_v24  ;;  %v5947_v24 = vld [vmem:[%s12910_s3 + $0x248] sm:$0xff] }
 0x1c4   : > { %8924 = vmatpush3.bf16.msra.mxu1 %v8921_v45  ;;  %8738 = vmatprep.subr.bf16.mxu0 %v8737_v2  ;;  %v6041_v45 = vld [vmem:[%s12910_s3 + $0x538] sm:$0xff]  ;;  %v8757_v63 = vpack.c.bf16 %v5947_v24, %v5946_v18  ;;  %v6050_v18 = vld [vmem:[%s12910_s3 + $0x580] sm:$0xff]  ;;  %v6051_v24 = vld [vmem:[%s12910_s3 + $0x588] sm:$0xff] }
 0x1c5   : > { %8926 = vmatprep.subr.bf16.mxu1 %v8925_v62 }
 0x1c7   : > { %8740 = vmatpush3.bf16.msra.mxu0 %v8737_v2 }
 0x1c8   : > { %8928 = vmatpush3.bf16.msra.mxu1 %v8925_v62  ;;  %8742 = vmatprep.subr.bf16.mxu0 %v8741_v8  ;;  %v5949_v62 = vld [vmem:[%s12910_s3 + $0x258] sm:$0xff] }
 0x1c9   : > { %8930 = vmatprep.subr.bf16.mxu1 %v8929_v23  ;;  %v8761_v35 = vpack.c.bf16 %v5949_v62, %v5948_v1  ;;  %v5958_v1 = vld [vmem:[%s12910_s3 + $0x2a0] sm:$0xff]  ;;  %v6053_v62 = vld [vmem:[%s12910_s3 + $0x598] sm:$0xff] }
 0x1ca   : > { %7572 = vmatmul.mubr.f32.vlgmr.msra.gmra.mrb[72].mxu0 %v10763_v41  ;;  %v8749_v41 = vpack.c.bf16 %v5943_v7, %v5942_v26  ;;  %v5953_v26 = vld [vmem:[%s12910_s3 + $0x278] sm:$0xff]  ;;  %v6046_v7 = vld [vmem:[%s12910_s3 + $0x560] sm:$0xff] }
 0x1cb   : > { %7574 = vmatprep.mubr.f32.mxu0 %v10823_v4  ;;  %8744 = vmatpush3.bf16.msra.mxu0 %v8741_v8  ;;  %v8949_v8 = vpack.c.bf16 %v6043_v29, %v6042_v3  ;;  %v11065_v29 = vld [vmem:[#allocation2 + $0x28] sm:$0xff] }
 0x1cc   : > { %8932 = vmatpush3.bf16.msra.mxu1 %v8929_v23  ;;  %8746 = vmatprep.subr.bf16.mxu0 %v8745_v49  ;;  %v5950_v23 = vld [vmem:[%s12910_s3 + $0x260] sm:$0xff] }
 0x1cd   : > { %8934 = vmatprep.subr.bf16.mxu1 %v8933_v43  ;;  %v8765_v47 = vpack.c.bf16 %v5951_v25, %v5950_v23  ;;  %v5961_v23 = vld [vmem:[%s12910_s3 + $0x2b8] sm:$0xff]  ;;  %v6054_v25 = vld [vmem:[%s12910_s3 + $0x5a0] sm:$0xff] }
 0x1ce   : > { %7575 = vmatmul.mubr.f32.gmra.mrb[74].mxu0 %v10833_v11 }
 0x1cf   : > { %7836 = vmatmul.mubr.f32.vlgmr.msra.gmra.mrb[0].mxu1 %v10948_v39  ;;  %7577 = vmatprep.mubr.f32.mxu0 %v10843_v28 }
 0x1d0   : > { %8748 = vmatpush3.bf16.msra.mxu0 %v8745_v49  ;;  %7838 = vmatprep.mubr.f32.mxu1 %v10483_v33  ;;  %v6040_v33 = vld [vmem:[%s12910_s3 + $0x530] sm:$0xff]  ;;  %v8953_v49 = vpack.c.bf16 %v6045_v13, %v6044_v37  ;;  %v6055_v37 = vld [vmem:[%s12910_s3 + $0x5a8] sm:$0xff] }
 0x1d1   : > { %8936 = vmatpush3.bf16.msra.mxu1 %v8933_v43  ;;  %8750 = vmatprep.subr.bf16.mxu0 %v8749_v41  ;;  %v8945_v2 = vpack.c.bf16 %v6041_v45, %v6040_v33  ;;  %v5952_v43 = vld [vmem:[%s12910_s3 + $0x270] sm:$0xff]  ;;  %v8965_v45 = vpack.c.bf16 %v6051_v24, %v6050_v18  ;;  %v5969_v24 = vld [vmem:[%s12910_s3 + $0x2f8] sm:$0xff] }
 0x1d2   : > { %7578 = vmatmul.mubr.f32.gmra.mrb[76].mxu0 %v10853_v21  ;;  %8938 = vmatprep.subr.bf16.mxu1 %v8937_v50  ;;  %v8769_v16 = vpack.c.bf16 %v5953_v26, %v5952_v43  ;;  %v5963_v43 = vld [vmem:[%s12910_s3 + $0x2c8] sm:$0xff]  ;;  %v5968_v18 = vld [vmem:[%s12910_s3 + $0x2f0] sm:$0xff] }
 0x1d3   : > { %7839 = vmatmul.mubr.f32.gmra.mrb[2].mxu1 %v10966_v32  ;;  %7580 = vmatprep.mubr.f32.mxu0 %v10866_v14 }
 0x1d4   : > { %8752 = vmatpush3.bf16.msra.mxu0 %v8749_v41  ;;  %7841 = vmatprep.mubr.f32.mxu1 %v10543_v40  ;;  %v5954_v41 = vld [vmem:[%s12910_s3 + $0x280] sm:$0xff] }
 0x1d5   : > { %8940 = vmatpush3.bf16.msra.mxu1 %v8937_v50  ;;  %8754 = vmatprep.subr.bf16.mxu0 %v8753_v57  ;;  %v5955_v50 = vld [vmem:[%s12910_s3 + $0x288] sm:$0xff] }
 0x1d6   : > { %7581 = vmatmul.mubr.f32.gmra.mrb[78].mxu0 %v10872_v42  ;;  %8942 = vmatprep.subr.bf16.mxu1 %v8941_v44  ;;  %v8773_v54 = vpack.c.bf16 %v5955_v50, %v5954_v41  ;;  %v11115_v41 = vld [vmem:[#allocation2 + $0x6c] sm:$0xff] }
 0x1d7   : > { %7842 = vmatmul.mubr.f32.gmra.mrb[4].mxu1 %v10987_v31  ;;  %7615 = vmatprep.mubr.f32.mxu0 %v1816_v17  ;;  %v5959_v17 = vld [vmem:[%s12910_s3 + $0x2a8] sm:$0xff] }
 0x1d8   : > { %8756 = vmatpush3.bf16.msra.mxu0 %v8753_v57  ;;  %7844 = vmatprep.mubr.f32.mxu1 %v10560_v0  ;;  %v5956_v57 = vld [vmem:[%s12910_s3 + $0x290] sm:$0xff]  ;;  %v8781_v3 = vpack.c.bf16 %v5959_v17, %v5958_v1 }
 0x1d9   : > { %8944 = vmatpush3.bf16.msra.mxu1 %v8941_v44  ;;  %8758 = vmatprep.subr.bf16.mxu0 %v8757_v63  ;;  %v5957_v44 = vld [vmem:[%s12910_s3 + $0x298] sm:$0xff]  ;;  %v6064_v17 = vld [vmem:[%s12910_s3 + $0x5f0] sm:$0xff] }
 0x1da   : > { %8946 = vmatprep.subr.bf16.mxu1 %v8945_v2  ;;  %v8777_v33 = vpack.c.bf16 %v5957_v44, %v5956_v57 }
 0x1db   : > { %7845 = vmatmul.mubr.f32.gmra.mrb[6].mxu1 %v11000_v15 }
 0x1dc   : > { %8760 = vmatpush3.bf16.msra.mxu0 %v8757_v63  ;;  %7879 = vmatprep.mubr.f32.mxu1 %v10471_v30  ;;  %v6047_v30 = vld [vmem:[%s12910_s3 + $0x568] sm:$0xff]  ;;  %v9937_v63 = vld [vmem:[#allocation2 + $0x10] sm:$0xff] }
 0x1dd   : > { %8948 = vmatpush3.bf16.msra.mxu1 %v8945_v2  ;;  %8762 = vmatprep.subr.bf16.mxu0 %v8761_v35  ;;  %v8957_v10 = vpack.c.bf16 %v6047_v30, %v6046_v7  ;;  %v6052_v2 = vld [vmem:[%s12910_s3 + $0x590] sm:$0xff] }
 0x1de   : > { %8950 = vmatprep.subr.bf16.mxu1 %v8949_v8  ;;  %v5964_v30 = vld [vmem:[%s12910_s3 + $0x2d0] sm:$0xff] }
 0x1e0   : > { %8764 = vmatpush3.bf16.msra.mxu0 %v8761_v35  ;;  %v8969_v35 = vpack.c.bf16 %v6053_v62, %v6052_v2  ;;  %v6065_v2 = vld [vmem:[%s12910_s3 + $0x5f8] sm:$0xff] }
 0x1e1   : > { %8952 = vmatpush3.bf16.msra.mxu1 %v8949_v8  ;;  %8766 = vmatprep.subr.bf16.mxu0 %v8765_v47  ;;  %v5960_v8 = vld [vmem:[%s12910_s3 + $0x2b0] sm:$0xff]  ;;  %v8993_v62 = vpack.c.bf16 %v6065_v2, %v6064_v17  ;;  %v6093_v2 = vld [vmem:[%s12910_s3 + $0x6d8] sm:$0xff] }
 0x1e2   : > { %8954 = vmatprep.subr.bf16.mxu1 %v8953_v49  ;;  %v8785_v13 = vpack.c.bf16 %v5961_v23, %v5960_v8  ;;  %v9940_v23 = vld [vmem:[#allocation2 + $0x18] sm:$0xff]  ;;  %v11256_v17 = vld [vmem:[#allocation2 + $0x6e] sm:$0xff] }
 0x1e4   : > { %8768 = vmatpush3.bf16.msra.mxu0 %v8765_v47  ;;  %v8973_v47 = vpack.c.bf16 %v6055_v37, %v6054_v25  ;;  %v6068_v25 = vld [vmem:[%s12910_s3 + $0x610] sm:$0xff]  ;;  %v6069_v37 = vld [vmem:[%s12910_s3 + $0x618] sm:$0xff] }
 0x1e5   : > { %8956 = vmatpush3.bf16.msra.mxu1 %v8953_v49  ;;  %8770 = vmatprep.subr.bf16.mxu0 %v8769_v16  ;;  %v5962_v49 = vld [vmem:[%s12910_s3 + $0x2c0] sm:$0xff] }
 0x1e6   : > { %8958 = vmatprep.subr.bf16.mxu1 %v8957_v10  ;;  %v8789_v26 = vpack.c.bf16 %v5963_v43, %v5962_v49  ;;  %v6070_v49 = vld [vmem:[%s12910_s3 + $0x620] sm:$0xff]  ;;  %v6071_v43 = vld [vmem:[%s12910_s3 + $0x628] sm:$0xff] }
 0x1e8   : > { %8772 = vmatpush3.bf16.msra.mxu0 %v8769_v16  ;;  %v5965_v16 = vld [vmem:[%s12910_s3 + $0x2d8] sm:$0xff] }
 0x1e9   : > { %8960 = vmatpush3.bf16.msra.mxu1 %v8957_v10  ;;  %8774 = vmatprep.subr.bf16.mxu0 %v8773_v54  ;;  %v8793_v10 = vpack.c.bf16 %v5965_v16, %v5964_v30  ;;  %v6073_v30 = vld [vmem:[%s12910_s3 + $0x638] sm:$0xff]  ;;  %v6074_v16 = vld [vmem:[%s12910_s3 + $0x640] sm:$0xff] }
 0x1ea   : > { %8962 = vmatprep.subr.bf16.mxu1 %v8961_v56 }
 0x1eb   : > { %7616 = vmatmul.mubr.f32.vlgmr.msra.gmra.mrb[72].mxu0 %v9937_v63  ;;  %v8801_v63 = vpack.c.bf16 %v5969_v24, %v5968_v18  ;;  %v6086_v18 = vld [vmem:[%s12910_s3 + $0x6a0] sm:$0xff]  ;;  %v6087_v24 = vld [vmem:[%s12910_s3 + $0x6a8] sm:$0xff] }
 0x1ec   : > { %7618 = vmatprep.mubr.f32.mxu0 %v10948_v39  ;;  %8776 = vmatpush3.bf16.msra.mxu0 %v8773_v54  ;;  %v6061_v54 = vld [vmem:[%s12910_s3 + $0x5d8] sm:$0xff] }
 0x1ed   : > { %8964 = vmatpush3.bf16.msra.mxu1 %v8961_v56  ;;  %8778 = vmatprep.subr.bf16.mxu0 %v8777_v33  ;;  %v9939_v56 = vld [vmem:[#allocation2 + $0x19] sm:$0xff]  ;;  %v8985_v44 = vpack.c.bf16 %v6061_v54, %v6060_v52  ;;  %v6083_v52 = vld [vmem:[%s12910_s3 + $0x688] sm:$0xff] }
 0x1ee   : > { %8966 = vmatprep.subr.bf16.mxu1 %v8965_v45 }
 0x1ef   : > { %7619 = vmatmul.mubr.f32.gmra.mrb[74].mxu0 %v11065_v29 }
 0x1f0   : > { %7880 = vmatmul.mubr.f32.vlgmr.msra.gmra.mrb[0].mxu1 %v10689_v48  ;;  %7621 = vmatprep.mubr.f32.mxu0 %v10966_v32 }
 0x1f1   : > { %8780 = vmatpush3.bf16.msra.mxu0 %v8777_v33  ;;  %7882 = vmatprep.mubr.f32.mxu1 %v10509_v36  ;;  %v6056_v36 = vld [vmem:[%s12910_s3 + $0x5b0] sm:$0xff]  ;;  %v6062_v33 = vld [vmem:[%s12910_s3 + $0x5e0] sm:$0xff] }
 0x1f2   : > { %8968 = vmatpush3.bf16.msra.mxu1 %v8965_v45  ;;  %8782 = vmatprep.subr.bf16.mxu0 %v8781_v3  ;;  %v6063_v45 = vld [vmem:[%s12910_s3 + $0x5e8] sm:$0xff] }
 0x1f3   : > { %7622 = vmatmul.mubr.f32.gmra.mrb[76].mxu0 %v10543_v40  ;;  %8970 = vmatprep.subr.bf16.mxu1 %v8969_v35  ;;  %v6057_v40 = vld [vmem:[%s12910_s3 + $0x5b8] sm:$0xff]  ;;  %v8989_v1 = vpack.c.bf16 %v6063_v45, %v6062_v33  ;;  %v9037_v33 = vpack.c.bf16 %v6087_v24, %v6086_v18  ;;  %v6088_v45 = vld [vmem:[%s12910_s3 + $0x6b0] sm:$0xff]  ;;  %v11362_v24 = vld [vmem:[#allocation2 + $0x40] sm:$0xff] }
 0x1f4   : > { %7883 = vmatmul.mubr.f32.gmra.mrb[2].mxu1 %v10711_v19  ;;  %7624 = vmatprep.mubr.f32.mxu0 %v10987_v31  ;;  %v8977_v7 = vpack.c.bf16 %v6057_v40, %v6056_v36  ;;  %v11170_v36 = vld [vmem:[#allocation2 + $0x25] sm:$0xff]  ;;  %v9005_v40 = vpack.c.bf16 %v6071_v43, %v6070_v49  ;;  %v6101_v49 = vld [vmem:[%s12910_s3 + $0x718] sm:$0xff] }
 0x1f5   : > { %8784 = vmatpush3.bf16.msra.mxu0 %v8781_v3  ;;  %7885 = vmatprep.mubr.f32.mxu1 %v10531_v61  ;;  %v6058_v61 = vld [vmem:[%s12910_s3 + $0x5c0] sm:$0xff]  ;;  %v6121_v18 = vld [vmem:[%s12910_s3 + $0x7b8] sm:$0xff] }
 0x1f6   : > { %8972 = vmatpush3.bf16.msra.mxu1 %v8969_v35  ;;  %8786 = vmatprep.subr.bf16.mxu0 %v8785_v13  ;;  %v6066_v3 = vld [vmem:[%s12910_s3 + $0x600] sm:$0xff]  ;;  %v6067_v35 = vld [vmem:[%s12910_s3 + $0x608] sm:$0xff] }
 0x1f7   : > { %7625 = vmatmul.mubr.f32.gmra.mrb[78].mxu0 %v10560_v0  ;;  %8974 = vmatprep.subr.bf16.mxu1 %v8973_v47  ;;  %v6059_v0 = vld [vmem:[%s12910_s3 + $0x5c8] sm:$0xff]  ;;  %v8997_v8 = vpack.c.bf16 %v6067_v35, %v6066_v3  ;;  %v6096_v35 = vld [vmem:[%s12910_s3 + $0x6f0] sm:$0xff] }
 0x1f8   : > { %7886 = vmatmul.mubr.f32.gmra.mrb[4].mxu1 %v10733_v9  ;;  %7659 = vmatprep.mubr.f32.mxu0 %v10673_v53  ;;  %v8981_v50 = vpack.c.bf16 %v6059_v0, %v6058_v61  ;;  %v5966_v53 = vld [vmem:[%s12910_s3 + $0x2e0] sm:$0xff]  ;;  %v6075_v61 = vld [vmem:[%s12910_s3 + $0x648] sm:$0xff] }
 0x1f9   : > { %8788 = vmatpush3.bf16.msra.mxu0 %v8785_v13  ;;  %7888 = vmatprep.mubr.f32.mxu1 %v10583_v59  ;;  %v8797_v57 = vpack.c.bf16 %v5967_v46, %v5966_v53  ;;  %v9001_v13 = vpack.c.bf16 %v6069_v37, %v6068_v25  ;;  %v6079_v0 = vld [vmem:[%s12910_s3 + $0x668] sm:$0xff]  ;;  %v6082_v46 = vld [vmem:[%s12910_s3 + $0x680] sm:$0xff] }
 0x1fa   : > { %8976 = vmatpush3.bf16.msra.mxu1 %v8973_v47  ;;  %8790 = vmatprep.subr.bf16.mxu0 %v8789_v26  ;;  %v11161_v47 = vld [vmem:[#allocation2 + $0x30] sm:$0xff]  ;;  %v9029_v54 = vpack.c.bf16 %v6083_v52, %v6082_v46  ;;  %v6099_v25 = vld [vmem:[%s12910_s3 + $0x708] sm:$0xff]  ;;  %v6117_v46 = vld [vmem:[%s12910_s3 + $0x798] sm:$0xff] }
 0x1fb   : > { %8978 = vmatprep.subr.bf16.mxu1 %v8977_v7 }
 0x1fc   : > { %7889 = vmatmul.mubr.f32.gmra.mrb[6].mxu1 %v11115_v41 }
 0x1fd   : > { %8792 = vmatpush3.bf16.msra.mxu0 %v8789_v26  ;;  %7923 = vmatprep.mubr.f32.mxu1 %v9939_v56  ;;  %v11177_v26 = vld [vmem:[#allocation2 + $0x48] sm:$0xff]  ;;  %v6084_v56 = vld [vmem:[%s12910_s3 + $0x690] sm:$0xff] }
 0x1fe   : > { %8980 = vmatpush3.bf16.msra.mxu1 %v8977_v7  ;;  %8794 = vmatprep.subr.bf16.mxu0 %v8793_v10  ;;  %v6072_v7 = vld [vmem:[%s12910_s3 + $0x630] sm:$0xff] }
 0x1ff   : > { %8982 = vmatprep.subr.bf16.mxu1 %v8981_v50 }
 0x201   : > { %8796 = vmatpush3.bf16.msra.mxu0 %v8793_v10 }
 0x202   : > { %8984 = vmatpush3.bf16.msra.mxu1 %v8981_v50  ;;  %8798 = vmatprep.subr.bf16.mxu0 %v8797_v57  ;;  %v6080_v50 = vld [vmem:[%s12910_s3 + $0x670] sm:$0xff] }
 0x203   : > { %8986 = vmatprep.subr.bf16.mxu1 %v8985_v44 }
 0x205   : > { %8800 = vmatpush3.bf16.msra.mxu0 %v8797_v57  ;;  %v6085_v57 = vld [vmem:[%s12910_s3 + $0x698] sm:$0xff] }
 0x206   : > { %8988 = vmatpush3.bf16.msra.mxu1 %v8985_v44  ;;  %8802 = vmatprep.subr.bf16.mxu0 %v8801_v63  ;;  %v9033_v44 = vpack.c.bf16 %v6085_v57, %v6084_v56  ;;  %v6119_v56 = vld [vmem:[%s12910_s3 + $0x7a8] sm:$0xff] }
 0x207   : > { %8990 = vmatprep.subr.bf16.mxu1 %v8989_v1 }
 0x209   : > { %8804 = vmatpush3.bf16.msra.mxu0 %v8801_v63  ;;  %v6089_v63 = vld [vmem:[%s12910_s3 + $0x6b8] sm:$0xff] }
 0x20a   : > { %8992 = vmatpush3.bf16.msra.mxu1 %v8989_v1  ;;  %v6091_v1 = vld [vmem:[%s12910_s3 + $0x6c8] sm:$0xff] }
 0x20b   : > { %8994 = vmatprep.subr.bf16.mxu1 %v8993_v62 }
 0x20c   : > { %7660 = vmatmul.mubr.f32.vlgmr.msra.gmra.mrb[72].mxu0 %v9940_v23  ;;  %v6098_v23 = vld [vmem:[%s12910_s3 + $0x700] sm:$0xff] }
 0x20d   : > { %7662 = vmatprep.mubr.f32.mxu0 %v10689_v48  ;;  %v11174_v48 = vld [vmem:[#allocation2 + $0x31] sm:$0xff]  ;;  %v9061_v37 = vpack.c.bf16 %v6099_v25, %v6098_v23 }
 0x20e   : > { %8996 = vmatpush3.bf16.msra.mxu1 %v8993_v62  ;;  %v6095_v62 = vld [vmem:[%s12910_s3 + $0x6e8] sm:$0xff]  ;;  %v6132_v23 = vld [vmem:[%s12910_s3 + $0x810] sm:$0xff]  ;;  %v6133_v25 = vld [vmem:[%s12910_s3 + $0x818] sm:$0xff] }
 0x20f   : > { %8998 = vmatprep.subr.bf16.mxu1 %v8997_v8 }
 0x210   : > { %7663 = vmatmul.mubr.f32.gmra.mrb[74].mxu0 %v11161_v47 }
 0x211   : > { %7924 = vmatmul.mubr.f32.vlgmr.msra.gmra.mrb[0].mxu1 %v11170_v36  ;;  %7665 = vmatprep.mubr.f32.mxu0 %v10711_v19  ;;  %v9009_v19 = vpack.c.bf16 %v6073_v30, %v6072_v7  ;;  %v6103_v7 = vld [vmem:[%s12910_s3 + $0x728] sm:$0xff] }
 0x212   : > { %7926 = vmatprep.mubr.f32.mxu1 %v11174_v48  ;;  %9000 = vmatpush3.bf16.msra.mxu1 %v8997_v8 }
 0x213   : > { %9002 = vmatprep.subr.bf16.mxu1 %v9001_v13 }
 0x214   : > { %7666 = vmatmul.mubr.f32.gmra.mrb[76].mxu0 %v11177_v26 }
 0x215   : > { %7927 = vmatmul.mubr.f32.gmra.mrb[2].mxu1 %v10587_v51  ;;  %7668 = vmatprep.mubr.f32.mxu0 %v10733_v9  ;;  %v9013_v51 = vpack.c.bf16 %v6075_v61, %v6074_v16  ;;  %v6077_v9 = vld [vmem:[%s12910_s3 + $0x658] sm:$0xff]  ;;  %v6107_v61 = vld [vmem:[%s12910_s3 + $0x748] sm:$0xff] }
 0x216   : > { %7929 = vmatprep.mubr.f32.mxu1 %v10611_v60  ;;  %9004 = vmatpush3.bf16.msra.mxu1 %v9001_v13  ;;  %v11198_v60 = vld [vmem:[#allocation2 + $0x6d] sm:$0xff]  ;;  %v6105_v16 = vld [vmem:[%s12910_s3 + $0x738] sm:$0xff] }
 0x217   : > { %9006 = vmatprep.subr.bf16.mxu1 %v9005_v40  ;;  %v6100_v13 = vld [vmem:[%s12910_s3 + $0x710] sm:$0xff] }
 0x218   : > { %7669 = vmatmul.mubr.f32.gmra.mrb[78].mxu0 %v10583_v59  ;;  %v6076_v59 = vld [vmem:[%s12910_s3 + $0x650] sm:$0xff]  ;;  %v9065_v43 = vpack.c.bf16 %v6101_v49, %v6100_v13  ;;  %v6134_v13 = vld [vmem:[%s12910_s3 + $0x820] sm:$0xff]  ;;  %v6135_v49 = vld [vmem:[%s12910_s3 + $0x828] sm:$0xff] }
 0x219   : > { %7930 = vmatmul.mubr.f32.gmra.mrb[4].mxu1 %v10613_v6  ;;  %v9017_v6 = vpack.c.bf16 %v6077_v9, %v6076_v59  ;;  %v6109_v59 = vld [vmem:[%s12910_s3 + $0x758] sm:$0xff]  ;;  %v6111_v9 = vld [vmem:[%s12910_s3 + $0x768] sm:$0xff] }
 0x21a   : > { %7932 = vmatprep.mubr.f32.mxu1 %v10637_v27  ;;  %9008 = vmatpush3.bf16.msra.mxu1 %v9005_v40  ;;  %v6078_v27 = vld [vmem:[%s12910_s3 + $0x660] sm:$0xff] }
 0x21b   : > { %9010 = vmatprep.subr.bf16.mxu1 %v9009_v19  ;;  %v9021_v10 = vpack.c.bf16 %v6079_v0, %v6078_v27  ;;  %v6102_v40 = vld [vmem:[%s12910_s3 + $0x720] sm:$0xff]  ;;  %v6112_v27 = vld [vmem:[%s12910_s3 + $0x770] sm:$0xff] }
 0x21c   : > { %v9069_v30 = vpack.c.bf16 %v6103_v7, %v6102_v40  ;;  %v9133_v40 = vpack.c.bf16 %v6135_v49, %v6134_v13  ;;  %v6136_v7 = vld [vmem:[%s12910_s3 + $0x830] sm:$0xff] }
 0x21d   : > { %7933 = vmatmul.mubr.f32.gmra.mrb[6].mxu1 %v11198_v60  ;;  %v6164_v49 = vld [vmem:[%s12910_s3 + $0x910] sm:$0xff] }
 0x21e   : > { %9012 = vmatpush3.bf16.msra.mxu1 %v9009_v19  ;;  %7967 = vmatprep.mubr.f32.mxu1 %v10692_v55  ;;  %v6081_v55 = vld [vmem:[%s12910_s3 + $0x678] sm:$0xff]  ;;  %v6104_v19 = vld [vmem:[%s12910_s3 + $0x730] sm:$0xff] }
 0x21f   : > { %9014 = vmatprep.subr.bf16.mxu1 %v9013_v51  ;;  %v9025_v53 = vpack.c.bf16 %v6081_v55, %v6080_v50  ;;  %v6115_v50 = vld [vmem:[%s12910_s3 + $0x788] sm:$0xff] }
 0x222   : > { %9016 = vmatpush3.bf16.msra.mxu1 %v9013_v51  ;;  %v11314_v51 = vld [vmem:[#allocation2 + $0x6f] sm:$0xff] }
 0x223   : > { %9018 = vmatprep.subr.bf16.mxu1 %v9017_v6 }
 0x226   : > { %9020 = vmatpush3.bf16.msra.mxu1 %v9017_v6 }
 0x227   : > { %9022 = vmatprep.subr.bf16.mxu1 %v9021_v10 }
 0x22a   : > { %9024 = vmatpush3.bf16.msra.mxu1 %v9021_v10  ;;  %v6114_v10 = vld [vmem:[%s12910_s3 + $0x780] sm:$0xff] }
 0x22b   : > { %9026 = vmatprep.subr.bf16.mxu1 %v9025_v53  ;;  %v9093_v55 = vpack.c.bf16 %v6115_v50, %v6114_v10  ;;  %v6147_v10 = vld [vmem:[%s12910_s3 + $0x888] sm:$0xff] }
 0x22e   : > { %9028 = vmatpush3.bf16.msra.mxu1 %v9025_v53  ;;  %v6116_v53 = vld [vmem:[%s12910_s3 + $0x790] sm:$0xff] }
 0x22f   : > { %9030 = vmatprep.subr.bf16.mxu1 %v9029_v54  ;;  %v9097_v52 = vpack.c.bf16 %v6117_v46, %v6116_v53  ;;  %v6149_v53 = vld [vmem:[%s12910_s3 + $0x898] sm:$0xff] }
 0x231   : > { %7968 = vmatmul.mubr.f32.vlgmr.msra.gmra.mrb[0].mxu1 %v10702_v58  ;;  %v9041_v58 = vpack.c.bf16 %v6089_v63, %v6088_v45  ;;  %v6123_v45 = vld [vmem:[%s12910_s3 + $0x7c8] sm:$0xff]  ;;  %v11372_v63 = vld [vmem:[#allocation2 + $0x58] sm:$0xff] }
 0x232   : > { %7970 = vmatprep.mubr.f32.mxu1 %v10714_v20  ;;  %9032 = vmatpush3.bf16.msra.mxu1 %v9029_v54  ;;  %v6090_v20 = vld [vmem:[%s12910_s3 + $0x6c0] sm:$0xff] }
 0x233   : > { %9034 = vmatprep.subr.bf16.mxu1 %v9033_v44  ;;  %v6118_v54 = vld [vmem:[%s12910_s3 + $0x7a0] sm:$0xff] }
 0x234   : > { %v9101_v57 = vpack.c.bf16 %v6119_v56, %v6118_v54  ;;  %v6151_v54 = vld [vmem:[%s12910_s3 + $0x8a8] sm:$0xff]  ;;  %v11480_v56 = vld [vmem:[#allocation2 + $0x3d] sm:$0xff] }
 0x235   : > { %7971 = vmatmul.mubr.f32.gmra.mrb[2].mxu1 %v10724_v5  ;;  %v9045_v5 = vpack.c.bf16 %v6091_v1, %v6090_v20  ;;  %v6124_v20 = vld [vmem:[%s12910_s3 + $0x7d0] sm:$0xff]  ;;  %v6125_v1 = vld [vmem:[%s12910_s3 + $0x7d8] sm:$0xff] }
 0x236   : > { %7973 = vmatprep.mubr.f32.mxu1 %v10739_v34  ;;  %9036 = vmatpush3.bf16.msra.mxu1 %v9033_v44  ;;  %v6092_v34 = vld [vmem:[%s12910_s3 + $0x6d0] sm:$0xff] }
 0x237   : > { %9038 = vmatprep.subr.bf16.mxu1 %v9037_v33  ;;  %v6120_v44 = vld [vmem:[%s12910_s3 + $0x7b0] sm:$0xff] }
 0x239   : > { %7974 = vmatmul.mubr.f32.gmra.mrb[4].mxu1 %v10745_v12  ;;  %v9049_v12 = vpack.c.bf16 %v6093_v2, %v6092_v34  ;;  %v6126_v34 = vld [vmem:[%s12910_s3 + $0x7e0] sm:$0xff]  ;;  %v6127_v2 = vld [vmem:[%s12910_s3 + $0x7e8] sm:$0xff] }
 0x23a   : > { %7976 = vmatprep.mubr.f32.mxu1 %v10754_v22  ;;  %9040 = vmatpush3.bf16.msra.mxu1 %v9037_v33  ;;  %v6094_v22 = vld [vmem:[%s12910_s3 + $0x6e0] sm:$0xff] }
 0x23b   : > { %9042 = vmatprep.subr.bf16.mxu1 %v9041_v58  ;;  %v9053_v3 = vpack.c.bf16 %v6095_v62, %v6094_v22  ;;  %v6122_v33 = vld [vmem:[%s12910_s3 + $0x7c0] sm:$0xff]  ;;  %v6128_v22 = vld [vmem:[%s12910_s3 + $0x7f0] sm:$0xff]  ;;  %v6129_v62 = vld [vmem:[%s12910_s3 + $0x7f8] sm:$0xff] }
 0x23d   : > { %7977 = vmatmul.mubr.f32.gmra.mrb[6].mxu1 %v11256_v17 }
 0x23e   : > { %9044 = vmatpush3.bf16.msra.mxu1 %v9041_v58  ;;  %8011 = vmatprep.mubr.f32.mxu1 %v10823_v4  ;;  %v6097_v4 = vld [vmem:[%s12910_s3 + $0x6f8] sm:$0xff]  ;;  %v11376_v58 = vld [vmem:[#allocation2 + $0x70] sm:$0xff] }
 0x23f   : > { %9046 = vmatprep.subr.bf16.mxu1 %v9045_v5  ;;  %v9057_v8 = vpack.c.bf16 %v6097_v4, %v6096_v35  ;;  %v6130_v35 = vld [vmem:[%s12910_s3 + $0x800] sm:$0xff]  ;;  %v6131_v4 = vld [vmem:[%s12910_s3 + $0x808] sm:$0xff] }
 0x242   : > { %9048 = vmatpush3.bf16.msra.mxu1 %v9045_v5  ;;  %v9947_v5 = vld [vmem:[#allocation2 + $0x24] sm:$0xff] }
 0x243   : > { %9050 = vmatprep.subr.bf16.mxu1 %v9049_v12 }
 0x246   : > { %9052 = vmatpush3.bf16.msra.mxu1 %v9049_v12  ;;  %v9117_v12 = vpack.c.bf16 %v6127_v2, %v6126_v34  ;;  %v6156_v34 = vld [vmem:[%s12910_s3 + $0x8d0] sm:$0xff]  ;;  %v6157_v2 = vld [vmem:[%s12910_s3 + $0x8d8] sm:$0xff] }
 0x247   : > { %9054 = vmatprep.subr.bf16.mxu1 %v9053_v3 }
 0x24a   : > { %9056 = vmatpush3.bf16.msra.mxu1 %v9053_v3  ;;  %v9121_v3 = vpack.c.bf16 %v6129_v62, %v6128_v22  ;;  %v9177_v22 = vpack.c.bf16 %v6157_v2, %v6156_v34  ;;  %v6158_v62 = vld [vmem:[%s12910_s3 + $0x8e0] sm:$0xff] }
 0x24b   : > { %9058 = vmatprep.subr.bf16.mxu1 %v9057_v8 }
 0x24e   : > { %9060 = vmatpush3.bf16.msra.mxu1 %v9057_v8  ;;  %v9125_v8 = vpack.c.bf16 %v6131_v4, %v6130_v35  ;;  %v6160_v4 = vld [vmem:[%s12910_s3 + $0x8f0] sm:$0xff] }
 0x24f   : > { %9062 = vmatprep.subr.bf16.mxu1 %v9061_v37 }
 0x251   : > { %8012 = vmatmul.mubr.f32.vlgmr.msra.gmra.mrb[0].mxu1 %v10833_v11  ;;  %v9073_v11 = vpack.c.bf16 %v6105_v16, %v6104_v19  ;;  %v11426_v19 = vld [vmem:[#allocation2 + $0x54] sm:$0xff] }
 0x252   : > { %8014 = vmatprep.mubr.f32.mxu1 %v10843_v28  ;;  %9064 = vmatpush3.bf16.msra.mxu1 %v9061_v37  ;;  %v6106_v28 = vld [vmem:[%s12910_s3 + $0x740] sm:$0xff]  ;;  %v9129_v37 = vpack.c.bf16 %v6133_v25, %v6132_v23 }
 0x253   : > { %9066 = vmatprep.subr.bf16.mxu1 %v9065_v43  ;;  %v6162_v25 = vld [vmem:[%s12910_s3 + $0x900] sm:$0xff] }
 0x255   : > { %8015 = vmatmul.mubr.f32.gmra.mrb[2].mxu1 %v10853_v21  ;;  %v9077_v21 = vpack.c.bf16 %v6107_v61, %v6106_v28  ;;  %v6139_v28 = vld [vmem:[%s12910_s3 + $0x848] sm:$0xff]  ;;  %v11435_v61 = vld [vmem:[#allocation2 + $0x60] sm:$0xff] }
 0x256   : > { %8017 = vmatprep.mubr.f32.mxu1 %v10866_v14  ;;  %9068 = vmatpush3.bf16.msra.mxu1 %v9065_v43  ;;  %v6108_v14 = vld [vmem:[%s12910_s3 + $0x750] sm:$0xff]  ;;  %v11416_v43 = vld [vmem:[#allocation2 + $0x3c] sm:$0xff] }
 0x257   : > { %9070 = vmatprep.subr.bf16.mxu1 %v9069_v30 }
 0x259   : > { %8018 = vmatmul.mubr.f32.gmra.mrb[4].mxu1 %v10872_v42  ;;  %v9081_v42 = vpack.c.bf16 %v6109_v59, %v6108_v14  ;;  %v11439_v14 = vld [vmem:[#allocation2 + $0x78] sm:$0xff]  ;;  %v6140_v59 = vld [vmem:[%s12910_s3 + $0x850] sm:$0xff] }
 0x25a   : > { %8020 = vmatprep.mubr.f32.mxu1 %v10881_v38  ;;  %9072 = vmatpush3.bf16.msra.mxu1 %v9069_v30  ;;  %v6110_v38 = vld [vmem:[%s12910_s3 + $0x760] sm:$0xff]  ;;  %v6137_v30 = vld [vmem:[%s12910_s3 + $0x838] sm:$0xff] }
 0x25b   : > { %9074 = vmatprep.subr.bf16.mxu1 %v9073_v11  ;;  %v9085_v6 = vpack.c.bf16 %v6111_v9, %v6110_v38  ;;  %v9137_v16 = vpack.c.bf16 %v6137_v30, %v6136_v7  ;;  %v6142_v38 = vld [vmem:[%s12910_s3 + $0x860] sm:$0xff]  ;;  %v6143_v9 = vld [vmem:[%s12910_s3 + $0x868] sm:$0xff] }
 0x25c   : > { %v6166_v30 = vld [vmem:[%s12910_s3 + $0x920] sm:$0xff] }
 0x25d   : > { %8021 = vmatmul.mubr.f32.gmra.mrb[6].mxu1 %v11314_v51 }
 0x25e   : > { %9076 = vmatpush3.bf16.msra.mxu1 %v9073_v11  ;;  %8055 = vmatprep.mubr.f32.mxu1 %v10948_v39  ;;  %v6113_v39 = vld [vmem:[%s12910_s3 + $0x778] sm:$0xff]  ;;  %v6138_v11 = vld [vmem:[%s12910_s3 + $0x840] sm:$0xff] }
 0x25f   : > { %9078 = vmatprep.subr.bf16.mxu1 %v9077_v21  ;;  %v9089_v0 = vpack.c.bf16 %v6113_v39, %v6112_v27  ;;  %v6144_v27 = vld [vmem:[%s12910_s3 + $0x870] sm:$0xff] }
 0x262   : > { %9080 = vmatpush3.bf16.msra.mxu1 %v9077_v21  ;;  %v9141_v21 = vpack.c.bf16 %v6139_v28, %v6138_v11  ;;  %v11544_v11 = vld [vmem:[#allocation2 + $0x32] sm:$0xff]  ;;  %v11547_v28 = vld [vmem:[#allocation2 + $0x3e] sm:$0xff] }
 0x263   : > { %9082 = vmatprep.subr.bf16.mxu1 %v9081_v42 }
 0x266   : > { %9084 = vmatpush3.bf16.msra.mxu1 %v9081_v42  ;;  %v6141_v42 = vld [vmem:[%s12910_s3 + $0x858] sm:$0xff] }
 0x267   : > { %9086 = vmatprep.subr.bf16.mxu1 %v9085_v6 }
 0x26a   : > { %9088 = vmatpush3.bf16.msra.mxu1 %v9085_v6  ;;  %v9149_v6 = vpack.c.bf16 %v6143_v9, %v6142_v38  ;;  %v11559_v38 = vld [vmem:[#allocation2 + $0x56] sm:$0xff] }
 0x26b   : > { %9090 = vmatprep.subr.bf16.mxu1 %v9089_v0 }
 0x26e   : > { %9092 = vmatpush3.bf16.msra.mxu1 %v9089_v0  ;;  %v6146_v0 = vld [vmem:[%s12910_s3 + $0x880] sm:$0xff] }
 0x26f   : > { %9094 = vmatprep.subr.bf16.mxu1 %v9093_v55  ;;  %v9157_v50 = vpack.c.bf16 %v6147_v10, %v6146_v0  ;;  %v11572_v0 = vld [vmem:[#allocation2 + $0x7a] sm:$0xff]  ;;  %v6172_v10 = vld [vmem:[%s12910_s3 + $0x950] sm:$0xff] }
 0x271   : > { %8056 = vmatmul.mubr.f32.vlgmr.msra.gmra.mrb[0].mxu1 %v11065_v29 }
 0x272   : > { %8058 = vmatprep.mubr.f32.mxu1 %v10966_v32  ;;  %9096 = vmatpush3.bf16.msra.mxu1 %v9093_v55  ;;  %v9105_v32 = vpack.c.bf16 %v6121_v18, %v6120_v44  ;;  %v6148_v55 = vld [vmem:[%s12910_s3 + $0x890] sm:$0xff]  ;;  %v6153_v18 = vld [vmem:[%s12910_s3 + $0x8b8] sm:$0xff] }
 0x273   : > { %9098 = vmatprep.subr.bf16.mxu1 %v9097_v52  ;;  %v9161_v46 = vpack.c.bf16 %v6149_v53, %v6148_v55  ;;  %v6152_v44 = vld [vmem:[%s12910_s3 + $0x8b0] sm:$0xff]  ;;  %v9961_v55 = vld [vmem:[#allocation2 + $0x27] sm:$0xff] }
 0x275   : > { %8059 = vmatmul.mubr.f32.gmra.mrb[2].mxu1 %v11362_v24 }
 0x276   : > { %8061 = vmatprep.mubr.f32.mxu1 %v10987_v31  ;;  %9100 = vmatpush3.bf16.msra.mxu1 %v9097_v52  ;;  %v9109_v31 = vpack.c.bf16 %v6123_v45, %v6122_v33  ;;  %v6150_v52 = vld [vmem:[%s12910_s3 + $0x8a0] sm:$0xff]  ;;  %v11492_v33 = vld [vmem:[#allocation2 + $0x55] sm:$0xff]  ;;  %v9169_v45 = vpack.c.bf16 %v6153_v18, %v6152_v44 }
 0x277   : > { %9102 = vmatprep.subr.bf16.mxu1 %v9101_v57 }
 0x279   : > { %8062 = vmatmul.mubr.f32.gmra.mrb[4].mxu1 %v11372_v63 }
 0x27a   : > { %8064 = vmatprep.mubr.f32.mxu1 %v11000_v15  ;;  %9104 = vmatpush3.bf16.msra.mxu1 %v9101_v57  ;;  %v9113_v15 = vpack.c.bf16 %v6125_v1, %v6124_v20  ;;  %v9165_v57 = vpack.c.bf16 %v6151_v54, %v6150_v52  ;;  %v6155_v20 = vld [vmem:[%s12910_s3 + $0x8c8] sm:$0xff]  ;;  %v6174_v54 = vld [vmem:[%s12910_s3 + $0x960] sm:$0xff] }
 0x27b   : > { %9106 = vmatprep.subr.bf16.mxu1 %v9105_v32  ;;  %v11501_v1 = vld [vmem:[#allocation2 + $0x61] sm:$0xff] }
 0x27d   : > { %8065 = vmatmul.mubr.f32.gmra.mrb[6].mxu1 %v11376_v58 }
 0x27e   : > { %9108 = vmatpush3.bf16.msra.mxu1 %v9105_v32  ;;  %8099 = vmatprep.mubr.f32.mxu1 %v9947_v5  ;;  %v11489_v32 = vld [vmem:[#allocation2 + $0x49] sm:$0xff] }
 0x27f   : > { %9110 = vmatprep.subr.bf16.mxu1 %v9109_v31 }
 0x282   : > { %9112 = vmatpush3.bf16.msra.mxu1 %v9109_v31  ;;  %v6154_v31 = vld [vmem:[%s12910_s3 + $0x8c0] sm:$0xff] }
 0x283   : > { %9114 = vmatprep.subr.bf16.mxu1 %v9113_v15  ;;  %v9173_v5 = vpack.c.bf16 %v6155_v20, %v6154_v31  ;;  %v6176_v31 = vld [vmem:[%s12910_s3 + $0x970] sm:$0xff]  ;;  %v6177_v20 = vld [vmem:[%s12910_s3 + $0x978] sm:$0xff] }
 0x284   : > { %v9217_v34 = vpack.c.bf16 %v6177_v20, %v6176_v31  ;;  %v6194_v20 = vld [vmem:[%s12910_s3 + $0xa00] sm:$0xff] }
 0x286   : > { %9116 = vmatpush3.bf16.msra.mxu1 %v9113_v15  ;;  %v11505_v15 = vld [vmem:[#allocation2 + $0x79] sm:$0xff] }
 0x287   : > { %9118 = vmatprep.subr.bf16.mxu1 %v9117_v12 }
 0x28a   : > { %9120 = vmatpush3.bf16.msra.mxu1 %v9117_v12  ;;  %v9955_v12 = vld [vmem:[#allocation2 + $0x26] sm:$0xff] }
 0x28b   : > { %9122 = vmatprep.subr.bf16.mxu1 %v9121_v3 }
 0x28e   : > { %9124 = vmatpush3.bf16.msra.mxu1 %v9121_v3  ;;  %v6159_v3 = vld [vmem:[%s12910_s3 + $0x8e8] sm:$0xff] }
 0x28f   : > { %9126 = vmatprep.subr.bf16.mxu1 %v9125_v8  ;;  %v9181_v35 = vpack.c.bf16 %v6159_v3, %v6158_v62 }
 0x291   : > { %8100 = vmatmul.mubr.f32.vlgmr.msra.gmra.mrb[0].mxu1 %v11161_v47 }
 0x292   : > { %8102 = vmatprep.mubr.f32.mxu1 %v11416_v43  ;;  %9128 = vmatpush3.bf16.msra.mxu1 %v9125_v8  ;;  %v6161_v8 = vld [vmem:[%s12910_s3 + $0x8f8] sm:$0xff] }
 0x293   : > { %9130 = vmatprep.subr.bf16.mxu1 %v9129_v37  ;;  %v9185_v23 = vpack.c.bf16 %v6161_v8, %v6160_v4  ;;  %v6180_v4 = vld [vmem:[%s12910_s3 + $0x990] sm:$0xff]  ;;  %v6181_v8 = vld [vmem:[%s12910_s3 + $0x998] sm:$0xff] }
 0x295   : > { %8103 = vmatmul.mubr.f32.gmra.mrb[2].mxu1 %v11177_v26 }
 0x296   : > { %8105 = vmatprep.mubr.f32.mxu1 %v11426_v19  ;;  %9132 = vmatpush3.bf16.msra.mxu1 %v9129_v37  ;;  %v6163_v37 = vld [vmem:[%s12910_s3 + $0x908] sm:$0xff] }
 0x297   : > { %9134 = vmatprep.subr.bf16.mxu1 %v9133_v40  ;;  %v9189_v13 = vpack.c.bf16 %v6163_v37, %v6162_v25  ;;  %v6182_v25 = vld [vmem:[%s12910_s3 + $0x9a0] sm:$0xff]  ;;  %v6183_v37 = vld [vmem:[%s12910_s3 + $0x9a8] sm:$0xff] }
 0x299   : > { %8106 = vmatmul.mubr.f32.gmra.mrb[4].mxu1 %v11435_v61 }
 0x29a   : > { %8108 = vmatprep.mubr.f32.mxu1 %v11115_v41  ;;  %9136 = vmatpush3.bf16.msra.mxu1 %v9133_v40  ;;  %v9145_v41 = vpack.c.bf16 %v6141_v42, %v6140_v59  ;;  %v6165_v40 = vld [vmem:[%s12910_s3 + $0x918] sm:$0xff]  ;;  %v6168_v59 = vld [vmem:[%s12910_s3 + $0x930] sm:$0xff] }
 0x29b   : > { %9138 = vmatprep.subr.bf16.mxu1 %v9137_v16  ;;  %v9193_v7 = vpack.c.bf16 %v6165_v40, %v6164_v49  ;;  %v6169_v42 = vld [vmem:[%s12910_s3 + $0x938] sm:$0xff]  ;;  %v9229_v40 = vpack.c.bf16 %v6183_v37, %v6182_v25 }
 0x29c   : > { %v9201_v9 = vpack.c.bf16 %v6169_v42, %v6168_v59  ;;  %v11630_v49 = vld [vmem:[#allocation2 + $0x3f] sm:$0xff]  ;;  %v11695_v25 = vld [vmem:[#allocation2 + $0x34] sm:$0xff] }
 0x29d   : > { %8109 = vmatmul.mubr.f32.gmra.mrb[6].mxu1 %v11439_v14  ;;  %v6186_v42 = vld [vmem:[%s12910_s3 + $0x9c0] sm:$0xff] }
 0x29e   : > { %9140 = vmatpush3.bf16.msra.mxu1 %v9137_v16  ;;  %8143 = vmatprep.mubr.f32.mxu1 %v11170_v36  ;;  %v6145_v36 = vld [vmem:[%s12910_s3 + $0x878] sm:$0xff]  ;;  %v6167_v16 = vld [vmem:[%s12910_s3 + $0x928] sm:$0xff] }
 0x29f   : > { %9142 = vmatprep.subr.bf16.mxu1 %v9141_v21  ;;  %v9153_v39 = vpack.c.bf16 %v6145_v36, %v6144_v27  ;;  %v6171_v27 = vld [vmem:[%s12910_s3 + $0x948] sm:$0xff] }
 0x2a0   : > { %v11568_v36 = vld [vmem:[#allocation2 + $0x62] sm:$0xff] }
 0x2a2   : > { %9144 = vmatpush3.bf16.msra.mxu1 %v9141_v21  ;;  %v9197_v21 = vpack.c.bf16 %v6167_v16, %v6166_v30  ;;  %v6185_v30 = vld [vmem:[%s12910_s3 + $0x9b8] sm:$0xff]  ;;  %v11639_v16 = vld [vmem:[#allocation2 + $0x4b] sm:$0xff] }
 0x2a3   : > { %9146 = vmatprep.subr.bf16.mxu1 %v9145_v41 }
 0x2a6   : > { %9148 = vmatpush3.bf16.msra.mxu1 %v9145_v41  ;;  %v11556_v41 = vld [vmem:[#allocation2 + $0x4a] sm:$0xff] }
 0x2a7   : > { %9150 = vmatprep.subr.bf16.mxu1 %v9149_v6 }
 0x2aa   : > { %9152 = vmatpush3.bf16.msra.mxu1 %v9149_v6  ;;  %v6170_v6 = vld [vmem:[%s12910_s3 + $0x940] sm:$0xff] }
 0x2ab   : > { %9154 = vmatprep.subr.bf16.mxu1 %v9153_v39 }
 0x2ae   : > { %9156 = vmatpush3.bf16.msra.mxu1 %v9153_v39  ;;  %v9205_v39 = vpack.c.bf16 %v6171_v27, %v6170_v6  ;;  %v11651_v6 = vld [vmem:[#allocation2 + $0x63] sm:$0xff] }
 0x2af   : > { %9158 = vmatprep.subr.bf16.mxu1 %v9157_v50 }
 0x2b1   : > { %8144 = vmatmul.mubr.f32.vlgmr.msra.gmra.mrb[0].mxu1 %v11174_v48 }
 0x2b2   : > { %8146 = vmatprep.mubr.f32.mxu1 %v11480_v56  ;;  %9160 = vmatpush3.bf16.msra.mxu1 %v9157_v50  ;;  %v6173_v50 = vld [vmem:[%s12910_s3 + $0x958] sm:$0xff] }
 0x2b3   : > { %9162 = vmatprep.subr.bf16.mxu1 %v9161_v46 }
 0x2b5   : > { %8147 = vmatmul.mubr.f32.gmra.mrb[2].mxu1 %v11489_v32 }
 0x2b6   : > { %8149 = vmatprep.mubr.f32.mxu1 %v11492_v33  ;;  %9164 = vmatpush3.bf16.msra.mxu1 %v9161_v46  ;;  %v9209_v46 = vpack.c.bf16 %v6173_v50, %v6172_v10  ;;  %v6188_v10 = vld [vmem:[%s12910_s3 + $0x9d0] sm:$0xff]  ;;  %v6189_v50 = vld [vmem:[%s12910_s3 + $0x9d8] sm:$0xff] }
 0x2b7   : > { %9166 = vmatprep.subr.bf16.mxu1 %v9165_v57 }
 0x2b9   : > { %8150 = vmatmul.mubr.f32.gmra.mrb[4].mxu1 %v11501_v1 }
 0x2ba   : > { %8152 = vmatprep.mubr.f32.mxu1 %v11198_v60  ;;  %9168 = vmatpush3.bf16.msra.mxu1 %v9165_v57  ;;  %v6175_v57 = vld [vmem:[%s12910_s3 + $0x968] sm:$0xff] }
 0x2bb   : > { %9170 = vmatprep.subr.bf16.mxu1 %v9169_v45  ;;  %v9213_v18 = vpack.c.bf16 %v6175_v57, %v6174_v54  ;;  %v6191_v54 = vld [vmem:[%s12910_s3 + $0x9e8] sm:$0xff] }
 0x2bd   : > { %8153 = vmatmul.mubr.f32.gmra.mrb[6].mxu1 %v11505_v15 }
 0x2be   : > { %9172 = vmatpush3.bf16.msra.mxu1 %v9169_v45  ;;  %8187 = vmatprep.mubr.f32.mxu1 %v9955_v12  ;;  %v6178_v12 = vld [vmem:[%s12910_s3 + $0x980] sm:$0xff] }
 0x2bf   : > { %9174 = vmatprep.subr.bf16.mxu1 %v9173_v5 }
 0x2c2   : > { %9176 = vmatpush3.bf16.msra.mxu1 %v9173_v5 }
 0x2c3   : > { %9178 = vmatprep.subr.bf16.mxu1 %v9177_v22 }
 0x2c6   : > { %9180 = vmatpush3.bf16.msra.mxu1 %v9177_v22  ;;  %v6179_v22 = vld [vmem:[%s12910_s3 + $0x988] sm:$0xff] }
 0x2c7   : > { %9182 = vmatprep.subr.bf16.mxu1 %v9181_v35  ;;  %v9221_v3 = vpack.c.bf16 %v6179_v22, %v6178_v12  ;;  %v6196_v22 = vld [vmem:[%s12910_s3 + $0xa10] sm:$0xff] }
 0x2ca   : > { %9184 = vmatpush3.bf16.msra.mxu1 %v9181_v35 }
 0x2cb   : > { %9186 = vmatprep.subr.bf16.mxu1 %v9185_v23 }
 0x2ce   : > { %9188 = vmatpush3.bf16.msra.mxu1 %v9185_v23  ;;  %v9225_v23 = vpack.c.bf16 %v6181_v8, %v6180_v4  ;;  %v6198_v8 = vld [vmem:[%s12910_s3 + $0xa20] sm:$0xff] }
 0x2cf   : > { %9190 = vmatprep.subr.bf16.mxu1 %v9189_v13 }
 0x2d1   : > { %8188 = vmatmul.mubr.f32.vlgmr.msra.gmra.mrb[0].mxu1 %v11544_v11 }
 0x2d2   : > { %8190 = vmatprep.mubr.f32.mxu1 %v11547_v28  ;;  %9192 = vmatpush3.bf16.msra.mxu1 %v9189_v13  ;;  %v11627_v13 = vld [vmem:[#allocation2 + $0x33] sm:$0xff] }
 0x2d3   : > { %9194 = vmatprep.subr.bf16.mxu1 %v9193_v7 }
 0x2d5   : > { %8191 = vmatmul.mubr.f32.gmra.mrb[2].mxu1 %v11556_v41 }
 0x2d6   : > { %8193 = vmatprep.mubr.f32.mxu1 %v11559_v38  ;;  %9196 = vmatpush3.bf16.msra.mxu1 %v9193_v7  ;;  %v6184_v7 = vld [vmem:[%s12910_s3 + $0x9b0] sm:$0xff] }
 0x2d7   : > { %9198 = vmatprep.subr.bf16.mxu1 %v9197_v21  ;;  %v9233_v59 = vpack.c.bf16 %v6185_v30, %v6184_v7  ;;  %v6201_v7 = vld [vmem:[%s12910_s3 + $0xa38] sm:$0xff]  ;;  %v11705_v30 = vld [vmem:[#allocation2 + $0x4c] sm:$0xff] }
 0x2d9   : > { %8194 = vmatmul.mubr.f32.gmra.mrb[4].mxu1 %v11568_v36 }
 0x2da   : > { %8196 = vmatprep.mubr.f32.mxu1 %v11256_v17  ;;  %9200 = vmatpush3.bf16.msra.mxu1 %v9197_v21  ;;  %v11642_v21 = vld [vmem:[#allocation2 + $0x57] sm:$0xff] }
 0x2db   : > { %9202 = vmatprep.subr.bf16.mxu1 %v9201_v9 }
 0x2dd   : > { %8197 = vmatmul.mubr.f32.gmra.mrb[6].mxu1 %v11572_v0 }
 0x2de   : > { %9204 = vmatpush3.bf16.msra.mxu1 %v9201_v9  ;;  %8231 = vmatprep.mubr.f32.mxu1 %v9961_v55  ;;  %v6187_v9 = vld [vmem:[%s12910_s3 + $0x9c8] sm:$0xff]  ;;  %v9241_v55 = vpack.c.bf16 %v6189_v50, %v6188_v10  ;;  %v11719_v50 = vld [vmem:[#allocation2 + $0x7c] sm:$0xff] }
 0x2df   : > { %v11581_v53 = vpop.f32.mrb[72].mxu0  ;;  %9206 = vmatprep.subr.bf16.mxu1 %v9205_v39  ;;  %v9237_v27 = vpack.c.bf16 %v6187_v9, %v6186_v42  ;;  %v6202_v42 = vld [vmem:[%s12910_s3 + $0xa40] sm:$0xff]  ;;  %v6203_v9 = vld [vmem:[%s12910_s3 + $0xa48] sm:$0xff] }
 0x2e0   : > { %v11583_v52 = vpop.f32.mrb[73].mxu0  ;;  %v9269_v10 = vpack.c.bf16 %v6203_v9, %v6202_v42  ;;  %v6219_v42 = vld [vmem:[%s12910_s3 + $0xac8] sm:$0xff] }
 0x2e1   : > { %v9970_v9 = vld [vmem:[#allocation2 + $0x6c] sm:$0xff] }
 0x2e2   : > { %9208 = vmatpush3.bf16.msra.mxu1 %v9205_v39  ;;  %v11655_v39 = vld [vmem:[#allocation2 + $0x7b] sm:$0xff] }
 0x2e3   : > { %v11591_v44 = vpop.f32.mrb[74].mxu0  ;;  %9210 = vmatprep.subr.bf16.mxu1 %v9209_v46 }
 0x2e4   : > { %v11593_v45 = vpop.f32.mrb[75].mxu0 }
 0x2e6   : > { %9212 = vmatpush3.bf16.msra.mxu1 %v9209_v46  ;;  %v6190_v46 = vld [vmem:[%s12910_s3 + $0x9e0] sm:$0xff] }
 0x2e7   : > { %v11601_v5 = vpop.f32.mrb[76].mxu0  ;;  %9214 = vmatprep.subr.bf16.mxu1 %v9213_v18  ;;  %v9245_v57 = vpack.c.bf16 %v6191_v54, %v6190_v46  ;;  %v6205_v46 = vld [vmem:[%s12910_s3 + $0xa58] sm:$0xff] }
 0x2e8   : > { %v11603_v2 = vpop.f32.mrb[77].mxu0 }
 0x2ea   : > { %9216 = vmatpush3.bf16.msra.mxu1 %v9213_v18  ;;  %v6192_v18 = vld [vmem:[%s12910_s3 + $0x9f0] sm:$0xff] }
 0x2eb   : > { %v11611_v62 = vpop.f32.mrb[78].mxu0  ;;  %9218 = vmatprep.subr.bf16.mxu1 %v9217_v34 }
 0x2ec   : > { %v11613_v35 = vpop.f32.mrb[79].mxu0 }
 0x2ee   : > { %9220 = vmatpush3.bf16.msra.mxu1 %v9217_v34  ;;  %v6195_v34 = vld [vmem:[%s12910_s3 + $0xa08] sm:$0xff] }
 0x2ef   : > { %9222 = vmatprep.subr.bf16.mxu1 %v9221_v3  ;;  %v9253_v12 = vpack.c.bf16 %v6195_v34, %v6194_v20  ;;  %v6210_v34 = vld [vmem:[%s12910_s3 + $0xa80] sm:$0xff] }
 0x2f1   : > { %8232 = vmatmul.mubr.f32.vlgmr.msra.gmra.mrb[0].mxu1 %v11627_v13 }
 0x2f2   : > { %8234 = vmatprep.mubr.f32.mxu1 %v11630_v49  ;;  %9224 = vmatpush3.bf16.msra.mxu1 %v9221_v3  ;;  %v6197_v3 = vld [vmem:[%s12910_s3 + $0xa18] sm:$0xff] }
 0x2f3   : > { %9226 = vmatprep.subr.bf16.mxu1 %v9225_v23  ;;  %v9257_v4 = vpack.c.bf16 %v6197_v3, %v6196_v22  ;;  %v6212_v3 = vld [vmem:[%s12910_s3 + $0xa90] sm:$0xff] }
 0x2f5   : > { %8235 = vmatmul.mubr.f32.gmra.mrb[2].mxu1 %v11639_v16 }
 0x2f6   : > { %8237 = vmatprep.mubr.f32.mxu1 %v11642_v21  ;;  %9228 = vmatpush3.bf16.msra.mxu1 %v9225_v23  ;;  %v6199_v23 = vld [vmem:[%s12910_s3 + $0xa28] sm:$0xff] }
 0x2f7   : > { %9230 = vmatprep.subr.bf16.mxu1 %v9229_v40  ;;  %v9261_v37 = vpack.c.bf16 %v6199_v23, %v6198_v8  ;;  %v6214_v23 = vld [vmem:[%s12910_s3 + $0xaa0] sm:$0xff] }
 0x2f9   : > { %8238 = vmatmul.mubr.f32.gmra.mrb[4].mxu1 %v11651_v6 }
 0x2fa   : > { %8240 = vmatprep.mubr.f32.mxu1 %v11314_v51  ;;  %9232 = vmatpush3.bf16.msra.mxu1 %v9229_v40  ;;  %v6200_v40 = vld [vmem:[%s12910_s3 + $0xa30] sm:$0xff] }
 0x2fb   : > { %9234 = vmatprep.subr.bf16.mxu1 %v9233_v59 }
 0x2fd   : > { %8241 = vmatmul.mubr.f32.gmra.mrb[6].mxu1 %v11655_v39 }
 0x2fe   : > { %9236 = vmatpush3.bf16.msra.mxu1 %v9233_v59  ;;  %8275 = vmatprep.mubr.f32.mxu1 %v11065_v29  ;;  %v6193_v29 = vld [vmem:[%s12910_s3 + $0x9f8] sm:$0xff]  ;;  %v9265_v59 = vpack.c.bf16 %v6201_v7, %v6200_v40  ;;  %v6216_v7 = vld [vmem:[%s12910_s3 + $0xab0] sm:$0xff] }
 0x2ff   : > { %9238 = vmatprep.subr.bf16.mxu1 %v9237_v27  ;;  %v9249_v31 = vpack.c.bf16 %v6193_v29, %v6192_v18  ;;  %v6207_v18 = vld [vmem:[%s12910_s3 + $0xa68] sm:$0xff] }
 0x302   : > { %9240 = vmatpush3.bf16.msra.mxu1 %v9237_v27  ;;  %v11715_v27 = vld [vmem:[#allocation2 + $0x64] sm:$0xff] }
 0x303   : > { %9242 = vmatprep.subr.bf16.mxu1 %v9241_v55 }
 0x306   : > { %9244 = vmatpush3.bf16.msra.mxu1 %v9241_v55  ;;  %v6204_v55 = vld [vmem:[%s12910_s3 + $0xa50] sm:$0xff] }
 0x307   : > { %9246 = vmatprep.subr.bf16.mxu1 %v9245_v57  ;;  %v9273_v54 = vpack.c.bf16 %v6205_v46, %v6204_v55  ;;  %v6221_v55 = vld [vmem:[%s12910_s3 + $0xad8] sm:$0xff] }
 0x30a   : > { %9248 = vmatpush3.bf16.msra.mxu1 %v9245_v57  ;;  %v6206_v57 = vld [vmem:[%s12910_s3 + $0xa60] sm:$0xff] }
 0x30b   : > { %9250 = vmatprep.subr.bf16.mxu1 %v9249_v31  ;;  %v9277_v29 = vpack.c.bf16 %v6207_v18, %v6206_v57  ;;  %v6224_v18 = vld [vmem:[%s12910_s3 + $0xaf0] sm:$0xff] }
 0x30e   : > { %9252 = vmatpush3.bf16.msra.mxu1 %v9249_v31  ;;  %v6208_v31 = vld [vmem:[%s12910_s3 + $0xa70] sm:$0xff] }
 0x30f   : > { %9254 = vmatprep.subr.bf16.mxu1 %v9253_v12 }
 0x311   : > { %8276 = vmatmul.mubr.f32.vlgmr.msra.gmra.mrb[0].mxu1 %v11695_v25 }
 0x312   : > { %8278 = vmatprep.mubr.f32.mxu1 %v11362_v24  ;;  %9256 = vmatpush3.bf16.msra.mxu1 %v9253_v12  ;;  %v6211_v12 = vld [vmem:[%s12910_s3 + $0xa88] sm:$0xff] }
 0x313   : > { %9258 = vmatprep.subr.bf16.mxu1 %v9257_v4  ;;  %v9285_v22 = vpack.c.bf16 %v6211_v12, %v6210_v34  ;;  %v6228_v34 = vld [vmem:[%s12910_s3 + $0xb10] sm:$0xff]  ;;  %v6229_v12 = vld [vmem:[%s12910_s3 + $0xb18] sm:$0xff] }
 0x315   : > { %8279 = vmatmul.mubr.f32.gmra.mrb[2].mxu1 %v11705_v30 }
 0x316   : > { %8281 = vmatprep.mubr.f32.mxu1 %v11372_v63  ;;  %9260 = vmatpush3.bf16.msra.mxu1 %v9257_v4  ;;  %v6213_v4 = vld [vmem:[%s12910_s3 + $0xa98] sm:$0xff] }
 0x317   : > { %9262 = vmatprep.subr.bf16.mxu1 %v9261_v37  ;;  %v9289_v8 = vpack.c.bf16 %v6213_v4, %v6212_v3  ;;  %v6230_v3 = vld [vmem:[%s12910_s3 + $0xb20] sm:$0xff]  ;;  %v6231_v4 = vld [vmem:[%s12910_s3 + $0xb28] sm:$0xff] }
 0x319   : > { %8282 = vmatmul.mubr.f32.gmra.mrb[4].mxu1 %v11715_v27 }
 0x31a   : > { %8284 = vmatprep.mubr.f32.mxu1 %v11376_v58  ;;  %9264 = vmatpush3.bf16.msra.mxu1 %v9261_v37  ;;  %v6215_v37 = vld [vmem:[%s12910_s3 + $0xaa8] sm:$0xff] }
 0x31b   : > { %9266 = vmatprep.subr.bf16.mxu1 %v9265_v59  ;;  %v9293_v40 = vpack.c.bf16 %v6215_v37, %v6214_v23  ;;  %v6232_v23 = vld [vmem:[%s12910_s3 + $0xb30] sm:$0xff]  ;;  %v6233_v37 = vld [vmem:[%s12910_s3 + $0xb38] sm:$0xff] }
 0x31d   : > { %8285 = vmatmul.mubr.f32.gmra.mrb[6].mxu1 %v11719_v50 }
 0x31e   : > { %9268 = vmatpush3.bf16.msra.mxu1 %v9265_v59  ;;  %8319 = vmatprep.mubr.f32.mxu1 %v11161_v47  ;;  %v6209_v47 = vld [vmem:[%s12910_s3 + $0xa78] sm:$0xff] }
 0x31f   : > { %9270 = vmatprep.subr.bf16.mxu1 %v9269_v10  ;;  %v9281_v20 = vpack.c.bf16 %v6209_v47, %v6208_v31  ;;  %v6217_v59 = vld [vmem:[%s12910_s3 + $0xab8] sm:$0xff]  ;;  %v6226_v31 = vld [vmem:[%s12910_s3 + $0xb00] sm:$0xff]  ;;  %v6227_v47 = vld [vmem:[%s12910_s3 + $0xb08] sm:$0xff] }
 0x322   : > { %9272 = vmatpush3.bf16.msra.mxu1 %v9269_v10  ;;  %v3919_v10 = vld [vmem:[#allocation2 + $0x84] sm:$0xff] }
 0x323   : > { %9274 = vmatprep.subr.bf16.mxu1 %v9273_v54 }
 0x326   : > { %9276 = vmatpush3.bf16.msra.mxu1 %v9273_v54  ;;  %v6223_v54 = vld [vmem:[%s12910_s3 + $0xae8] sm:$0xff] }
 0x327   : > { %9278 = vmatprep.subr.bf16.mxu1 %v9277_v29 }
 0x32a   : > { %9280 = vmatpush3.bf16.msra.mxu1 %v9277_v29 }
 0x32b   : > { %9282 = vmatprep.subr.bf16.mxu1 %v9281_v20 }
 0x32e   : > { %9284 = vmatpush3.bf16.msra.mxu1 %v9281_v20  ;;  %v9317_v20 = vpack.c.bf16 %v6227_v47, %v6226_v31  ;;  %v6251_v31 = vld [vmem:[%s12910_s3 + $0xbc8] sm:$0xff] }
 0x32f   : > { %9286 = vmatprep.subr.bf16.mxu1 %v9285_v22  ;;  %v4181_v47 = vld [vmem:[#allocation2 + $0x86] sm:$0xff] }
 0x331   : > { %8320 = vmatmul.mubr.f32.vlgmr.msra.gmra.mrb[0].mxu1 %v11416_v43  ;;  %v9297_v43 = vpack.c.bf16 %v6217_v59, %v6216_v7  ;;  %v4050_v7 = vld [vmem:[#allocation2 + $0x85] sm:$0xff]  ;;  %v6237_v59 = vld [vmem:[%s12910_s3 + $0xb58] sm:$0xff] }
 0x332   : > { %8322 = vmatprep.mubr.f32.mxu1 %v11177_v26  ;;  %9288 = vmatpush3.bf16.msra.mxu1 %v9285_v22  ;;  %v6218_v26 = vld [vmem:[%s12910_s3 + $0xac0] sm:$0xff]  ;;  %v9321_v22 = vpack.c.bf16 %v6229_v12, %v6228_v34  ;;  %v6255_v34 = vld [vmem:[%s12910_s3 + $0xbe8] sm:$0xff] }
 0x333   : > { %9290 = vmatprep.subr.bf16.mxu1 %v9289_v8 }
 0x335   : > { %8323 = vmatmul.mubr.f32.gmra.mrb[2].mxu1 %v11426_v19  ;;  %v9301_v19 = vpack.c.bf16 %v6219_v42, %v6218_v26  ;;  %v6240_v42 = vld [vmem:[%s12910_s3 + $0xb70] sm:$0xff] }
 0x336   : > { %8325 = vmatprep.mubr.f32.mxu1 %v11435_v61  ;;  %9292 = vmatpush3.bf16.msra.mxu1 %v9289_v8  ;;  %v6220_v61 = vld [vmem:[%s12910_s3 + $0xad0] sm:$0xff]  ;;  %v9325_v8 = vpack.c.bf16 %v6231_v4, %v6230_v3  ;;  %v6258_v4 = vld [vmem:[%s12910_s3 + $0xc00] sm:$0xff] }
 0x337   : > { %9294 = vmatprep.subr.bf16.mxu1 %v9293_v40  ;;  %v9305_v46 = vpack.c.bf16 %v6221_v55, %v6220_v61  ;;  %v6244_v55 = vld [vmem:[%s12910_s3 + $0xb90] sm:$0xff] }
 0x339   : > { %8326 = vmatmul.mubr.f32.gmra.mrb[4].mxu1 %v9970_v9 }
 0x33a   : > { %8328 = vmatprep.mubr.f32.mxu1 %v11439_v14  ;;  %9296 = vmatpush3.bf16.msra.mxu1 %v9293_v40  ;;  %v6222_v14 = vld [vmem:[%s12910_s3 + $0xae0] sm:$0xff]  ;;  %v6235_v40 = vld [vmem:[%s12910_s3 + $0xb48] sm:$0xff] }
 0x33b   : > { %9298 = vmatprep.subr.bf16.mxu1 %v9297_v43  ;;  %v9309_v57 = vpack.c.bf16 %v6223_v54, %v6222_v14  ;;  %v6246_v54 = vld [vmem:[%s12910_s3 + $0xba0] sm:$0xff] }
 0x33d   : > { %8329 = vmatmul.mubr.f32.gmra.mrb[6].mxu1 %v3919_v10  ;;  %v6243_v10 = vld [vmem:[%s12910_s3 + $0xb88] sm:$0xff] }
 0x33e   : > { %9300 = vmatpush3.bf16.msra.mxu1 %v9297_v43  ;;  %8363 = vmatprep.mubr.f32.mxu1 %v11174_v48  ;;  %v6225_v48 = vld [vmem:[%s12910_s3 + $0xaf8] sm:$0xff]  ;;  %v6239_v43 = vld [vmem:[%s12910_s3 + $0xb68] sm:$0xff] }
 0x33f   : > { %9302 = vmatprep.subr.bf16.mxu1 %v9301_v19  ;;  %v9313_v29 = vpack.c.bf16 %v6225_v48, %v6224_v18  ;;  %v6248_v48 = vld [vmem:[%s12910_s3 + $0xbb0] sm:$0xff] }
 0x342   : > { %9304 = vmatpush3.bf16.msra.mxu1 %v9301_v19  ;;  %v6242_v19 = vld [vmem:[%s12910_s3 + $0xb80] sm:$0xff] }
 0x343   : > { %9306 = vmatprep.subr.bf16.mxu1 %v9305_v46  ;;  %v9349_v61 = vpack.c.bf16 %v6243_v10, %v6242_v19  ;;  %v4443_v19 = vld [vmem:[#allocation2 + $0x88] sm:$0xff]  ;;  %v4597_v10 = vld [vmem:[%s12912_s5] sm:$0xff] }
 0x346   : > { %9308 = vmatpush3.bf16.msra.mxu1 %v9305_v46  ;;  %v6245_v46 = vld [vmem:[%s12910_s3 + $0xb98] sm:$0xff] }
 0x347   : > { %9310 = vmatprep.subr.bf16.mxu1 %v9309_v57  ;;  %v9353_v14 = vpack.c.bf16 %v6245_v46, %v6244_v55 }
 0x34a   : > { %9312 = vmatpush3.bf16.msra.mxu1 %v9309_v57  ;;  %v6247_v57 = vld [vmem:[%s12910_s3 + $0xba8] sm:$0xff] }
 0x34b   : > { %9314 = vmatprep.subr.bf16.mxu1 %v9313_v29  ;;  %v9357_v18 = vpack.c.bf16 %v6247_v57, %v6246_v54  ;;  %v4762_v54 = vld [vmem:[%s12913_s6 + $0x18] sm:$0xff] }
 0x34e   : > { %9316 = vmatpush3.bf16.msra.mxu1 %v9313_v29  ;;  %v6249_v29 = vld [vmem:[%s12910_s3 + $0xbb8] sm:$0xff] }
 0x34f   : > { %9318 = vmatprep.subr.bf16.mxu1 %v9317_v20 }
 0x351   : > { %8364 = vmatmul.mubr.f32.vlgmr.msra.gmra.mrb[0].mxu1 %v11480_v56  ;;  %v9329_v56 = vpack.c.bf16 %v6233_v37, %v6232_v23  ;;  %v6260_v37 = vld [vmem:[%s12910_s3 + $0xc10] sm:$0xff] }
 0x352   : > { %8366 = vmatprep.mubr.f32.mxu1 %v11489_v32  ;;  %9320 = vmatpush3.bf16.msra.mxu1 %v9317_v20  ;;  %v6234_v32 = vld [vmem:[%s12910_s3 + $0xb40] sm:$0xff]  ;;  %v6253_v20 = vld [vmem:[%s12910_s3 + $0xbd8] sm:$0xff] }
 0x353   : > { %9322 = vmatprep.subr.bf16.mxu1 %v9321_v22 }
 0x355   : > { %8367 = vmatmul.mubr.f32.gmra.mrb[2].mxu1 %v11492_v33  ;;  %v9333_v33 = vpack.c.bf16 %v6235_v40, %v6234_v32  ;;  %v6262_v40 = vld [vmem:[%s12910_s3 + $0xc20] sm:$0xff] }
 0x356   : > { %8369 = vmatprep.mubr.f32.mxu1 %v11501_v1  ;;  %9324 = vmatpush3.bf16.msra.mxu1 %v9321_v22  ;;  %v6236_v1 = vld [vmem:[%s12910_s3 + $0xb50] sm:$0xff] }
 0x357   : > { %9326 = vmatprep.subr.bf16.mxu1 %v9325_v8  ;;  %v6256_v22 = vld [vmem:[%s12910_s3 + $0xbf0] sm:$0xff] }
 0x359   : > { %8370 = vmatmul.mubr.f32.gmra.mrb[4].mxu1 %v11198_v60  ;;  %v9337_v60 = vpack.c.bf16 %v6237_v59, %v6236_v1  ;;  %v6264_v1 = vld [vmem:[%s12910_s3 + $0xc30] sm:$0xff]  ;;  %v6265_v59 = vld [vmem:[%s12910_s3 + $0xc38] sm:$0xff] }
 0x35a   : > { %8372 = vmatprep.mubr.f32.mxu1 %v11505_v15  ;;  %9328 = vmatpush3.bf16.msra.mxu1 %v9325_v8  ;;  %v6238_v15 = vld [vmem:[%s12910_s3 + $0xb60] sm:$0xff]  ;;  %v6259_v8 = vld [vmem:[%s12910_s3 + $0xc08] sm:$0xff] }
 0x35b   : > { %9330 = vmatprep.subr.bf16.mxu1 %v9329_v56  ;;  %v9341_v26 = vpack.c.bf16 %v6239_v43, %v6238_v15  ;;  %v9381_v23 = vpack.c.bf16 %v6259_v8, %v6258_v4  ;;  %v4312_v15 = vld [vmem:[#allocation2 + $0x87] sm:$0xff]  ;;  %v6269_v43 = vld [vmem:[%s12910_s3 + $0xc58] sm:$0xff] }
 0x35d   : > { %8373 = vmatmul.mubr.f32.gmra.mrb[6].mxu1 %v4050_v7 }
 0x35e   : > { %9332 = vmatpush3.bf16.msra.mxu1 %v9329_v56  ;;  %8407 = vmatprep.mubr.f32.mxu1 %v11544_v11  ;;  %v6241_v11 = vld [vmem:[%s12910_s3 + $0xb78] sm:$0xff] }
 0x35f   : > { %9334 = vmatprep.subr.bf16.mxu1 %v9333_v33  ;;  %v9345_v9 = vpack.c.bf16 %v6241_v11, %v6240_v42  ;;  %v6261_v56 = vld [vmem:[%s12910_s3 + $0xc18] sm:$0xff]  ;;  %v6272_v11 = vld [vmem:[%s12910_s3 + $0xc70] sm:$0xff] }
 0x360   : > { %v9385_v32 = vpack.c.bf16 %v6261_v56, %v6260_v37 }
 0x362   : > { %9336 = vmatpush3.bf16.msra.mxu1 %v9333_v33  ;;  %v6263_v33 = vld [vmem:[%s12910_s3 + $0xc28] sm:$0xff] }
 0x363   : > { %9338 = vmatprep.subr.bf16.mxu1 %v9337_v60  ;;  %v9389_v7 = vpack.c.bf16 %v6263_v33, %v6262_v40 }
 0x366   : > { %9340 = vmatpush3.bf16.msra.mxu1 %v9337_v60  ;;  %v6267_v60 = vld [vmem:[%s12910_s3 + $0xc48] sm:$0xff] }
 0x367   : > { %9342 = vmatprep.subr.bf16.mxu1 %v9341_v26 }
 0x36a   : > { %9344 = vmatpush3.bf16.msra.mxu1 %v9341_v26  ;;  %v6271_v26 = vld [vmem:[%s12910_s3 + $0xc68] sm:$0xff] }
 0x36b   : > { %9346 = vmatprep.subr.bf16.mxu1 %v9345_v9 }
 0x36e   : > { %9348 = vmatpush3.bf16.msra.mxu1 %v9345_v9 }
 0x36f   : > { %9350 = vmatprep.subr.bf16.mxu1 %v9349_v61 }
 0x371   : > { %8408 = vmatmul.mubr.f32.vlgmr.msra.gmra.mrb[0].mxu1 %v11547_v28  ;;  %v9361_v28 = vpack.c.bf16 %v6249_v29, %v6248_v48  ;;  %v6274_v48 = vld [vmem:[%s12911_s4] ss:$0 sm:$0xff] }
 0x372   : > { %8410 = vmatprep.mubr.f32.mxu1 %v11556_v41  ;;  %9352 = vmatpush3.bf16.msra.mxu1 %v9349_v61  ;;  %v6250_v41 = vld [vmem:[%s12910_s3 + $0xbc0] sm:$0xff]  ;;  %v4778_v61 = vld [vmem:[%s12913_s6 + $0x98] sm:$0xff] }
 0x373   : > { %9354 = vmatprep.subr.bf16.mxu1 %v9353_v14 }
 0x375   : > { %8411 = vmatmul.mubr.f32.gmra.mrb[2].mxu1 %v11559_v38  ;;  %v9365_v38 = vpack.c.bf16 %v6251_v31, %v6250_v41 }
 0x376   : > { %8413 = vmatprep.mubr.f32.mxu1 %v11568_v36  ;;  %9356 = vmatpush3.bf16.msra.mxu1 %v9353_v14  ;;  %v6252_v36 = vld [vmem:[%s12910_s3 + $0xbd0] sm:$0xff] }
 0x377   : > { %9358 = vmatprep.subr.bf16.mxu1 %v9357_v18  ;;  %v4761_v14 = vld [vmem:[%s12913_s6 + $0x10] sm:$0xff] }
 0x378   : > { %v9435_v57 = vpack.c.bf16 %v4762_v54, %v4761_v14  ;;  %v4785_v54 = vld [vmem:[%s12913_s6 + $0xd0] sm:$0xff] }
 0x379   : > { %8414 = vmatmul.mubr.f32.gmra.mrb[4].mxu1 %v11256_v17  ;;  %v9369_v17 = vpack.c.bf16 %v6253_v20, %v6252_v36 }
 0x37a   : > { %8416 = vmatprep.mubr.f32.mxu1 %v11572_v0  ;;  %9360 = vmatpush3.bf16.msra.mxu1 %v9357_v18  ;;  %v6254_v0 = vld [vmem:[%s12910_s3 + $0xbe0] sm:$0xff] }
 0x37b   : > { %9362 = vmatprep.subr.bf16.mxu1 %v9361_v28  ;;  %v9373_v12 = vpack.c.bf16 %v6255_v34, %v6254_v0 }
 0x37d   : > { %8417 = vmatmul.mubr.f32.gmra.mrb[6].mxu1 %v4181_v47 }
 0x37e   : > { %9364 = vmatpush3.bf16.msra.mxu1 %v9361_v28  ;;  %8451 = vmatprep.mubr.f32.mxu1 %v11627_v13  ;;  %v6257_v13 = vld [vmem:[%s12910_s3 + $0xbf8] sm:$0xff] }
 0x37f   : > { %9366 = vmatprep.subr.bf16.mxu1 %v9365_v38  ;;  %v9377_v3 = vpack.c.bf16 %v6257_v13, %v6256_v22 }
 0x382   : > { %9368 = vmatpush3.bf16.msra.mxu1 %v9365_v38 }
 0x383   : > { %9370 = vmatprep.subr.bf16.mxu1 %v9369_v17 }
 0x386   : > { %9372 = vmatpush3.bf16.msra.mxu1 %v9369_v17 }
 0x387   : > { %9374 = vmatprep.subr.bf16.mxu1 %v9373_v12 }
 0x38a   : > { %9376 = vmatpush3.bf16.msra.mxu1 %v9373_v12 }
 0x38b   : > { %9378 = vmatprep.subr.bf16.mxu1 %v9377_v3 }
 0x38e   : > { %9380 = vmatpush3.bf16.msra.mxu1 %v9377_v3 }
 0x38f   : > { %9382 = vmatprep.subr.bf16.mxu1 %v9381_v23 }
 0x391   : > { %8452 = vmatmul.mubr.f32.vlgmr.msra.gmra.mrb[0].mxu1 %v11630_v49  ;;  %v9393_v49 = vpack.c.bf16 %v6265_v59, %v6264_v1 }
 0x392   : > { %8454 = vmatprep.mubr.f32.mxu1 %v11639_v16  ;;  %9384 = vmatpush3.bf16.msra.mxu1 %v9381_v23  ;;  %v6266_v16 = vld [vmem:[%s12910_s3 + $0xc40] sm:$0xff] }
 0x393   : > { %9386 = vmatprep.subr.bf16.mxu1 %v9385_v32 }
 0x395   : > { %8455 = vmatmul.mubr.f32.gmra.mrb[2].mxu1 %v11642_v21  ;;  %v9397_v21 = vpack.c.bf16 %v6267_v60, %v6266_v16 }
 0x396   : > { %8457 = vmatprep.mubr.f32.mxu1 %v11651_v6  ;;  %9388 = vmatpush3.bf16.msra.mxu1 %v9385_v32  ;;  %v6268_v6 = vld [vmem:[%s12910_s3 + $0xc50] sm:$0xff] }
 0x397   : > { %9390 = vmatprep.subr.bf16.mxu1 %v9389_v7 }
 0x399   : > { %8458 = vmatmul.mubr.f32.gmra.mrb[4].mxu1 %v11314_v51  ;;  %v9401_v51 = vpack.c.bf16 %v6269_v43, %v6268_v6  ;;  %v4602_v6 = vld [vmem:[%s12912_s5 + $0x28] sm:$0xff]  ;;  %v4603_v43 = vld [vmem:[%s12912_s5 + $0x30] sm:$0xff] }
 0x39a   : > { %8460 = vmatprep.mubr.f32.mxu1 %v11655_v39  ;;  %9392 = vmatpush3.bf16.msra.mxu1 %v9389_v7  ;;  %v6270_v39 = vld [vmem:[%s12910_s3 + $0xc60] sm:$0xff] }
 0x39b   : > { %9394 = vmatprep.subr.bf16.mxu1 %v9393_v49  ;;  %v9405_v42 = vpack.c.bf16 %v6271_v26, %v6270_v39  ;;  %v4779_v39 = vld [vmem:[%s12913_s6 + $0xa0] sm:$0xff]  ;;  %v4780_v26 = vld [vmem:[%s12913_s6 + $0xa8] sm:$0xff] }
 0x39d   : > { %8461 = vmatmul.mubr.f32.gmra.mrb[6].mxu1 %v4312_v15  ;;  %v4601_v15 = vld [vmem:[%s12912_s5 + $0x20] sm:$0xff] }
 0x39e   : > { %9396 = vmatpush3.bf16.msra.mxu1 %v9393_v49  ;;  %8495 = vmatprep.mubr.f32.mxu1 %v11695_v25  ;;  %v6273_v25 = vld [vmem:[%s12910_s3 + $0xc78] sm:$0xff] }
 0x39f   : > { %9398 = vmatprep.subr.bf16.mxu1 %v9397_v21  ;;  %v9409_v9 = vpack.c.bf16 %v6273_v25, %v6272_v11  ;;  %v4763_v11 = vld [vmem:[%s12913_s6 + $0x20] sm:$0xff]  ;;  %v4764_v25 = vld [vmem:[%s12913_s6 + $0x28] sm:$0xff] }
 0x3a2   : > { %9400 = vmatpush3.bf16.msra.mxu1 %v9397_v21  ;;  %v4600_v21 = vld [vmem:[%s12912_s5 + $0x18] sm:$0xff] }
 0x3a3   : > { %9402 = vmatprep.subr.bf16.mxu1 %v9401_v51 }
 0x3a6   : > { %9404 = vmatpush3.bf16.msra.mxu1 %v9401_v51  ;;  %v4604_v51 = vld [vmem:[%s12912_s5 + $0x38] sm:$0xff] }
 0x3a7   : > { %9406 = vmatprep.subr.bf16.mxu1 %v9405_v42 }
 0x3aa   : > { %9408 = vmatpush3.bf16.msra.mxu1 %v9405_v42  ;;  %v9437_v42 = vpack.c.bf16 %v4780_v26, %v4779_v39  ;;  %v4812_v39 = vld [vmem:[%s12913_s6 + $0x1a8] sm:$0xff] }
 0x3ab   : > { %9410 = vmatprep.subr.bf16.mxu1 %v9409_v9 }
 0x3ae   : > { %9412 = vmatpush3.bf16.msra.mxu1 %v9409_v9  ;;  %v9439_v9 = vpack.c.bf16 %v4764_v25, %v4763_v11  ;;  %v4795_v25 = vld [vmem:[%s12913_s6 + $0x120] sm:$0xff] }
 0x3b1   : > { %8496 = vmatmul.mubr.f32.vlgmr.msra.gmra.mrb[0].mxu1 %v11362_v24  ;;  %v4775_v24 = vld [vmem:[%s12913_s6 + $0x80] sm:$0xff] }
 0x3b2   : > { %8498 = vmatprep.mubr.f32.mxu1 %v11705_v30 }
 0x3b5   : > { %8499 = vmatmul.mubr.f32.gmra.mrb[2].mxu1 %v11372_v63  ;;  %v4776_v63 = vld [vmem:[%s12913_s6 + $0x88] sm:$0xff] }
 0x3b6   : > { %8501 = vmatprep.mubr.f32.mxu1 %v11715_v27  ;;  %v9429_v30 = vpack.c.bf16 %v4776_v63, %v4775_v24  ;;  %v4760_v27 = vld [vmem:[%s12913_s6 + $0x8] sm:$0xff]  ;;  %v4765_v63 = vld [vmem:[%s12913_s6 + $0x30] sm:$0xff] }
 0x3b8   : > { %9430 = vmatprep.subr.bf16.mxu0 %v9429_v30 }
 0x3b9   : > { %8502 = vmatmul.mubr.f32.gmra.mrb[4].mxu1 %v11376_v58  ;;  %v4759_v58 = vld [vmem:[%s12913_s6] sm:$0xff] }
 0x3ba   : > { %8504 = vmatprep.mubr.f32.mxu1 %v11719_v50  ;;  %v4777_v50 = vld [vmem:[%s12913_s6 + $0x90] sm:$0xff]  ;;  %v9431_v55 = vpack.c.bf16 %v4760_v27, %v4759_v58  ;;  %v4766_v58 = vld [vmem:[%s12913_s6 + $0x38] sm:$0xff]  ;;  %v4783_v27 = vld [vmem:[%s12913_s6 + $0xc0] sm:$0xff] }
 0x3bb   : > { %v9433_v46 = vpack.c.bf16 %v4778_v61, %v4777_v50  ;;  %v9443_v30 = vpack.c.bf16 %v4766_v58, %v4765_v63  ;;  %v4784_v50 = vld [vmem:[%s12913_s6 + $0xc8] sm:$0xff]  ;;  %v4797_v58 = vld [vmem:[%s12913_s6 + $0x130] sm:$0xff] }
 0x3bc   : > { %9432 = vmatpush3.bf16.msra.mxu0 %v9431_v55  ;;  %v9445_v61 = vpack.c.bf16 %v4784_v50, %v4783_v27  ;;  %v4767_v55 = vld [vmem:[%s12913_s6 + $0x40] sm:$0xff]  ;;  %v4816_v50 = vld [vmem:[%s12913_s6 + $0x1c8] sm:$0xff] }
 0x3bd   : > { %8505 = vmatmul.mubr.f32.gmra.mrb[6].mxu1 %v4443_v19  ;;  %9434 = vmatprep.subr.bf16.mxu0 %v9433_v46  ;;  %v4781_v19 = vld [vmem:[%s12913_s6 + $0xb0] sm:$0xff]  ;;  %v4768_v46 = vld [vmem:[%s12913_s6 + $0x48] sm:$0xff]  ;;  %v4815_v27 = vld [vmem:[%s12913_s6 + $0x1c0] sm:$0xff] }
 0x3be   : > { %8523 = vmatprep.mubr.msk.f32.mxu1 %vm4605_vm1, %v4597_v10  ;;  %v4782_v10 = vld [vmem:[%s12913_s6 + $0xb8] sm:$0xff]  ;;  %v9447_v14 = vpack.c.bf16 %v4768_v46, %v4767_v55  ;;  %v9477_v55 = vpack.c.bf16 %v4816_v50, %v4815_v27  ;;  %v4799_v46 = vld [vmem:[%s12913_s6 + $0x140] sm:$0xff] }
 0x3bf   : > { %v9441_v24 = vpack.c.bf16 %v4782_v10, %v4781_v19  ;;  %v4813_v19 = vld [vmem:[%s12913_s6 + $0x1b0] sm:$0xff]  ;;  %v4814_v10 = vld [vmem:[%s12913_s6 + $0x1b8] sm:$0xff] }
 0x3c0   : > { %9436 = vmatpush3.bf16.msra.mxu0 %v9435_v57  ;;  %v4786_v57 = vld [vmem:[%s12913_s6 + $0xd8] sm:$0xff]  ;;  %v9473_v63 = vpack.c.bf16 %v4814_v10, %v4813_v19 }
 0x3c1   : > { %9438 = vmatprep.subr.bf16.mxu0 %v9437_v42 }
 0x3c4   : > { %9440 = vmatpush3.bf16.msra.mxu0 %v9439_v9  ;;  %v4796_v9 = vld [vmem:[%s12913_s6 + $0x128] sm:$0xff] }
 0x3c5   : > { %9442 = vmatprep.subr.bf16.mxu0 %v9441_v24  ;;  %v9471_v24 = vpack.c.bf16 %v4796_v9, %v4795_v25  ;;  %v4849_v25 = vld [vmem:[%s12913_s6 + $0x2d0] sm:$0xff]  ;;  %v4850_v9 = vld [vmem:[%s12913_s6 + $0x2d8] sm:$0xff] }
 0x3c6   : > { %v9513_v10 = vpack.c.bf16 %v4850_v9, %v4849_v25 }
 0x3c8   : > { %9444 = vmatpush3.bf16.msra.mxu0 %v9443_v30  ;;  %v4798_v30 = vld [vmem:[%s12913_s6 + $0x138] sm:$0xff] }
 0x3c9   : > { %9446 = vmatprep.subr.bf16.mxu0 %v9445_v61  ;;  %v9475_v61 = vpack.c.bf16 %v4798_v30, %v4797_v58  ;;  %v4851_v58 = vld [vmem:[%s12913_s6 + $0x2e0] sm:$0xff]  ;;  %v4852_v30 = vld [vmem:[%s12913_s6 + $0x2e8] sm:$0xff] }
 0x3ca   : > { %v9517_v50 = vpack.c.bf16 %v4852_v30, %v4851_v58 }
 0x3cc   : > { %9448 = vmatpush3.bf16.msra.mxu0 %v9447_v14  ;;  %v4800_v14 = vld [vmem:[%s12913_s6 + $0x148] sm:$0xff] }
 0x484   : > { %v8497_v18 = vpop.f32.mrb[0].mxu1 }
 0x485   : > { %v9733_v29 = vadd.f32 %v8497_v18, %v11581_v53  ;;  %v4527_v28 = vpop.f32.mrb[1].mxu1  ;;  %v9449_v18 = vpack.c.bf16 %v4786_v57, %v4785_v54  ;;  %v4817_v54 = vld [vmem:[%s12913_s6 + $0x1d0] sm:$0xff]  ;;  %v4818_v57 = vld [vmem:[%s12913_s6 + $0x1d8] sm:$0xff] }
 0x486   : > { %v9734_v41 = vadd.f32 %v4527_v28, %v11583_v52 }
 0x487   : > { %v4582_v31 = vadd.f32 %v9733_v29, %v6274_v48  ;;  %v4770_v29 = vld [vmem:[%s12913_s6 + $0x58] sm:$0xff]  ;;  %9450 = vmatprep.subr.bf16.mxu0 %v9449_v18  ;;  %v9479_v18 = vpack.c.bf16 %v4800_v14, %v4799_v46  ;;  %v4853_v46 = vld [vmem:[%s12913_s6 + $0x2f0] sm:$0xff] }
 0x488   : > { %v4581_v38 = vadd.f32 %v9734_v41, %v6274_v48  ;;  %v8500_v47 = vpop.f32.mrb[2].mxu1  ;;  %v4787_v41 = vld [vmem:[%s12913_s6 + $0xe0] sm:$0xff]  ;;  %v4854_v14 = vld [vmem:[%s12913_s6 + $0x2f8] sm:$0xff] }
 0x489   : > { %v4590_v36 = vmax.f32 %v4582_v31, 0.0  ;;  %v9735_v20 = vadd.f32 %v8500_v47, %v11591_v44  ;;  %v4537_v17 = vpop.f32.mrb[3].mxu1  ;;  %v4788_v31 = vld [vmem:[%s12913_s6 + $0xe8] sm:$0xff]  ;;  %v4771_v47 = vld [vmem:[%s12913_s6 + $0x60] sm:$0xff] }
 0x48a   : > { %v4589_v0 = vmax.f32 %v4581_v38, 0.0  ;;  %v9736_v34 = vadd.f32 %v4537_v17, %v11593_v45  ;;  %v9453_v38 = vpack.c.bf16 %v4788_v31, %v4787_v41  ;;  %v4789_v17 = vld [vmem:[%s12913_s6 + $0xf0] sm:$0xff]  ;;  %v4819_v41 = vld [vmem:[%s12913_s6 + $0x1e0] sm:$0xff]  ;;  %v4820_v31 = vld [vmem:[%s12913_s6 + $0x1e8] sm:$0xff] }
 0x48b   : > { %v4584_v12 = vadd.f32 %v9735_v20, %v6274_v48 }
 0x48c   : > { %v4583_v22 = vadd.f32 %v9736_v34, %v6274_v48  ;;  %v8503_v13 = vpop.f32.mrb[4].mxu1  ;;  %v9413_v3 = vpack.c.bf16 %v4590_v36, %v4589_v0  ;;  %v4772_v36 = vld [vmem:[%s12913_s6 + $0x68] sm:$0xff]  ;;  %v4790_v0 = vld [vmem:[%s12913_s6 + $0xf8] sm:$0xff]  ;;  %v4773_v34 = vld [vmem:[%s12913_s6 + $0x70] sm:$0xff] }
 0x48d   : > { %v4592_v4 = vmax.f32 %v4584_v12, 0.0  ;;  %v9737_v53 = vadd.f32 %v8503_v13, %v11601_v5  ;;  %v4547_v8 = vpop.f32.mrb[5].mxu1  ;;  %v9455_v20 = vpack.c.bf16 %v4772_v36, %v4771_v47  ;;  %v9457_v12 = vpack.c.bf16 %v4790_v0, %v4789_v17  ;;  %v4803_v36 = vld [vmem:[%s12913_s6 + $0x160] sm:$0xff]  ;;  %v4821_v17 = vld [vmem:[%s12913_s6 + $0x1f0] sm:$0xff]  ;;  %v4822_v0 = vld [vmem:[%s12913_s6 + $0x1f8] sm:$0xff] }
 0x48e   : > { %v4591_v23 = vmax.f32 %v4583_v22, 0.0  ;;  %v9738_v52 = vadd.f32 %v4547_v8, %v11603_v2  ;;  %9414 = vmatprep.subr.bf16.mxu1 %v9413_v3  ;;  %v4774_v22 = vld [vmem:[%s12913_s6 + $0x78] sm:$0xff]  ;;  %v9485_v47 = vpack.c.bf16 %v4820_v31, %v4819_v41 }
 0x48f   : > { %v4586_v37 = vadd.f32 %v9737_v53, %v6274_v48  ;;  %9416 = vmatpush3.bf16.msra.mxu1 %v9413_v3  ;;  %v9459_v13 = vpack.c.bf16 %v4774_v22, %v4773_v34  ;;  %v4807_v3 = vld [vmem:[%s12913_s6 + $0x180] sm:$0xff]  ;;  %v4805_v22 = vld [vmem:[%s12913_s6 + $0x170] sm:$0xff] }
 0x490   : > { %v4585_v56 = vadd.f32 %v9738_v52, %v6274_v48  ;;  %v8506_v44 = vpop.f32.mrb[6].mxu1  ;;  %v9417_v32 = vpack.c.bf16 %v4592_v4, %v4591_v23  ;;  %v4808_v4 = vld [vmem:[%s12913_s6 + $0x188] sm:$0xff] }
 0x491   : > { %v4594_v40 = vmax.f32 %v4586_v37, 0.0  ;;  %v9739_v45 = vadd.f32 %v8506_v44, %v11611_v62  ;;  %v4557_v33 = vpop.f32.mrb[7].mxu1  ;;  %v4598_v62 = vld [vmem:[%s12912_s5 + $0x8] sm:$0xff]  ;;  %v9461_v53 = vpack.c.bf16 %v4808_v4, %v4807_v3  ;;  %v4839_v3 = vld [vmem:[%s12913_s6 + $0x280] sm:$0xff] }
 0x492   : > { %v4593_v7 = vmax.f32 %v4585_v56, 0.0  ;;  %v9740_v1 = vadd.f32 %v4557_v33, %v11613_v35  ;;  %9418 = vmatprep.subr.bf16.mxu1 %v9417_v32  ;;  %v4599_v35 = vld [vmem:[%s12912_s5 + $0x10] sm:$0xff]  ;;  %v4840_v4 = vld [vmem:[%s12913_s6 + $0x288] sm:$0xff] }
 0x493   : > { %v4588_v59 = vadd.f32 %v9739_v45, %v6274_v48  ;;  %9420 = vmatpush3.bf16.msra.mxu1 %v9417_v32 }
 0x494   : > { %v4587_v5 = vadd.f32 %v9740_v1, %v6274_v48  ;;  %v9421_v49 = vpack.c.bf16 %v4594_v40, %v4593_v7  ;;  %v4769_v48 = vld [vmem:[%s12913_s6 + $0x50] sm:$0xff] }
 0x495   : > { %v4596_v16 = vmax.f32 %v4588_v59, 0.0  ;;  %v9451_v28 = vpack.c.bf16 %v4770_v29, %v4769_v48  ;;  %v9481_v48 = vpack.c.bf16 %v4818_v57, %v4817_v54  ;;  %v4801_v29 = vld [vmem:[%s12913_s6 + $0x150] sm:$0xff]  ;;  %v9521_v57 = vpack.c.bf16 %v4854_v14, %v4853_v46 }
 0x496   : > { %v4595_v2 = vmax.f32 %v4587_v5, 0.0  ;;  %9422 = vmatprep.subr.bf16.mxu1 %v9421_v49 }
 0x497   : > { %9424 = vmatpush3.bf16.msra.mxu1 %v9421_v49  ;;  %9452 = vmatpush3.bf16.msra.mxu0 %v9451_v28  ;;  %v4791_v49 = vld [vmem:[%s12913_s6 + $0x100] sm:$0xff]  ;;  %v4802_v28 = vld [vmem:[%s12913_s6 + $0x158] sm:$0xff] }
 0x498   : > { %v9425_v60 = vpack.c.bf16 %v4596_v16, %v4595_v2  ;;  %9454 = vmatprep.subr.bf16.mxu0 %v9453_v38  ;;  %v4792_v16 = vld [vmem:[%s12913_s6 + $0x108] sm:$0xff]  ;;  %v4809_v2 = vld [vmem:[%s12913_s6 + $0x190] sm:$0xff]  ;;  %v9483_v38 = vpack.c.bf16 %v4802_v28, %v4801_v29  ;;  %v4871_v29 = vld [vmem:[%s12913_s6 + $0x380] sm:$0xff] }
 0x499   : > { %v4872_v28 = vld [vmem:[%s12913_s6 + $0x388] sm:$0xff] }
 0x49a   : > { %9426 = vmatprep.subr.bf16.mxu1 %v9425_v60  ;;  %v9525_v31 = vpack.c.bf16 %v4872_v28, %v4871_v29  ;;  %v4908_v29 = vld [vmem:[%s12913_s6 + $0x4a8] sm:$0xff] }
 0x49b   : > { %9428 = vmatpush3.bf16.msra.mxu1 %v9425_v60  ;;  %9456 = vmatpush3.bf16.msra.mxu0 %v9455_v20  ;;  %v4810_v60 = vld [vmem:[%s12913_s6 + $0x198] sm:$0xff]  ;;  %v4804_v20 = vld [vmem:[%s12913_s6 + $0x168] sm:$0xff] }
 0x49c   : > { %9458 = vmatprep.subr.bf16.mxu0 %v9457_v12  ;;  %v9487_v34 = vpack.c.bf16 %v4804_v20, %v4803_v36  ;;  %v9489_v12 = vpack.c.bf16 %v4822_v0, %v4821_v17  ;;  %v4873_v36 = vld [vmem:[%s12913_s6 + $0x390] sm:$0xff]  ;;  %v4874_v20 = vld [vmem:[%s12913_s6 + $0x398] sm:$0xff] }
 0x49d   : > { %v9529_v0 = vpack.c.bf16 %v4874_v20, %v4873_v36  ;;  %v4909_v36 = vld [vmem:[%s12913_s6 + $0x4b0] sm:$0xff]  ;;  %v4910_v20 = vld [vmem:[%s12913_s6 + $0x4b8] sm:$0xff] }
 0x49e   : > { %8524 = vmatmul.mubr.msk.f32.vlgmr.msra.gmra.mrb[8].mxu1 %vm4605_vm1, %v4598_v62  ;;  %v9463_v62 = vpack.c.bf16 %v4792_v16, %v4791_v49  ;;  %v4827_v16 = vld [vmem:[%s12913_s6 + $0x220] sm:$0xff] }
 0x49f   : > { %8526 = vmatprep.mubr.msk.f32.mxu1 %vm4605_vm1, %v4599_v35  ;;  %9460 = vmatpush3.bf16.msra.mxu0 %v9459_v13  ;;  %v4793_v35 = vld [vmem:[%s12913_s6 + $0x110] sm:$0xff]  ;;  %v4806_v13 = vld [vmem:[%s12913_s6 + $0x178] sm:$0xff] }
 0x4a0   : > { %9462 = vmatprep.subr.bf16.mxu0 %v9461_v53  ;;  %v9491_v53 = vpack.c.bf16 %v4806_v13, %v4805_v22  ;;  %v4875_v13 = vld [vmem:[%s12913_s6 + $0x3a0] sm:$0xff] }
 0x4a2   : > { %8527 = vmatmul.mubr.msk.f32.gmra.mrb[10].mxu1 %vm4605_vm1, %v4600_v21 }
 0x4a3   : > { %8529 = vmatprep.mubr.msk.f32.mxu1 %vm4605_vm1, %v4601_v15 }
 0x4a6   : > { %8530 = vmatmul.mubr.msk.f32.gmra.mrb[12].mxu1 %vm4605_vm1, %v4602_v6  ;;  %v9465_v6 = vpack.c.bf16 %v4810_v60, %v4809_v2  ;;  %v4828_v2 = vld [vmem:[%s12913_s6 + $0x228] sm:$0xff]  ;;  %v4845_v60 = vld [vmem:[%s12913_s6 + $0x2b0] sm:$0xff] }
 0x4a7   : > { %8532 = vmatprep.mubr.msk.f32.mxu1 %vm4605_vm1, %v4603_v43  ;;  %v4794_v43 = vld [vmem:[%s12913_s6 + $0x118] sm:$0xff] }
 0x4a8   : > { %v9467_v42 = vpack.c.bf16 %v4794_v43, %v4793_v35  ;;  %v9503_v35 = vpack.c.bf16 %v4828_v2, %v4827_v16  ;;  %v4847_v43 = vld [vmem:[%s12913_s6 + $0x2c0] sm:$0xff]  ;;  %v4881_v16 = vld [vmem:[%s12913_s6 + $0x3d0] sm:$0xff]  ;;  %v4882_v2 = vld [vmem:[%s12913_s6 + $0x3d8] sm:$0xff] }
 0x4aa   : > { %8533 = vmatmul.mubr.msk.f32.gmra.mrb[14].mxu1 %vm4605_vm1, %v4604_v51  ;;  %v4811_v51 = vld [vmem:[%s12913_s6 + $0x1a0] sm:$0xff] }
 0x4ab   : > { %v9469_v11 = vpack.c.bf16 %v4812_v39, %v4811_v51  ;;  %v4848_v51 = vld [vmem:[%s12913_s6 + $0x2c8] sm:$0xff] }
 0x571   : > { %v8525_v8 = vpop.f32.mrb[8].mxu1 }
 0x572   : > { %v4696_v23 = vpop.f32.mrb[9].mxu1 }
 0x575   : > { %v8528_v52 = vpop.f32.mrb[10].mxu1 }
 0x576   : > { %v4736_v37 = vmax.f32 %v8525_v8, %v8528_v52  ;;  %v4706_v56 = vpop.f32.mrb[11].mxu1  ;;  %v9493_v8 = vpack.c.bf16 %v4840_v4, %v4839_v3  ;;  %v4824_v52 = vld [vmem:[%s12913_s6 + $0x208] sm:$0xff] }
 0x577   : > { %v4735_v44 = vmax.f32 %v4696_v23, %v4706_v56  ;;  %v4823_v23 = vld [vmem:[%s12913_s6 + $0x200] sm:$0xff]  ;;  %v4842_v56 = vld [vmem:[%s12913_s6 + $0x298] sm:$0xff]  ;;  %v4876_v3 = vld [vmem:[%s12913_s6 + $0x3a8] sm:$0xff] }
 0x579   : > { %v8531_v32 = vpop.f32.mrb[12].mxu1 }
 0x57a   : > { %v4716_v40 = vpop.f32.mrb[13].mxu1 }
 0x57d   : > { %v8534_v45 = vpop.f32.mrb[14].mxu1 }
 0x57e   : > { %v4738_v33 = vmax.f32 %v8531_v32, %v8534_v45  ;;  %v4726_v7 = vpop.f32.mrb[15].mxu1  ;;  %v4826_v45 = vld [vmem:[%s12913_s6 + $0x218] sm:$0xff] }
 0x57f   : > { %v4737_v1 = vmax.f32 %v4716_v40, %v4726_v7  ;;  %v4825_v40 = vld [vmem:[%s12913_s6 + $0x210] sm:$0xff]  ;;  %v4843_v7 = vld [vmem:[%s12913_s6 + $0x2a0] sm:$0xff] }
 0x580   : > { %v4740_v59 = vmax.f32 %v4736_v37, %v4738_v33  ;;  %v4841_v37 = vld [vmem:[%s12913_s6 + $0x290] sm:$0xff] }
 0x581   : > { %v4739_v5 = vmax.f32 %v4735_v44, %v4737_v1  ;;  %v9495_v44 = vpack.c.bf16 %v4824_v52, %v4823_v23  ;;  %v9497_v32 = vpack.c.bf16 %v4842_v56, %v4841_v37  ;;  %v4844_v1 = vld [vmem:[%s12913_s6 + $0x2a8] sm:$0xff]  ;;  %v4859_v23 = vld [vmem:[%s12913_s6 + $0x320] sm:$0xff]  ;;  %v4877_v37 = vld [vmem:[%s12913_s6 + $0x3b0] sm:$0xff] }
 0x582   : > { %4742 = vst [vmem:[#allocation3 + $0x8] sm:$0xff] %v4740_v59  ;;  %v9501_v49 = vpack.c.bf16 %v4844_v1, %v4843_v7  ;;  %v4860_v52 = vld [vmem:[%s12913_s6 + $0x328] sm:$0xff]  ;;  %v4878_v56 = vld [vmem:[%s12913_s6 + $0x3b8] sm:$0xff] }
 0x583   : > { %4741 = vst [vmem:[#allocation3] sm:$0xff] %v4739_v5  ;;  %v9499_v5 = vpack.c.bf16 %v4826_v45, %v4825_v40  ;;  %v4861_v40 = vld [vmem:[%s12913_s6 + $0x330] sm:$0xff]  ;;  %v4862_v45 = vld [vmem:[%s12913_s6 + $0x338] sm:$0xff]  ;;  %v4880_v7 = vld [vmem:[%s12913_s6 + $0x3c8] sm:$0xff] }
 0x584   : > { %v9539_v1 = vpack.c.bf16 %v4862_v45, %v4861_v40  ;;  %v4915_v40 = vld [vmem:[%s12913_s6 + $0x4e0] sm:$0xff]  ;;  %v4916_v45 = vld [vmem:[%s12913_s6 + $0x4e8] sm:$0xff] }
 0x589   : > { %v4752_v28 = vld [vmem:[#allocation3 + $0x9] sm:$0x1] }
 0x58a   : > { %v4744_v21 = vld [vmem:[#allocation3 + $0x1] sm:$0x1]  ;;  %v4743_v15 = vld [vmem:[#allocation3] sm:$0x1]  ;;  %v4746_v26 = vld [vmem:[#allocation3 + $0x3] sm:$0x1] }
 0x58b   : > { %5080 = vmatprep.mubr.f32.mxu0 %v4744_v21  ;;  %v4745_v33 = vld [vmem:[#allocation3 + $0x2] sm:$0x1]  ;;  %v4748_v59 = vld [vmem:[#allocation3 + $0x5] sm:$0x1]  ;;  %v4747_v22 = vld [vmem:[#allocation3 + $0x4] sm:$0x1] }
 0x58c   : > { %5081 = vmatmul.mubr.f32.vlgmr.msra.gmra.mrb[80].mxu0 %v4743_v15  ;;  %v4829_v15 = vld [vmem:[%s12913_s6 + $0x230] sm:$0xff] }
 0x58d   : > { %9464 = vmatpush3.bf16.msra.mxu0 %v9463_v62  ;;  %5150 = vmatprep.mubr.f32.mxu0 %v4746_v26  ;;  %v4846_v62 = vld [vmem:[%s12913_s6 + $0x2b8] sm:$0xff]  ;;  %v9509_v26 = vpack.c.bf16 %v4848_v51, %v4847_v43  ;;  %v4750_v4 = vld [vmem:[#allocation3 + $0x7] sm:$0x1] }
 0x58e   : > { %9466 = vmatprep.subr.bf16.mxu0 %v9465_v6  ;;  %v9505_v21 = vpack.c.bf16 %v4846_v62, %v4845_v60  ;;  %v4830_v6 = vld [vmem:[%s12913_s6 + $0x238] sm:$0xff]  ;;  %v9545_v62 = vpack.c.bf16 %v4882_v2, %v4881_v16 }
 0x58f   : > { %v9507_v39 = vpack.c.bf16 %v4830_v6, %v4829_v15  ;;  %v4883_v15 = vld [vmem:[%s12913_s6 + $0x3e0] sm:$0xff]  ;;  %v4884_v6 = vld [vmem:[%s12913_s6 + $0x3e8] sm:$0xff] }
 0x590   : > { %v9549_v51 = vpack.c.bf16 %v4884_v6, %v4883_v15 }
 0x591   : > { %9468 = vmatpush3.bf16.msra.mxu0 %v9467_v42  ;;  %v4831_v42 = vld [vmem:[%s12913_s6 + $0x240] sm:$0xff] }
 0x592   : > { %9470 = vmatprep.subr.bf16.mxu0 %v9469_v11  ;;  %v4832_v11 = vld [vmem:[%s12913_s6 + $0x248] sm:$0xff] }
 0x593   : > { %v9511_v19 = vpack.c.bf16 %v4832_v11, %v4831_v42  ;;  %v4885_v42 = vld [vmem:[%s12913_s6 + $0x3f0] sm:$0xff]  ;;  %v4886_v11 = vld [vmem:[%s12913_s6 + $0x3f8] sm:$0xff] }
 0x594   : > { %v9553_v9 = vpack.c.bf16 %v4886_v11, %v4885_v42 }
 0x595   : > { %9472 = vmatpush3.bf16.msra.mxu0 %v9471_v24  ;;  %v4833_v24 = vld [vmem:[%s12913_s6 + $0x250] sm:$0xff] }
 0x596   : > { %9474 = vmatprep.subr.bf16.mxu0 %v9473_v63  ;;  %v4834_v63 = vld [vmem:[%s12913_s6 + $0x258] sm:$0xff] }
 0x597   : > { %v9515_v27 = vpack.c.bf16 %v4834_v63, %v4833_v24  ;;  %v4903_v24 = vld [vmem:[%s12913_s6 + $0x480] sm:$0xff]  ;;  %v4904_v63 = vld [vmem:[%s12913_s6 + $0x488] sm:$0xff] }
 0x598   : > { %v9557_v30 = vpack.c.bf16 %v4904_v63, %v4903_v24  ;;  %v4940_v24 = vld [vmem:[%s12913_s6 + $0x5a8] sm:$0xff]  ;;  %v4754_v63 = vld [vmem:[#allocation3 + $0xb] sm:$0x1] }
 0x599   : > { %9476 = vmatpush3.bf16.msra.mxu0 %v9475_v61  ;;  %v4835_v61 = vld [vmem:[%s12913_s6 + $0x260] sm:$0xff] }
 0x59a   : > { %9478 = vmatprep.subr.bf16.mxu0 %v9477_v55  ;;  %v4836_v55 = vld [vmem:[%s12913_s6 + $0x268] sm:$0xff] }
 0x59b   : > { %v9519_v54 = vpack.c.bf16 %v4836_v55, %v4835_v61  ;;  %v4905_v61 = vld [vmem:[%s12913_s6 + $0x490] sm:$0xff]  ;;  %v4906_v55 = vld [vmem:[%s12913_s6 + $0x498] sm:$0xff] }
 0x59c   : > { %v9561_v14 = vpack.c.bf16 %v4906_v55, %v4905_v61  ;;  %v4941_v61 = vld [vmem:[%s12913_s6 + $0x5b0] sm:$0xff]  ;;  %v4942_v55 = vld [vmem:[%s12913_s6 + $0x5b8] sm:$0xff] }
 0x59d   : > { %9480 = vmatpush3.bf16.msra.mxu0 %v9479_v18  ;;  %v4837_v18 = vld [vmem:[%s12913_s6 + $0x270] sm:$0xff] }
 0x59e   : > { %9482 = vmatprep.subr.bf16.mxu0 %v9481_v48  ;;  %v4838_v48 = vld [vmem:[%s12913_s6 + $0x278] sm:$0xff] }
 0x59f   : > { %v9523_v41 = vpack.c.bf16 %v4838_v48, %v4837_v18  ;;  %v4749_v18 = vld [vmem:[#allocation3 + $0x6] sm:$0x1]  ;;  %v4907_v48 = vld [vmem:[%s12913_s6 + $0x4a0] sm:$0xff] }
 0x5a1   : > { %9484 = vmatpush3.bf16.msra.mxu0 %v9483_v38  ;;  %v4855_v38 = vld [vmem:[%s12913_s6 + $0x300] sm:$0xff] }
 0x5a2   : > { %9486 = vmatprep.subr.bf16.mxu0 %v9485_v47  ;;  %v4856_v47 = vld [vmem:[%s12913_s6 + $0x308] sm:$0xff] }
 0x5a3   : > { %v9527_v17 = vpack.c.bf16 %v4856_v47, %v4855_v38  ;;  %v4891_v38 = vld [vmem:[%s12913_s6 + $0x420] sm:$0xff]  ;;  %v4892_v47 = vld [vmem:[%s12913_s6 + $0x428] sm:$0xff] }
 0x5a5   : > { %9488 = vmatpush3.bf16.msra.mxu0 %v9487_v34  ;;  %v4857_v34 = vld [vmem:[%s12913_s6 + $0x310] sm:$0xff] }
 0x5a6   : > { %9490 = vmatprep.subr.bf16.mxu0 %v9489_v12  ;;  %v4858_v12 = vld [vmem:[%s12913_s6 + $0x318] sm:$0xff] }
 0x5a9   : > { %9492 = vmatpush3.bf16.msra.mxu0 %v9491_v53  ;;  %v9531_v53 = vpack.c.bf16 %v4858_v12, %v4857_v34  ;;  %v4893_v34 = vld [vmem:[%s12913_s6 + $0x430] sm:$0xff]  ;;  %v4894_v12 = vld [vmem:[%s12913_s6 + $0x438] sm:$0xff] }
 0x5aa   : > { %9494 = vmatprep.subr.bf16.mxu0 %v9493_v8  ;;  %v9533_v8 = vpack.c.bf16 %v4876_v3, %v4875_v13  ;;  %v4912_v13 = vld [vmem:[%s12913_s6 + $0x4c8] sm:$0xff]  ;;  %v9571_v3 = vpack.c.bf16 %v4894_v12, %v4893_v34  ;;  %v4947_v34 = vld [vmem:[%s12913_s6 + $0x5e0] sm:$0xff] }
 0x5ab   : > { %v4948_v12 = vld [vmem:[%s12913_s6 + $0x5e8] sm:$0xff] }
 0x5ac   : > { %5151 = vmatmul.mubr.f32.vlgmr.msra.gmra.mrb[82].mxu0 %v4745_v33  ;;  %v4879_v33 = vld [vmem:[%s12913_s6 + $0x3c0] sm:$0xff] }
 0x5ad   : > { %9496 = vmatpush3.bf16.msra.mxu0 %v9495_v44  ;;  %5220 = vmatprep.mubr.f32.mxu0 %v4748_v59  ;;  %v9535_v44 = vpack.c.bf16 %v4860_v52, %v4859_v23  ;;  %v9541_v59 = vpack.c.bf16 %v4880_v7, %v4879_v33  ;;  %v4913_v23 = vld [vmem:[%s12913_s6 + $0x4d0] sm:$0xff]  ;;  %v4914_v52 = vld [vmem:[%s12913_s6 + $0x4d8] sm:$0xff]  ;;  %v9581_v7 = vpack.c.bf16 %v4916_v45, %v4915_v40 }
 0x5ae   : > { %9498 = vmatprep.subr.bf16.mxu0 %v9497_v32  ;;  %v9537_v32 = vpack.c.bf16 %v4878_v56, %v4877_v37  ;;  %v9577_v56 = vpack.c.bf16 %v4914_v52, %v4913_v23 }
 0x5b1   : > { %9500 = vmatpush3.bf16.msra.mxu0 %v9499_v5  ;;  %v4863_v5 = vld [vmem:[%s12913_s6 + $0x340] sm:$0xff] }
 0x5b2   : > { %9502 = vmatprep.subr.bf16.mxu0 %v9501_v49  ;;  %v4864_v49 = vld [vmem:[%s12913_s6 + $0x348] sm:$0xff] }
 0x5b3   : > { %v9543_v60 = vpack.c.bf16 %v4864_v49, %v4863_v5  ;;  %v4917_v5 = vld [vmem:[%s12913_s6 + $0x4f0] sm:$0xff]  ;;  %v4918_v49 = vld [vmem:[%s12913_s6 + $0x4f8] sm:$0xff] }
 0x5b4   : > { %v9585_v2 = vpack.c.bf16 %v4918_v49, %v4917_v5 }
 0x5b5   : > { %9504 = vmatpush3.bf16.msra.mxu0 %v9503_v35  ;;  %v4865_v35 = vld [vmem:[%s12913_s6 + $0x350] sm:$0xff] }
 0x5b6   : > { %9506 = vmatprep.subr.bf16.mxu0 %v9505_v21  ;;  %v4866_v21 = vld [vmem:[%s12913_s6 + $0x358] sm:$0xff] }
 0x5b7   : > { %v9547_v43 = vpack.c.bf16 %v4866_v21, %v4865_v35  ;;  %v4935_v35 = vld [vmem:[%s12913_s6 + $0x580] sm:$0xff]  ;;  %v4936_v21 = vld [vmem:[%s12913_s6 + $0x588] sm:$0xff] }
 0x5b8   : > { %v9589_v6 = vpack.c.bf16 %v4936_v21, %v4935_v35  ;;  %v4972_v35 = vld [vmem:[%s12913_s6 + $0x6a8] sm:$0xff]  ;;  %v4756_v21 = vld [vmem:[#allocation3 + $0xd] sm:$0x1] }
 0x5b9   : > { %9508 = vmatpush3.bf16.msra.mxu0 %v9507_v39  ;;  %v4867_v39 = vld [vmem:[%s12913_s6 + $0x360] sm:$0xff] }
 0x5ba   : > { %9510 = vmatprep.subr.bf16.mxu0 %v9509_v26  ;;  %v4868_v26 = vld [vmem:[%s12913_s6 + $0x368] sm:$0xff] }
 0x5bb   : > { %v9551_v25 = vpack.c.bf16 %v4868_v26, %v4867_v39  ;;  %v4937_v39 = vld [vmem:[%s12913_s6 + $0x590] sm:$0xff]  ;;  %v4938_v26 = vld [vmem:[%s12913_s6 + $0x598] sm:$0xff] }
 0x5bc   : > { %v9593_v11 = vpack.c.bf16 %v4938_v26, %v4937_v39  ;;  %v4973_v39 = vld [vmem:[%s12913_s6 + $0x6b0] sm:$0xff]  ;;  %v4974_v26 = vld [vmem:[%s12913_s6 + $0x6b8] sm:$0xff] }
 0x5bd   : > { %9512 = vmatpush3.bf16.msra.mxu0 %v9511_v19  ;;  %v4869_v19 = vld [vmem:[%s12913_s6 + $0x370] sm:$0xff] }
 0x5be   : > { %9514 = vmatprep.subr.bf16.mxu0 %v9513_v10  ;;  %v4870_v10 = vld [vmem:[%s12913_s6 + $0x378] sm:$0xff] }
 0x5bf   : > { %v9555_v58 = vpack.c.bf16 %v4870_v10, %v4869_v19  ;;  %v4751_v19 = vld [vmem:[#allocation3 + $0x8] sm:$0x1]  ;;  %v4939_v10 = vld [vmem:[%s12913_s6 + $0x5a0] sm:$0xff] }
 0x5c1   : > { %9516 = vmatpush3.bf16.msra.mxu0 %v9515_v27  ;;  %v4887_v27 = vld [vmem:[%s12913_s6 + $0x400] sm:$0xff] }
 0x5c2   : > { %9518 = vmatprep.subr.bf16.mxu0 %v9517_v50  ;;  %v4888_v50 = vld [vmem:[%s12913_s6 + $0x408] sm:$0xff] }
 0x5c3   : > { %v9559_v46 = vpack.c.bf16 %v4888_v50, %v4887_v27  ;;  %v4923_v27 = vld [vmem:[%s12913_s6 + $0x520] sm:$0xff]  ;;  %v4924_v50 = vld [vmem:[%s12913_s6 + $0x528] sm:$0xff] }
 0x5c5   : > { %9520 = vmatpush3.bf16.msra.mxu0 %v9519_v54  ;;  %v4889_v54 = vld [vmem:[%s12913_s6 + $0x410] sm:$0xff] }
 0x5c6   : > { %9522 = vmatprep.subr.bf16.mxu0 %v9521_v57  ;;  %v4890_v57 = vld [vmem:[%s12913_s6 + $0x418] sm:$0xff] }
 0x5c9   : > { %9524 = vmatpush3.bf16.msra.mxu0 %v9523_v41  ;;  %v9563_v41 = vpack.c.bf16 %v4890_v57, %v4889_v54  ;;  %v4925_v54 = vld [vmem:[%s12913_s6 + $0x530] sm:$0xff]  ;;  %v4926_v57 = vld [vmem:[%s12913_s6 + $0x538] sm:$0xff] }
 0x5ca   : > { %9526 = vmatprep.subr.bf16.mxu0 %v9525_v31  ;;  %v9565_v31 = vpack.c.bf16 %v4908_v29, %v4907_v48  ;;  %v4944_v48 = vld [vmem:[%s12913_s6 + $0x5c8] sm:$0xff]  ;;  %v9603_v29 = vpack.c.bf16 %v4926_v57, %v4925_v54  ;;  %v4979_v54 = vld [vmem:[%s12913_s6 + $0x6e0] sm:$0xff] }
 0x5cb   : > { %v4980_v57 = vld [vmem:[%s12913_s6 + $0x6e8] sm:$0xff] }
 0x5cc   : > { %5221 = vmatmul.mubr.f32.vlgmr.msra.gmra.mrb[84].mxu0 %v4747_v22  ;;  %v4911_v22 = vld [vmem:[%s12913_s6 + $0x4c0] sm:$0xff] }
 0x5cd   : > { %9528 = vmatpush3.bf16.msra.mxu0 %v9527_v17  ;;  %5290 = vmatprep.mubr.f32.mxu0 %v4750_v4  ;;  %v9567_v17 = vpack.c.bf16 %v4892_v47, %v4891_v38  ;;  %v9573_v4 = vpack.c.bf16 %v4912_v13, %v4911_v22  ;;  %v4945_v38 = vld [vmem:[%s12913_s6 + $0x5d0] sm:$0xff]  ;;  %v4946_v47 = vld [vmem:[%s12913_s6 + $0x5d8] sm:$0xff]  ;;  %v9613_v13 = vpack.c.bf16 %v4948_v12, %v4947_v34 }
 0x5ce   : > { %9530 = vmatprep.subr.bf16.mxu0 %v9529_v0  ;;  %v9569_v0 = vpack.c.bf16 %v4910_v20, %v4909_v36  ;;  %v9609_v20 = vpack.c.bf16 %v4946_v47, %v4945_v38 }
 0x5d1   : > { %9532 = vmatpush3.bf16.msra.mxu0 %v9531_v53  ;;  %v4895_v53 = vld [vmem:[%s12913_s6 + $0x440] sm:$0xff] }
 0x5d2   : > { %9534 = vmatprep.subr.bf16.mxu0 %v9533_v8  ;;  %v4896_v8 = vld [vmem:[%s12913_s6 + $0x448] sm:$0xff] }
 0x5d3   : > { %v9575_v37 = vpack.c.bf16 %v4896_v8, %v4895_v53  ;;  %v4949_v53 = vld [vmem:[%s12913_s6 + $0x5f0] sm:$0xff]  ;;  %v4950_v8 = vld [vmem:[%s12913_s6 + $0x5f8] sm:$0xff] }
 0x5d4   : > { %v9617_v52 = vpack.c.bf16 %v4950_v8, %v4949_v53 }
 0x5d5   : > { %9536 = vmatpush3.bf16.msra.mxu0 %v9535_v44  ;;  %v4897_v44 = vld [vmem:[%s12913_s6 + $0x450] sm:$0xff] }
 0x5d6   : > { %9538 = vmatprep.subr.bf16.mxu0 %v9537_v32  ;;  %v4898_v32 = vld [vmem:[%s12913_s6 + $0x458] sm:$0xff] }
 0x5d7   : > { %v9579_v33 = vpack.c.bf16 %v4898_v32, %v4897_v44  ;;  %v4967_v44 = vld [vmem:[%s12913_s6 + $0x680] sm:$0xff]  ;;  %v4968_v32 = vld [vmem:[%s12913_s6 + $0x688] sm:$0xff] }
 0x5d8   : > { %v9621_v45 = vpack.c.bf16 %v4968_v32, %v4967_v44  ;;  %v5004_v44 = vld [vmem:[%s12913_s6 + $0x7a8] sm:$0xff]  ;;  %v4758_v32 = vld [vmem:[#allocation3 + $0xf] sm:$0x1] }
 0x5d9   : > { %9540 = vmatpush3.bf16.msra.mxu0 %v9539_v1  ;;  %v4899_v1 = vld [vmem:[%s12913_s6 + $0x460] sm:$0xff] }
 0x5da   : > { %9542 = vmatprep.subr.bf16.mxu0 %v9541_v59  ;;  %v4900_v59 = vld [vmem:[%s12913_s6 + $0x468] sm:$0xff] }
 0x5db   : > { %v9583_v16 = vpack.c.bf16 %v4900_v59, %v4899_v1  ;;  %v4969_v1 = vld [vmem:[%s12913_s6 + $0x690] sm:$0xff]  ;;  %v4970_v59 = vld [vmem:[%s12913_s6 + $0x698] sm:$0xff] }
 0x5dc   : > { %v9625_v49 = vpack.c.bf16 %v4970_v59, %v4969_v1  ;;  %v5005_v1 = vld [vmem:[%s12913_s6 + $0x7b0] sm:$0xff]  ;;  %v5006_v59 = vld [vmem:[%s12913_s6 + $0x7b8] sm:$0xff] }
 0x5dd   : > { %9544 = vmatpush3.bf16.msra.mxu0 %v9543_v60  ;;  %v4901_v60 = vld [vmem:[%s12913_s6 + $0x470] sm:$0xff] }
 0x5de   : > { %9546 = vmatprep.subr.bf16.mxu0 %v9545_v62  ;;  %v4902_v62 = vld [vmem:[%s12913_s6 + $0x478] sm:$0xff] }
 0x5df   : > { %v9587_v15 = vpack.c.bf16 %v4902_v62, %v4901_v60  ;;  %v4753_v60 = vld [vmem:[#allocation3 + $0xa] sm:$0x1]  ;;  %v4971_v62 = vld [vmem:[%s12913_s6 + $0x6a0] sm:$0xff] }
 0x5e1   : > { %9548 = vmatpush3.bf16.msra.mxu0 %v9547_v43  ;;  %v4919_v43 = vld [vmem:[%s12913_s6 + $0x500] sm:$0xff] }
 0x5e2   : > { %9550 = vmatprep.subr.bf16.mxu0 %v9549_v51  ;;  %v4920_v51 = vld [vmem:[%s12913_s6 + $0x508] sm:$0xff] }
 0x5e3   : > { %v9591_v42 = vpack.c.bf16 %v4920_v51, %v4919_v43  ;;  %v4955_v43 = vld [vmem:[%s12913_s6 + $0x620] sm:$0xff]  ;;  %v4956_v51 = vld [vmem:[%s12913_s6 + $0x628] sm:$0xff] }
 0x5e5   : > { %9552 = vmatpush3.bf16.msra.mxu0 %v9551_v25  ;;  %v4921_v25 = vld [vmem:[%s12913_s6 + $0x510] sm:$0xff] }
 0x5e6   : > { %9554 = vmatprep.subr.bf16.mxu0 %v9553_v9  ;;  %v4922_v9 = vld [vmem:[%s12913_s6 + $0x518] sm:$0xff] }
 0x5e9   : > { %9556 = vmatpush3.bf16.msra.mxu0 %v9555_v58  ;;  %v9595_v58 = vpack.c.bf16 %v4922_v9, %v4921_v25  ;;  %v4957_v25 = vld [vmem:[%s12913_s6 + $0x630] sm:$0xff]  ;;  %v4958_v9 = vld [vmem:[%s12913_s6 + $0x638] sm:$0xff] }
 0x5ea   : > { %9558 = vmatprep.subr.bf16.mxu0 %v9557_v30  ;;  %v9597_v30 = vpack.c.bf16 %v4940_v24, %v4939_v10  ;;  %v4976_v10 = vld [vmem:[%s12913_s6 + $0x6c8] sm:$0xff]  ;;  %v9635_v24 = vpack.c.bf16 %v4958_v9, %v4957_v25  ;;  %v5011_v25 = vld [vmem:[%s12913_s6 + $0x7e0] sm:$0xff] }
 0x5eb   : > { %v5012_v9 = vld [vmem:[%s12913_s6 + $0x7e8] sm:$0xff] }
 0x5ec   : > { %5291 = vmatmul.mubr.f32.vlgmr.msra.gmra.mrb[86].mxu0 %v4749_v18  ;;  %v4943_v18 = vld [vmem:[%s12913_s6 + $0x5c0] sm:$0xff] }
 0x5ed   : > { %9560 = vmatpush3.bf16.msra.mxu0 %v9559_v46  ;;  %5360 = vmatprep.mubr.f32.mxu0 %v4752_v28  ;;  %v9599_v46 = vpack.c.bf16 %v4924_v50, %v4923_v27  ;;  %v9605_v28 = vpack.c.bf16 %v4944_v48, %v4943_v18  ;;  %v4977_v27 = vld [vmem:[%s12913_s6 + $0x6d0] sm:$0xff]  ;;  %v4978_v50 = vld [vmem:[%s12913_s6 + $0x6d8] sm:$0xff]  ;;  %v9645_v48 = vpack.c.bf16 %v4980_v57, %v4979_v54 }
 0x5ee   : > { %9562 = vmatprep.subr.bf16.mxu0 %v9561_v14  ;;  %v9601_v14 = vpack.c.bf16 %v4942_v55, %v4941_v61  ;;  %v9641_v55 = vpack.c.bf16 %v4978_v50, %v4977_v27  ;;  %v5014_v27 = vld [vmem:[%s12913_s6 + $0x7f8] sm:$0xff] }
 0x5ef   : > { %v4998_v54 = vld [vmem:[%s12913_s6 + $0x778] sm:$0xff] }
 0x5f1   : > { %9564 = vmatpush3.bf16.msra.mxu0 %v9563_v41  ;;  %v4927_v41 = vld [vmem:[%s12913_s6 + $0x540] sm:$0xff] }
 0x5f2   : > { %9566 = vmatprep.subr.bf16.mxu0 %v9565_v31  ;;  %v4928_v31 = vld [vmem:[%s12913_s6 + $0x548] sm:$0xff] }
 0x5f3   : > { %v9607_v36 = vpack.c.bf16 %v4928_v31, %v4927_v41  ;;  %v4981_v41 = vld [vmem:[%s12913_s6 + $0x6f0] sm:$0xff]  ;;  %v4982_v31 = vld [vmem:[%s12913_s6 + $0x6f8] sm:$0xff] }
 0x5f4   : > { %v9649_v47 = vpack.c.bf16 %v4982_v31, %v4981_v41 }
 0x5f5   : > { %9568 = vmatpush3.bf16.msra.mxu0 %v9567_v17  ;;  %v4929_v17 = vld [vmem:[%s12913_s6 + $0x550] sm:$0xff] }
 0x5f6   : > { %9570 = vmatprep.subr.bf16.mxu0 %v9569_v0  ;;  %v4930_v0 = vld [vmem:[%s12913_s6 + $0x558] sm:$0xff] }
 0x5f7   : > { %v9611_v22 = vpack.c.bf16 %v4930_v0, %v4929_v17  ;;  %v4999_v17 = vld [vmem:[%s12913_s6 + $0x780] sm:$0xff]  ;;  %v5000_v0 = vld [vmem:[%s12913_s6 + $0x788] sm:$0xff] }
 0x5f8   : > { %v9653_v12 = vpack.c.bf16 %v5000_v0, %v4999_v17  ;;  %v5577_v0 = vld [vmem:[%s12915_s8] sm:$0xff] }
 0x5f9   : > { %9572 = vmatpush3.bf16.msra.mxu0 %v9571_v3  ;;  %v4931_v3 = vld [vmem:[%s12913_s6 + $0x560] sm:$0xff] }
 0x5fa   : > { %9574 = vmatprep.subr.bf16.mxu0 %v9573_v4  ;;  %v4932_v4 = vld [vmem:[%s12913_s6 + $0x568] sm:$0xff] }
 0x5fb   : > { %v9615_v23 = vpack.c.bf16 %v4932_v4, %v4931_v3  ;;  %v5001_v3 = vld [vmem:[%s12913_s6 + $0x790] sm:$0xff]  ;;  %v5002_v4 = vld [vmem:[%s12913_s6 + $0x798] sm:$0xff] }
 0x5fc   : > { %v9657_v8 = vpack.c.bf16 %v5002_v4, %v5001_v3  ;;  %v5580_v3 = vld [vmem:[%s12915_s8 + $0x18] sm:$0xff] }
 0x5fd   : > { %9576 = vmatpush3.bf16.msra.mxu0 %v9575_v37  ;;  %v4933_v37 = vld [vmem:[%s12913_s6 + $0x570] sm:$0xff] }
 0x5fe   : > { %9578 = vmatprep.subr.bf16.mxu0 %v9577_v56  ;;  %v4934_v56 = vld [vmem:[%s12913_s6 + $0x578] sm:$0xff] }
 0x5ff   : > { %v9619_v40 = vpack.c.bf16 %v4934_v56, %v4933_v37  ;;  %v4755_v37 = vld [vmem:[#allocation3 + $0xc] sm:$0x1]  ;;  %v5003_v56 = vld [vmem:[%s12913_s6 + $0x7a0] sm:$0xff] }
 0x601   : > { %9580 = vmatpush3.bf16.msra.mxu0 %v9579_v33  ;;  %v4951_v33 = vld [vmem:[%s12913_s6 + $0x600] sm:$0xff] }
 0x602   : > { %9582 = vmatprep.subr.bf16.mxu0 %v9581_v7  ;;  %v4952_v7 = vld [vmem:[%s12913_s6 + $0x608] sm:$0xff] }
 0x603   : > { %v9623_v5 = vpack.c.bf16 %v4952_v7, %v4951_v33  ;;  %v4987_v33 = vld [vmem:[%s12913_s6 + $0x720] sm:$0xff]  ;;  %v4988_v7 = vld [vmem:[%s12913_s6 + $0x728] sm:$0xff] }
 0x605   : > { %9584 = vmatpush3.bf16.msra.mxu0 %v9583_v16  ;;  %v4953_v16 = vld [vmem:[%s12913_s6 + $0x610] sm:$0xff] }
 0x606   : > { %9586 = vmatprep.subr.bf16.mxu0 %v9585_v2  ;;  %v4954_v2 = vld [vmem:[%s12913_s6 + $0x618] sm:$0xff] }
 0x609   : > { %9588 = vmatpush3.bf16.msra.mxu0 %v9587_v15  ;;  %v9627_v15 = vpack.c.bf16 %v4954_v2, %v4953_v16  ;;  %v4989_v16 = vld [vmem:[%s12913_s6 + $0x730] sm:$0xff]  ;;  %v4990_v2 = vld [vmem:[%s12913_s6 + $0x738] sm:$0xff] }
 0x60a   : > { %9590 = vmatprep.subr.bf16.mxu0 %v9589_v6  ;;  %v9629_v6 = vpack.c.bf16 %v4972_v35, %v4971_v62  ;;  %v5008_v62 = vld [vmem:[%s12913_s6 + $0x7c8] sm:$0xff]  ;;  %v9667_v35 = vpack.c.bf16 %v4990_v2, %v4989_v16  ;;  %v5589_v16 = vld [vmem:[%s12915_s8 + $0x60] sm:$0xff] }
 0x60b   : > { %v5590_v2 = vld [vmem:[%s12915_s8 + $0x68] sm:$0xff] }
 0x60c   : > { %5361 = vmatmul.mubr.f32.vlgmr.msra.gmra.mrb[88].mxu0 %v4751_v19  ;;  %v4975_v19 = vld [vmem:[%s12913_s6 + $0x6c0] sm:$0xff] }
 0x60d   : > { %9592 = vmatpush3.bf16.msra.mxu0 %v9591_v42  ;;  %5430 = vmatprep.mubr.f32.mxu0 %v4754_v63  ;;  %v9631_v42 = vpack.c.bf16 %v4956_v51, %v4955_v43  ;;  %v9637_v63 = vpack.c.bf16 %v4976_v10, %v4975_v19  ;;  %v5009_v43 = vld [vmem:[%s12913_s6 + $0x7d0] sm:$0xff]  ;;  %v5010_v51 = vld [vmem:[%s12913_s6 + $0x7d8] sm:$0xff]  ;;  %v9677_v10 = vpack.c.bf16 %v5012_v9, %v5011_v25 }
 0x60e   : > { %9594 = vmatprep.subr.bf16.mxu0 %v9593_v11  ;;  %v9633_v11 = vpack.c.bf16 %v4974_v26, %v4973_v39  ;;  %v9673_v26 = vpack.c.bf16 %v5010_v51, %v5009_v43 }
 0x611   : > { %9596 = vmatpush3.bf16.msra.mxu0 %v9595_v58  ;;  %v4959_v58 = vld [vmem:[%s12913_s6 + $0x640] sm:$0xff] }
 0x612   : > { %9598 = vmatprep.subr.bf16.mxu0 %v9597_v30  ;;  %v4960_v30 = vld [vmem:[%s12913_s6 + $0x648] sm:$0xff] }
 0x613   : > { %v9639_v61 = vpack.c.bf16 %v4960_v30, %v4959_v58  ;;  %v5013_v30 = vld [vmem:[%s12913_s6 + $0x7f0] sm:$0xff] }
 0x615   : > { %9600 = vmatpush3.bf16.msra.mxu0 %v9599_v46  ;;  %v4961_v46 = vld [vmem:[%s12913_s6 + $0x650] sm:$0xff] }
 0x616   : > { %9602 = vmatprep.subr.bf16.mxu0 %v9601_v14  ;;  %v4962_v14 = vld [vmem:[%s12913_s6 + $0x658] sm:$0xff] }
 0x617   : > { %v9643_v18 = vpack.c.bf16 %v4962_v14, %v4961_v46  ;;  %v9681_v46 = vpack.c.bf16 %v5014_v27, %v5013_v30  ;;  %v4997_v14 = vld [vmem:[%s12913_s6 + $0x770] sm:$0xff]  ;;  %v5665_v27 = vld [vmem:[%s12917_s10] sm:$0xff] }
 0x618   : > { %v9683_v57 = vpack.c.bf16 %v4998_v54, %v4997_v14  ;;  %v5667_v14 = vld [vmem:[%s12917_s10 + $0x10] sm:$0xff]  ;;  %v5668_v54 = vld [vmem:[%s12917_s10 + $0x18] sm:$0xff] }
 0x619   : > { %9604 = vmatpush3.bf16.msra.mxu0 %v9603_v29  ;;  %v4963_v29 = vld [vmem:[%s12913_s6 + $0x660] sm:$0xff] }
 0x61a   : > { %9606 = vmatprep.subr.bf16.mxu0 %v9605_v28  ;;  %v4964_v28 = vld [vmem:[%s12913_s6 + $0x668] sm:$0xff] }
 0x61b   : > { %v9647_v38 = vpack.c.bf16 %v4964_v28, %v4963_v29 }
 0x61d   : > { %9608 = vmatpush3.bf16.msra.mxu0 %v9607_v36  ;;  %v4965_v36 = vld [vmem:[%s12913_s6 + $0x670] sm:$0xff] }
 0x61e   : > { %9610 = vmatprep.subr.bf16.mxu0 %v9609_v20  ;;  %v4966_v20 = vld [vmem:[%s12913_s6 + $0x678] sm:$0xff] }
 0x61f   : > { %v9651_v34 = vpack.c.bf16 %v4966_v20, %v4965_v36 }
 0x621   : > { %9612 = vmatpush3.bf16.msra.mxu0 %v9611_v22  ;;  %v4983_v22 = vld [vmem:[%s12913_s6 + $0x700] sm:$0xff] }
 0x622   : > { %9614 = vmatprep.subr.bf16.mxu0 %v9613_v13  ;;  %v4984_v13 = vld [vmem:[%s12913_s6 + $0x708] sm:$0xff] }
 0x623   : > { %v9655_v53 = vpack.c.bf16 %v4984_v13, %v4983_v22  ;;  %v9979_v22 = vmov 0.0|0.0  }
 0x625   : > { %9616 = vmatpush3.bf16.msra.mxu0 %v9615_v23  ;;  %v4985_v23 = vld [vmem:[%s12913_s6 + $0x710] sm:$0xff] }
 0x626   : > { %9618 = vmatprep.subr.bf16.mxu0 %v9617_v52  ;;  %v4986_v52 = vld [vmem:[%s12913_s6 + $0x718] sm:$0xff] }
 0x629   : > { %9620 = vmatpush3.bf16.msra.mxu0 %v9619_v40  ;;  %v9659_v40 = vpack.c.bf16 %v4986_v52, %v4985_v23  ;;  %v5583_v52 = vld [vmem:[%s12915_s8 + $0x30] sm:$0xff] }
 0x62a   : > { %9622 = vmatprep.subr.bf16.mxu0 %v9621_v45  ;;  %v9661_v45 = vpack.c.bf16 %v5004_v44, %v5003_v56  ;;  %v5585_v44 = vld [vmem:[%s12915_s8 + $0x40] sm:$0xff] }
 0x62c   : > { %5431 = vmatmul.mubr.f32.vlgmr.msra.gmra.mrb[90].mxu0 %v4753_v60  ;;  %v5007_v60 = vld [vmem:[%s12913_s6 + $0x7c0] sm:$0xff] }
 0x62d   : > { %9624 = vmatpush3.bf16.msra.mxu0 %v9623_v5  ;;  %5500 = vmatprep.mubr.f32.mxu0 %v4756_v21  ;;  %v9663_v5 = vpack.c.bf16 %v4988_v7, %v4987_v33  ;;  %v9669_v21 = vpack.c.bf16 %v5008_v62, %v5007_v60  ;;  %v5588_v33 = vld [vmem:[%s12915_s8 + $0x58] sm:$0xff]  ;;  %v9704_v60 = vpack.c.bf16 %v5590_v2, %v5589_v16  ;;  %v5591_v62 = vld [vmem:[%s12915_s8 + $0x70] sm:$0xff] }
 0x62e   : > { %9626 = vmatprep.subr.bf16.mxu0 %v9625_v49  ;;  %v9665_v49 = vpack.c.bf16 %v5006_v59, %v5005_v1 }
 0x631   : > { %9628 = vmatpush3.bf16.msra.mxu0 %v9627_v15  ;;  %v4991_v15 = vld [vmem:[%s12913_s6 + $0x740] sm:$0xff] }
 0x632   : > { %9630 = vmatprep.subr.bf16.mxu0 %v9629_v6  ;;  %v4992_v6 = vld [vmem:[%s12913_s6 + $0x748] sm:$0xff] }
 0x633   : > { %v9671_v39 = vpack.c.bf16 %v4992_v6, %v4991_v15  ;;  %v9981_v15 = vmov 0.0  }
 0x635   : > { %9632 = vmatpush3.bf16.msra.mxu0 %v9631_v42  ;;  %v4993_v42 = vld [vmem:[%s12913_s6 + $0x750] sm:$0xff] }
 0x636   : > { %9634 = vmatprep.subr.bf16.mxu0 %v9633_v11  ;;  %v4994_v11 = vld [vmem:[%s12913_s6 + $0x758] sm:$0xff] }
 0x637   : > { %v9675_v19 = vpack.c.bf16 %v4994_v11, %v4993_v42 }
 0x639   : > { %9636 = vmatpush3.bf16.msra.mxu0 %v9635_v24  ;;  %v4995_v24 = vld [vmem:[%s12913_s6 + $0x760] sm:$0xff] }
 0x63a   : > { %9638 = vmatprep.subr.bf16.mxu0 %v9637_v63  ;;  %v4996_v63 = vld [vmem:[%s12913_s6 + $0x768] sm:$0xff] }
 0x63d   : > { %9640 = vmatpush3.bf16.msra.mxu0 %v9639_v61 }
 0x63e   : > { %9642 = vmatprep.subr.bf16.mxu0 %v9641_v55  ;;  %v9679_v55 = vpack.c.bf16 %v4996_v63, %v4995_v24 }
 0x641   : > { %9644 = vmatpush3.bf16.msra.mxu0 %v9643_v18  ;;  %v4757_v18 = vld [vmem:[#allocation3 + $0xe] sm:$0x1] }
 0x642   : > { %9646 = vmatprep.subr.bf16.mxu0 %v9645_v48  ;;  %v5015_v48 = vld [vmem:[%s12914_s7] sm:$0x1] }
 0x645   : > { %9648 = vmatpush3.bf16.msra.mxu0 %v9647_v38 }
 0x646   : > { %9650 = vmatprep.subr.bf16.mxu0 %v9649_v47 }
 0x649   : > { %9652 = vmatpush3.bf16.msra.mxu0 %v9651_v34  ;;  %v5578_v34 = vld [vmem:[%s12915_s8 + $0x8] sm:$0xff] }
 0x64a   : > { %9654 = vmatprep.subr.bf16.mxu0 %v9653_v12  ;;  %v5579_v12 = vld [vmem:[%s12915_s8 + $0x10] sm:$0xff]  ;;  %v9686_v13 = vpack.c.bf16 %v5578_v34, %v5577_v0  ;;  %v5677_v34 = vld [vmem:[%s12917_s10 + $0x60] sm:$0xff] }
 0x64b   : > { %v9689_v4 = vpack.c.bf16 %v5580_v3, %v5579_v12  ;;  %v5678_v12 = vld [vmem:[%s12917_s10 + $0x68] sm:$0xff]  ;;  %v5679_v3 = vld [vmem:[%s12917_s10 + $0x70] sm:$0xff] }
 0x64c   : > { %5501 = vmatmul.mubr.f32.vlgmr.msra.gmra.mrb[92].mxu0 %v4755_v37  ;;  %v5584_v37 = vld [vmem:[%s12915_s8 + $0x38] sm:$0xff] }
 0x64d   : > { %9656 = vmatpush3.bf16.msra.mxu0 %v9655_v53  ;;  %5570 = vmatprep.mubr.f32.mxu0 %v4758_v32  ;;  %v5581_v53 = vld [vmem:[%s12915_s8 + $0x20] sm:$0xff]  ;;  %v9695_v56 = vpack.c.bf16 %v5584_v37, %v5583_v52  ;;  %v5586_v32 = vld [vmem:[%s12915_s8 + $0x48] sm:$0xff] }
 0x64e   : > { %9658 = vmatprep.subr.bf16.mxu0 %v9657_v8  ;;  %v5582_v8 = vld [vmem:[%s12915_s8 + $0x28] sm:$0xff] }
 0x64f   : > { %v9692_v23 = vpack.c.bf16 %v5582_v8, %v5581_v53  ;;  %v5593_v8 = vld [vmem:[%s12916_s9] sm:$0x1] }
 0x651   : > { %9660 = vmatpush3.bf16.msra.mxu0 %v9659_v40  ;;  %v9698_v40 = vpack.c.bf16 %v5586_v32, %v5585_v44  ;;  %v5681_v32 = vld [vmem:[%s12918_s11] sm:$0x1] }
 0x652   : > { %9662 = vmatprep.subr.bf16.mxu0 %v9661_v45  ;;  %v5587_v45 = vld [vmem:[%s12915_s8 + $0x50] sm:$0xff] }
 0x653   : > { %v9701_v7 = vpack.c.bf16 %v5588_v33, %v5587_v45 }
 0x655   : > { %9664 = vmatpush3.bf16.msra.mxu0 %v9663_v5 }
 0x656   : > { %9666 = vmatprep.subr.bf16.mxu0 %v9665_v49 }
 0x659   : > { %9668 = vmatpush3.bf16.msra.mxu0 %v9667_v35  ;;  %v5592_v35 = vld [vmem:[%s12915_s8 + $0x78] sm:$0xff] }
 0x65a   : > { %9670 = vmatprep.subr.bf16.mxu0 %v9669_v21  ;;  %v9707_v21 = vpack.c.bf16 %v5592_v35, %v5591_v62 }
 0x65d   : > { %9672 = vmatpush3.bf16.msra.mxu0 %v9671_v39 }
 0x65e   : > { %9674 = vmatprep.subr.bf16.mxu0 %v9673_v26 }
 0x65f   : > { %v7009_v58 = vpop.f32.mrb[80].mxu0 }
 0x660   : > { %v7010_v50 = vpop.f32.mrb[81].mxu0 }
 0x661   : > { %v7011_v61 = vadd.f32 %v7010_v50, %v7009_v58  ;;  %9676 = vmatpush3.bf16.msra.mxu0 %v9675_v19  ;;  %v5666_v50 = vld [vmem:[%s12917_s10 + $0x8] sm:$0xff] }
 0x662   : > { %9678 = vmatprep.subr.bf16.mxu0 %v9677_v10 }
 0x663   : > { %v5083_v41 = vadd.f32 %v7011_v61, %v5015_v48  ;;  %v5670_v48 = vld [vmem:[%s12917_s10 + $0x28] sm:$0xff] }
 0x665   : > { %9680 = vmatpush3.bf16.msra.mxu0 %v9679_v55  ;;  %v9710_v55 = vpack.c.bf16 %v5666_v50, %v5665_v27 }
 0x666   : > { %9682 = vmatprep.subr.bf16.mxu0 %v9681_v46 }
 0x669   : > { %9684 = vmatpush3.bf16.msra.mxu0 %v9683_v57  ;;  %v9713_v57 = vpack.c.bf16 %v5668_v54, %v5667_v14 }
 0x66a   : > { %9685 = vmatprep.subr.bf16.mxu0 %v9979_v22 }
 0x66c   : > { %5571 = vmatmul.mubr.f32.vlgmr.msra.gmra.mrb[94].mxu0 %v4757_v18  ;;  %v5669_v18 = vld [vmem:[%s12917_s10 + $0x20] sm:$0xff] }
 0x66d   : > { %9687 = vmatpush3.bf16.msra.mxu0 %v9686_v13  ;;  %8567 = vmatprep.mubr.msk.f32.mxu0 %vm9980_vm2, %v9981_v15  ;;  %v9728_v13 = vpack.c.bf16 %v5678_v12, %v5677_v34 }
 0x66e   : > { %9688 = vmatprep.subr.bf16.mxu0 %v9979_v22 }
 0x671   : > { %9690 = vmatpush3.bf16.msra.mxu0 %v9689_v4  ;;  %v5680_v4 = vld [vmem:[%s12917_s10 + $0x78] sm:$0xff] }
 0x672   : > { %9691 = vmatprep.subr.bf16.mxu0 %v9979_v22  ;;  %v9731_v53 = vpack.c.bf16 %v5680_v4, %v5679_v3 }
 0x675   : > { %9693 = vmatpush3.bf16.msra.mxu0 %v9692_v23 }
 0x676   : > { %9694 = vmatprep.subr.bf16.mxu0 %v9979_v22 }
 0x679   : > { %9696 = vmatpush3.bf16.msra.mxu0 %v9695_v56 }
 0x67a   : > { %9697 = vmatprep.subr.bf16.mxu0 %v9979_v22 }
 0x67d   : > { %9699 = vmatpush3.bf16.msra.mxu0 %v9698_v40 }
 0x67e   : > { %9700 = vmatprep.subr.bf16.mxu0 %v9979_v22 }
 0x67f   : > { %v7044_v29 = vpop.f32.mrb[82].mxu0 }
 0x680   : > { %v7045_v28 = vpop.f32.mrb[83].mxu0 }
 0x681   : > { %v7046_v31 = vadd.f32 %v7045_v28, %v7044_v29  ;;  %9702 = vmatpush3.bf16.msra.mxu0 %v9701_v7  ;;  %v9716_v29 = vpack.c.bf16 %v5670_v48, %v5669_v18  ;;  %v5671_v28 = vld [vmem:[%s12917_s10 + $0x30] sm:$0xff] }
 0x682   : > { %9703 = vmatprep.subr.bf16.mxu0 %v9979_v22 }
 0x683   : > { %v5153_v38 = vadd.f32 %v7046_v31, %v5083_v41  ;;  %v5672_v41 = vld [vmem:[%s12917_s10 + $0x38] sm:$0xff] }
 0x684   : > { %v9719_v31 = vpack.c.bf16 %v5672_v41, %v5671_v28 }
 0x685   : > { %9705 = vmatpush3.bf16.msra.mxu0 %v9704_v60 }
 0x686   : > { %9706 = vmatprep.subr.bf16.mxu0 %v9979_v22 }
 0x689   : > { %9708 = vmatpush3.bf16.msra.mxu0 %v9707_v21 }
 0x68a   : > { %9709 = vmatprep.subr.bf16.mxu0 %v9979_v22 }
 0x69f   : > { %v7079_v47 = vpop.f32.mrb[84].mxu0 }
 0x6a0   : > { %v7080_v36 = vpop.f32.mrb[85].mxu0 }
 0x6a1   : > { %v7081_v20 = vadd.f32 %v7080_v36, %v7079_v47  ;;  %v5674_v47 = vld [vmem:[%s12917_s10 + $0x48] sm:$0xff] }
 0x6a3   : > { %v5223_v17 = vadd.f32 %v7081_v20, %v5153_v38  ;;  %v5673_v38 = vld [vmem:[%s12917_s10 + $0x40] sm:$0xff]  ;;  %v5675_v20 = vld [vmem:[%s12917_s10 + $0x50] sm:$0xff] }
 0x6a4   : > { %v9722_v36 = vpack.c.bf16 %v5674_v47, %v5673_v38 }
 0x6bf   : > { %v7114_v1 = vpop.f32.mrb[86].mxu0 }
 0x6c0   : > { %v7115_v59 = vpop.f32.mrb[87].mxu0 }
 0x6c1   : > { %v7116_v5 = vadd.f32 %v7115_v59, %v7114_v1 }
 0x6c3   : > { %v5293_v49 = vadd.f32 %v7116_v5, %v5223_v17  ;;  %v5676_v17 = vld [vmem:[%s12917_s10 + $0x58] sm:$0xff] }
 0x6c4   : > { %v9725_v0 = vpack.c.bf16 %v5676_v17, %v5675_v20 }
 0x6df   : > { %v7149_v6 = vpop.f32.mrb[88].mxu0 }
 0x6e0   : > { %v7150_v43 = vpop.f32.mrb[89].mxu0 }
 0x6e1   : > { %v7151_v51 = vadd.f32 %v7150_v43, %v7149_v6 }
 0x6e3   : > { %v5363_v39 = vadd.f32 %v7151_v51, %v5293_v49 }
 0x6ff   : > { %v7184_v26 = vpop.f32.mrb[90].mxu0 }
 0x700   : > { %v7185_v42 = vpop.f32.mrb[91].mxu0 }
 0x701   : > { %v7186_v11 = vadd.f32 %v7185_v42, %v7184_v26 }
 0x703   : > { %v5433_v25 = vadd.f32 %v7186_v11, %v5363_v39 }
 0x71f   : > { %v7219_v9 = vpop.f32.mrb[92].mxu0 }
 0x720   : > { %v7220_v19 = vpop.f32.mrb[93].mxu0 }
 0x721   : > { %v7221_v10 = vadd.f32 %v7220_v19, %v7219_v9 }
 0x723   : > { %v5503_v24 = vadd.f32 %v7221_v10, %v5433_v25 }
 0x73f   : > { %v7254_v63 = vpop.f32.mrb[94].mxu0 }
 0x740   : > { %v7255_v58 = vpop.f32.mrb[95].mxu0 }
 0x741   : > { %v7256_v30 = vadd.f32 %v7255_v58, %v7254_v63 }
 0x743   : > { %v5573_v61 = vadd.f32 %v7256_v30, %v5503_v24 }
 0x745   : > { %v5576_v46 = vmax.f32 %v5573_v61, 0.0 }
 0x747   : > { %8568 = vmatmul.mubr.f32.vlgmr.msra.gmra.mrb[96].mxu0 %v5576_v46 }
 0x748   : > { %9711 = vmatpush3.bf16.msra.mxu0 %v9710_v55  ;;  %8602 = vmatprep.mubr.msk.f32.mxu0 %vm9980_vm2, %v9981_v15 }
 0x749   : > { %9712 = vmatprep.subr.bf16.mxu0 %v9979_v22 }
 0x74c   : > { %9714 = vmatpush3.bf16.msra.mxu0 %v9713_v57 }
 0x74d   : > { %9715 = vmatprep.subr.bf16.mxu0 %v9979_v22 }
 0x750   : > { %9717 = vmatpush3.bf16.msra.mxu0 %v9716_v29 }
 0x751   : > { %9718 = vmatprep.subr.bf16.mxu0 %v9979_v22 }
 0x754   : > { %9720 = vmatpush3.bf16.msra.mxu0 %v9719_v31 }
 0x755   : > { %9721 = vmatprep.subr.bf16.mxu0 %v9979_v22 }
 0x758   : > { %9723 = vmatpush3.bf16.msra.mxu0 %v9722_v36 }
 0x759   : > { %9724 = vmatprep.subr.bf16.mxu0 %v9979_v22 }
 0x75c   : > { %9726 = vmatpush3.bf16.msra.mxu0 %v9725_v0 }
 0x75d   : > { %9727 = vmatprep.subr.bf16.mxu0 %v9979_v22 }
 0x760   : > { %9729 = vmatpush3.bf16.msra.mxu0 %v9728_v13 }
 0x761   : > { %9730 = vmatprep.subr.bf16.mxu0 %v9979_v22  ;;  %v5752_v22 = vlaneseq }
 0x763   : > { %v5753_v44 = vshrl.u32 %v5752_v22, 7 }
 0x764   : > { %9732 = vmatpush3.bf16.msra.mxu0 %v9731_v53 }
 0x765   : > { %v5754_v40 = vsub.s32 0, %v5753_v44 }
 0x81a   : > { %v5660_v23 = vpop.f32.mrb[96].mxu0 }
 0x81b   : > { %v5661_v52 = vadd.f32 %v5660_v23, %v5593_v8  ;;  %v8569_v37 = vpop.f32.mrb[97].mxu0 }
 0x81d   : > { %v5664_v56 = vmax.f32 %v5661_v52, 0.0 }
 0x81f   : > { %8603 = vmatmul.mubr.f32.vlgmr.msra.gmra.mrb[98].mxu0 %v5664_v56 }
 0x8f2   : > { %v5748_v45 = vpop.f32.mrb[98].mxu0 }
 0x8f3   : > { %v5749_v33 = vadd.f32 %v5748_v45, %v5681_v32  ;;  %v8604_v7 = vpop.f32.mrb[99].mxu0 }
 0x8f5   : > { %v5755_v1 = vrot.slane %v5749_v33, %v5754_v40 }
 0x8f7   : > { %5756 = vst [vmem:[%s411_s14] sm:$0xff] %v5755_v1 }
 0x8f8 PF: > { %s22_s21 = sadd.s32 1, %s9977_s21  }
 0x8f9   : > { %p19_p4 = scmp.ge.s32.totalorder %s22_s21, 4  }
 0x8fb   :  { %21 = sbr.rel (!%p19_p4) target bundleno = 1 (0x1), region = 122 }

</bundles_post_ra>
